<compile_context>
chip_gen: v7x
topology: tpu7x:2x2x1
jax: 0.10.0
libtpu: 0.0.40
codegen_flags: <defaults>
</compile_context>

<pallas_src>
import functools
import math

import jax
import jax.numpy as jnp
from jax.experimental import pallas as pl
from jax.experimental.pallas import tpu as pltpu

# Set to jnp.bfloat16 on v6e / v7x to feed the MXU at native precision
# (accumulation stays float32; LayerNorm / softmax statistics stay float32).
# Default float32 keeps exact parity with the PyTorch reference numerics.
MXU_DTYPE = jnp.float32


def _mm(a, b):
    # (M, K) @ (K, N) with f32 accumulation.
    return jnp.dot(a.astype(MXU_DTYPE), b.astype(MXU_DTYPE),
                   preferred_element_type=jnp.float32)


def _mm_nt(a, b):
    # (M, K) x (N, K) -> (M, N)  == a @ b.T without an explicit transpose.
    return jax.lax.dot_general(
        a.astype(MXU_DTYPE), b.astype(MXU_DTYPE),
        (((1,), (1,)), ((), ())), preferred_element_type=jnp.float32)


# ----------------------- in-kernel building blocks (on values) -----------------------

def _attention(xq, xk, xv, mask, wqb, wkb, wvb, wot, bo, *, heads, scale):
    """Multi-head self/cross attention on one batch element.

    xq: (Lq, E), xk/xv: (Lk, E); mask: (1, Lk) or (Lq, Lk) (0/1 floats);
    wqb/wkb/wvb: (E, E) block-diagonal per-head projections (pre-transposed);
    wot: (E, E) = Wo.T; bo: (1, E).
    """
    E = xq.shape[-1]
    hd = E // heads
    # Fused q/k/v projections: one (L,E)x(E,E) GEMM each instead of H tiny ones.
    # Softmax scale folded into q (masked -1e20 logits stay huge-negative either way).
    q = _mm(xq, wqb) * jnp.float32(scale)
    k = _mm(xk, wkb)
    v = _mm(xv, wvb)
    masked = (mask == 0.0)                       # hoisted out of the head loop
    outs = []
    for h in range(heads):                       # static unroll, tiny H
        sl = slice(h * hd, (h + 1) * hd)
        e = _mm_nt(q[:, sl], k[:, sl])           # (Lq, Lk)
        e = jnp.where(masked, jnp.float32(-1e20), e)
        e = e - jnp.max(e, axis=-1, keepdims=True)
        p = jnp.exp(e)
        p = p * pl.reciprocal(jnp.sum(p, axis=-1, keepdims=True), approx=True)
        outs.append(_mm(p, v[:, sl]))            # (Lq, hd)
    att = jnp.concatenate(outs, axis=-1)         # (Lq, E) lane-dense
    return _mm(att, wot) + bo


def _add_layernorm(a, b, g, beta, *, eps):
    x = a + b
    mu = jnp.mean(x, axis=-1, keepdims=True)
    var = jnp.mean(jnp.square(x - mu), axis=-1, keepdims=True)
    return (x - mu) * jax.lax.rsqrt(var + eps) * g + beta


def _ffn(x, w1t, b1, w2t, b2):
    h = jnp.maximum(_mm(x, w1t) + b1, 0.0)
    return _mm(h, w2t) + b2


# ----------------------------- fused Pallas kernels -----------------------------

def _encoder_block_kernel(x_ref, m_ref,
                          wqb, wkb, wvb, wot, bo,
                          g1, be1, w1t, bf1, w2t, bf2, g2, be2,
                          o_ref, *, heads, scale, eps):
    x = x_ref[0]                                  # (L, E)
    att = _attention(x, x, x, m_ref[0], wqb[...], wkb[...], wvb[...],
                     wot[...], bo[...], heads=heads, scale=scale)
    h1 = _add_layernorm(att, x, g1[...], be1[...], eps=eps)
    ff = _ffn(h1, w1t[...], bf1[...], w2t[...], bf2[...])
    o_ref[0] = _add_layernorm(ff, h1, g2[...], be2[...], eps=eps)


def _decoder_block_kernel(x_ref, enc_ref, tmask_ref, smask_ref,
                          s_wqb, s_wkb, s_wvb, s_wot, s_bo, s_g, s_b,
                          t_wqb, t_wkb, t_wvb, t_wot, t_bo,
                          g1, be1, w1t, bf1, w2t, bf2, g2, be2,
                          o_ref, *, heads, scale, eps):
    x = x_ref[0]                                  # (Lt, E)
    enc = enc_ref[0]                              # (Ls, E)
    # masked self-attention + add & LN
    att = _attention(x, x, x, tmask_ref[0], s_wqb[...], s_wkb[...], s_wvb[...],
                     s_wot[...], s_bo[...], heads=heads, scale=scale)
    query = _add_layernorm(att, x, s_g[...], s_b[...], eps=eps)
    # cross-attention (keys/values from the encoder) + add & LN + FFN + add & LN
    att2 = _attention(query, enc, enc, smask_ref[0], t_wqb[...], t_wkb[...],
                      t_wvb[...], t_wot[...], t_bo[...], heads=heads, scale=scale)
    x1 = _add_layernorm(att2, query, g1[...], be1[...], eps=eps)
    ff = _ffn(x1, w1t[...], bf1[...], w2t[...], bf2[...])
    o_ref[0] = _add_layernorm(ff, x1, g2[...], be2[...], eps=eps)


def _linear_kernel(x_ref, wt_ref, b_ref, o_ref):
    o_ref[0] = _mm(x_ref[0], wt_ref[...]) + b_ref[...]


# ----------------------------- kernel wrappers -----------------------------

def _w_spec(a):
    zeros = (0,) * a.ndim
    return pl.BlockSpec(a.shape, lambda n, z=zeros: z)   # resident across grid steps


def _tblock_weights(p):
    a = p['attn']
    return [a['wqb'], a['wkb'], a['wvb'], a['wot'], a['bo'],
            p['ln1_g'], p['ln1_b'],
            p['w1t'], p['b1'], p['w2t'], p['b2'],
            p['ln2_g'], p['ln2_b']]


def encoder_block(p, x, mask, heads, scale):
    N, L, E = x.shape
    ws = _tblock_weights(p)
    kern = functools.partial(_encoder_block_kernel, heads=heads, scale=scale, eps=1e-5)
    return pl.pallas_call(
        kern,
        out_shape=jax.ShapeDtypeStruct((N, L, E), jnp.float32),
        grid=(N,),
        in_specs=[pl.BlockSpec((1, L, E), lambda n: (n, 0, 0)),
                  pl.BlockSpec((1, 1, L), lambda n: (n, 0, 0))]
                 + [_w_spec(w) for w in ws],
        out_specs=pl.BlockSpec((1, L, E), lambda n: (n, 0, 0)),
        compiler_params=pltpu.CompilerParams(dimension_semantics=("parallel",)),
    )(x, mask, *ws)


def decoder_block(p, x, enc_out, src_mask, tgt_mask, heads, scale):
    N, Lt, E = x.shape
    Ls = enc_out.shape[1]
    a = p['attn']
    ws = [a['wqb'], a['wkb'], a['wvb'], a['wot'], a['bo'], p['ln_g'], p['ln_b']] \
        + _tblock_weights(p['tb'])
    kern = functools.partial(_decoder_block_kernel, heads=heads, scale=scale, eps=1e-5)
    return pl.pallas_call(
        kern,
        out_shape=jax.ShapeDtypeStruct((N, Lt, E), jnp.float32),
        grid=(N,),
        in_specs=[pl.BlockSpec((1, Lt, E), lambda n: (n, 0, 0)),
                  pl.BlockSpec((1, Ls, E), lambda n: (n, 0, 0)),
                  pl.BlockSpec((1, Lt, Lt), lambda n: (0, 0, 0)),
                  pl.BlockSpec((1, 1, Ls), lambda n: (n, 0, 0))]
                 + [_w_spec(w) for w in ws],
        out_specs=pl.BlockSpec((1, Lt, E), lambda n: (n, 0, 0)),
        compiler_params=pltpu.CompilerParams(dimension_semantics=("parallel",)),
    )(x, enc_out, tgt_mask, src_mask, *ws)


def linear3d(x, wt, b):
    # x: (N, L, E), wt: (E, V) pre-transposed, b: (1, V)
    N, L, E = x.shape
    V = wt.shape[1]
    return pl.pallas_call(
        _linear_kernel,
        out_shape=jax.ShapeDtypeStruct((N, L, V), jnp.float32),
        grid=(N,),
        in_specs=[pl.BlockSpec((1, L, E), lambda n: (n, 0, 0)),
                  pl.BlockSpec((E, V), lambda n: (0, 0)),
                  pl.BlockSpec((1, V), lambda n: (0, 0))],
        out_specs=pl.BlockSpec((1, L, V), lambda n: (n, 0, 0)),
        compiler_params=pltpu.CompilerParams(dimension_semantics=("parallel",)),
    )(x, wt, b)


# ----------------------------- model forward -----------------------------

def encoder_fwd(p, tokens, mask, heads):
    N, L = tokens.shape
    enc_in = p['word_emb'][tokens] + p['pos_emb'][jnp.arange(L)][None, :, :]
    E = enc_in.shape[-1]
    # Reference bug: every layer consumes `enc_in`, so only the LAST layer's
    # output is live -> running only that layer gives an identical result.
    return encoder_block(p['layers'][-1], enc_in, mask, heads, 1.0 / math.sqrt(E))


def decoder_fwd(p, tokens, enc_out, src_mask, tgt_mask, heads):
    N, L = tokens.shape
    x = p['word_emb'][tokens] + p['pos_emb'][jnp.arange(L)][None, :, :]
    E = x.shape[-1]
    scale = 1.0 / math.sqrt(E)
    for lp in p['layers']:
        x = decoder_block(lp, x, enc_out, src_mask, tgt_mask, heads, scale)
    return linear3d(x, p['fc_wt'], p['fc_b'])


@functools.partial(jax.jit, static_argnames=("heads",))
def transformer_fwd(params, inp, outp, input_pad, *, heads):
    Lt = outp.shape[1]
    src_mask = (inp != input_pad).astype(jnp.float32)[:, None, :]     # (N, 1, Ls)
    tgt_mask = jnp.tril(jnp.ones((Lt, Lt), jnp.float32))[None]        # (1, Lt, Lt)
    enc_out = encoder_fwd(params['encoder'], inp, src_mask, heads)
    return decoder_fwd(params['decoder'], outp, enc_out, src_mask, tgt_mask, heads)


# ----------------------------- deterministic params -----------------------------
# Weights are stored in kernel-ready layout:
#   * wqb/wkb/wvb: (E,E) = kron(I_heads, W.T) of the shared per-head (hd,hd) Linear
#   * wot / w1t / w2t / fc_wt: pre-transposed so kernels compute plain x @ W
#   * biases / LN params stored as (1, features)

def _dense(key, out_f, in_f, scale=0.05):
    return scale * jax.random.normal(key, (out_f, in_f), jnp.float32)


def init_attn(key, E, heads):
    hd = E // heads
    ks = jax.random.split(key, 5)
    wq, wk, wv = _dense(ks[0], hd, hd), _dense(ks[1], hd, hd), _dense(ks[2], hd, hd)
    wo = _dense(ks[3], E, E)
    eye = jnp.eye(heads, dtype=jnp.float32)
    return dict(wqb=jnp.kron(eye, wq.T), wkb=jnp.kron(eye, wk.T),
                wvb=jnp.kron(eye, wv.T), wot=wo.T,
                bo=(0.01 * jax.random.normal(ks[4], (E,), jnp.float32)).reshape(1, E))


def init_tblock(key, E, heads, fe):
    ks = jax.random.split(key, 5)
    H = fe * E
    return dict(
        attn=init_attn(ks[0], E, heads),
        ln1_g=jnp.ones((1, E), jnp.float32), ln1_b=jnp.zeros((1, E), jnp.float32),
        ln2_g=jnp.ones((1, E), jnp.float32), ln2_b=jnp.zeros((1, E), jnp.float32),
        w1t=_dense(ks[1], H, E).T,
        b1=(0.01 * jax.random.normal(ks[2], (H,), jnp.float32)).reshape(1, H),
        w2t=_dense(ks[3], E, H).T,
        b2=(0.01 * jax.random.normal(ks[4], (E,), jnp.float32)).reshape(1, E))


def init_dblock(key, E, heads, fe):
    ks = jax.random.split(key, 2)
    return dict(attn=init_attn(ks[0], E, heads),
                ln_g=jnp.ones((1, E), jnp.float32), ln_b=jnp.zeros((1, E), jnp.float32),
                tb=init_tblock(ks[1], E, heads, fe))


def init_params(key, in_vocab, out_vocab, E, num_layers, heads, fe, max_len):
    keys = jax.random.split(key, 8)
    enc_layers = [init_tblock(k, E, heads, fe)
                  for k in jax.random.split(keys[0], num_layers)]
    dec_layers = [init_dblock(k, E, heads, fe)
                  for k in jax.random.split(keys[1], num_layers)]
    fc_w = _dense(keys[6], out_vocab, E)
    return dict(
        encoder=dict(word_emb=0.1 * jax.random.normal(keys[2], (in_vocab, E), jnp.float32),
                     pos_emb=0.1 * jax.random.normal(keys[3], (max_len, E), jnp.float32),
                     layers=enc_layers),
        decoder=dict(word_emb=0.1 * jax.random.normal(keys[4], (out_vocab, E), jnp.float32),
                     pos_emb=0.1 * jax.random.normal(keys[5], (max_len, E), jnp.float32),
                     layers=dec_layers,
                     fc_wt=fc_w.T,
                     fc_b=(0.01 * jax.random.normal(keys[7], (out_vocab,),
                                                    jnp.float32)).reshape(1, out_vocab)))


# ----------------------------- main -----------------------------

if __name__ == "__main__":
    IN_VOCAB, OUT_VOCAB = 20, 20
    E, LAYERS, HEADS, FE, MAX_LEN = 32, 2, 4, 4, 16
    INPUT_PAD = 0
    N, Ls, Lt = 2, 8, 8

    root = jax.random.PRNGKey(0)
    pk, ik, ok = jax.random.split(root, 3)
    params = init_params(pk, IN_VOCAB, OUT_VOCAB, E, LAYERS, HEADS, FE, MAX_LEN)

    inp = jax.random.randint(ik, (N, Ls), 1, IN_VOCAB, dtype=jnp.int32)
    outp = jax.random.randint(ok, (N, Lt), 1, OUT_VOCAB, dtype=jnp.int32)
    inp = inp.at[:, -2:].set(INPUT_PAD)   # exercise the input padding mask

    # TODO(synk): nn.Embedding token gather stays as XLA take (a DMA-gather
    # Pallas kernel is not worthwhile at these shapes).
    logits = transformer_fwd(params, inp, outp, INPUT_PAD, heads=HEADS)
    jax.block_until_ready(logits)
    assert logits.shape == (N, Lt, OUT_VOCAB), logits.shape
    assert bool(jnp.all(jnp.isfinite(logits)))
    print("KERNEL_OK")
</pallas_src>

<mosaic_0001>
module attributes {stable_mosaic.version = 11 : i64} {
  func.func @_decoder_block_kernel(%arg0: i32, %arg1: memref<1x8x32xf32, #tpu.memory_space<vmem>>, %arg2: memref<1x8x32xf32, #tpu.memory_space<vmem>>, %arg3: memref<1x8x8xf32, #tpu.memory_space<vmem>>, %arg4: memref<1x1x8xf32, #tpu.memory_space<vmem>>, %arg5: memref<32x32xf32, #tpu.memory_space<vmem>>, %arg6: memref<32x32xf32, #tpu.memory_space<vmem>>, %arg7: memref<32x32xf32, #tpu.memory_space<vmem>>, %arg8: memref<32x32xf32, #tpu.memory_space<vmem>>, %arg9: memref<1x32xf32, #tpu.memory_space<vmem>>, %arg10: memref<1x32xf32, #tpu.memory_space<vmem>>, %arg11: memref<1x32xf32, #tpu.memory_space<vmem>>, %arg12: memref<32x32xf32, #tpu.memory_space<vmem>>, %arg13: memref<32x32xf32, #tpu.memory_space<vmem>>, %arg14: memref<32x32xf32, #tpu.memory_space<vmem>>, %arg15: memref<32x32xf32, #tpu.memory_space<vmem>>, %arg16: memref<1x32xf32, #tpu.memory_space<vmem>>, %arg17: memref<1x32xf32, #tpu.memory_space<vmem>>, %arg18: memref<1x32xf32, #tpu.memory_space<vmem>>, %arg19: memref<32x128xf32, #tpu.memory_space<vmem>>, %arg20: memref<1x128xf32, #tpu.memory_space<vmem>>, %arg21: memref<128x32xf32, #tpu.memory_space<vmem>>, %arg22: memref<1x32xf32, #tpu.memory_space<vmem>>, %arg23: memref<1x32xf32, #tpu.memory_space<vmem>>, %arg24: memref<1x32xf32, #tpu.memory_space<vmem>>, %arg25: memref<1x8x32xf32, #tpu.memory_space<vmem>>) attributes {dimension_semantics = [#tpu.dimension_semantics<parallel>], iteration_bounds = array<i64: 2>, scalar_prefetch = 0 : i64, scratch_operands = 0 : i64, tpu.core_type = #tpu.core_type<tc>, window_params = [{transform_indices = @transform_0, window_bounds = array<i64: 1, 8, 32>}, {transform_indices = @transform_1, window_bounds = array<i64: 1, 8, 32>}, {pipeline_mode = #tpu.pipeline_mode<synchronous>, transform_indices = @transform_2, window_bounds = array<i64: 1, 8, 8>}, {transform_indices = @transform_3, window_bounds = array<i64: 1, 1, 8>}, {pipeline_mode = #tpu.pipeline_mode<synchronous>, transform_indices = @transform_4, window_bounds = array<i64: 32, 32>}, {pipeline_mode = #tpu.pipeline_mode<synchronous>, transform_indices = @transform_5, window_bounds = array<i64: 32, 32>}, {pipeline_mode = #tpu.pipeline_mode<synchronous>, transform_indices = @transform_6, window_bounds = array<i64: 32, 32>}, {pipeline_mode = #tpu.pipeline_mode<synchronous>, transform_indices = @transform_7, window_bounds = array<i64: 32, 32>}, {pipeline_mode = #tpu.pipeline_mode<synchronous>, transform_indices = @transform_8, window_bounds = array<i64: 1, 32>}, {pipeline_mode = #tpu.pipeline_mode<synchronous>, transform_indices = @transform_9, window_bounds = array<i64: 1, 32>}, {pipeline_mode = #tpu.pipeline_mode<synchronous>, transform_indices = @transform_10, window_bounds = array<i64: 1, 32>}, {pipeline_mode = #tpu.pipeline_mode<synchronous>, transform_indices = @transform_11, window_bounds = array<i64: 32, 32>}, {pipeline_mode = #tpu.pipeline_mode<synchronous>, transform_indices = @transform_12, window_bounds = array<i64: 32, 32>}, {pipeline_mode = #tpu.pipeline_mode<synchronous>, transform_indices = @transform_13, window_bounds = array<i64: 32, 32>}, {pipeline_mode = #tpu.pipeline_mode<synchronous>, transform_indices = @transform_14, window_bounds = array<i64: 32, 32>}, {pipeline_mode = #tpu.pipeline_mode<synchronous>, transform_indices = @transform_15, window_bounds = array<i64: 1, 32>}, {pipeline_mode = #tpu.pipeline_mode<synchronous>, transform_indices = @transform_16, window_bounds = array<i64: 1, 32>}, {pipeline_mode = #tpu.pipeline_mode<synchronous>, transform_indices = @transform_17, window_bounds = array<i64: 1, 32>}, {pipeline_mode = #tpu.pipeline_mode<synchronous>, transform_indices = @transform_18, window_bounds = array<i64: 32, 128>}, {pipeline_mode = #tpu.pipeline_mode<synchronous>, transform_indices = @transform_19, window_bounds = array<i64: 1, 128>}, {pipeline_mode = #tpu.pipeline_mode<synchronous>, transform_indices = @transform_20, window_bounds = array<i64: 128, 32>}, {pipeline_mode = #tpu.pipeline_mode<synchronous>, transform_indices = @transform_21, window_bounds = array<i64: 1, 32>}, {pipeline_mode = #tpu.pipeline_mode<synchronous>, transform_indices = @transform_22, window_bounds = array<i64: 1, 32>}, {pipeline_mode = #tpu.pipeline_mode<synchronous>, transform_indices = @transform_23, window_bounds = array<i64: 1, 32>}, {transform_indices = @transform_24, window_bounds = array<i64: 1, 8, 32>}]} {
    %c0 = arith.constant 0 : index
    %c0_0 = arith.constant 0 : index
    %c0_1 = arith.constant 0 : index
    %0 = vector.load %arg1[%c0, %c0_0, %c0_1] : memref<1x8x32xf32, #tpu.memory_space<vmem>>, vector<1x8x32xf32>
    %1 = vector.shape_cast %0 : vector<1x8x32xf32> to vector<8x32xf32>
    %c0_2 = arith.constant 0 : index
    %c0_3 = arith.constant 0 : index
    %c0_4 = arith.constant 0 : index
    %2 = vector.load %arg2[%c0_2, %c0_3, %c0_4] : memref<1x8x32xf32, #tpu.memory_space<vmem>>, vector<1x8x32xf32>
    %3 = vector.shape_cast %2 : vector<1x8x32xf32> to vector<8x32xf32>
    %c0_5 = arith.constant 0 : index
    %c0_6 = arith.constant 0 : index
    %c0_7 = arith.constant 0 : index
    %4 = vector.load %arg3[%c0_5, %c0_6, %c0_7] : memref<1x8x8xf32, #tpu.memory_space<vmem>>, vector<1x8x8xf32>
    %5 = vector.shape_cast %4 : vector<1x8x8xf32> to vector<8x8xf32>
    %c0_8 = arith.constant 0 : index
    %c0_9 = arith.constant 0 : index
    %6 = vector.load %arg5[%c0_8, %c0_9] : memref<32x32xf32, #tpu.memory_space<vmem>>, vector<32x32xf32>
    %c0_10 = arith.constant 0 : index
    %c0_11 = arith.constant 0 : index
    %7 = vector.load %arg6[%c0_10, %c0_11] : memref<32x32xf32, #tpu.memory_space<vmem>>, vector<32x32xf32>
    %c0_12 = arith.constant 0 : index
    %c0_13 = arith.constant 0 : index
    %8 = vector.load %arg7[%c0_12, %c0_13] : memref<32x32xf32, #tpu.memory_space<vmem>>, vector<32x32xf32>
    %c0_14 = arith.constant 0 : index
    %c0_15 = arith.constant 0 : index
    %9 = vector.load %arg8[%c0_14, %c0_15] : memref<32x32xf32, #tpu.memory_space<vmem>>, vector<32x32xf32>
    %c0_16 = arith.constant 0 : index
    %c0_17 = arith.constant 0 : index
    %10 = vector.load %arg9[%c0_16, %c0_17] : memref<1x32xf32, #tpu.memory_space<vmem>>, vector<1x32xf32>
    %cst = arith.constant dense<0.000000e+00> : vector<8x32xf32>
    %11 = tpu.matmul %1, %6, %cst {dimension_numbers = #tpu.dot_dimension_numbers<[1], [0], [0], [1], [0, 0, 1, 1], [], []>} : vector<8x32xf32>, vector<32x32xf32>, vector<8x32xf32> -> vector<8x32xf32>
    %cst_18 = arith.constant 0.176776692 : f32
    %12 = vector.broadcast %cst_18 : f32 to vector<8x32xf32>
    %13 = arith.mulf %11, %12 : vector<8x32xf32>
    %cst_19 = arith.constant dense<0.000000e+00> : vector<8x32xf32>
    %14 = tpu.matmul %1, %7, %cst_19 {dimension_numbers = #tpu.dot_dimension_numbers<[1], [0], [0], [1], [0, 0, 1, 1], [], []>} : vector<8x32xf32>, vector<32x32xf32>, vector<8x32xf32> -> vector<8x32xf32>
    %cst_20 = arith.constant dense<0.000000e+00> : vector<8x32xf32>
    %15 = tpu.matmul %1, %8, %cst_20 {dimension_numbers = #tpu.dot_dimension_numbers<[1], [0], [0], [1], [0, 0, 1, 1], [], []>} : vector<8x32xf32>, vector<32x32xf32>, vector<8x32xf32> -> vector<8x32xf32>
    %cst_21 = arith.constant 0.000000e+00 : f32
    %16 = vector.broadcast %cst_21 : f32 to vector<8x8xf32>
    %17 = arith.cmpf oeq, %5, %16 : vector<8x8xf32>
    %18 = vector.extract_strided_slice %13 {offsets = [0, 0], sizes = [8, 8], strides = [1, 1]} : vector<8x32xf32> to vector<8x8xf32>
    %19 = vector.extract_strided_slice %14 {offsets = [0, 0], sizes = [8, 8], strides = [1, 1]} : vector<8x32xf32> to vector<8x8xf32>
    %cst_22 = arith.constant dense<0.000000e+00> : vector<8x8xf32>
    %20 = tpu.matmul %18, %19, %cst_22 {dimension_numbers = #tpu.dot_dimension_numbers<[1], [1], [0], [0], [0, 0, 1, 0], [], []>} : vector<8x8xf32>, vector<8x8xf32>, vector<8x8xf32> -> vector<8x8xf32>
    %cst_23 = arith.constant -1.000000e+20 : f32
    %21 = vector.broadcast %cst_23 : f32 to vector<8x8xf32>
    %22 = arith.select %17, %21, %20 : vector<8x8xi1>, vector<8x8xf32>
    %cst_24 = arith.constant dense<0xFF800000> : vector<8xf32>
    %23 = vector.multi_reduction <maximumf>, %22, %cst_24 [1] : vector<8x8xf32> to vector<8xf32>
    %24 = vector.shape_cast %23 : vector<8xf32> to vector<8x1xf32>
    %25 = vector.broadcast %24 : vector<8x1xf32> to vector<8x8xf32>
    %26 = arith.subf %22, %25 : vector<8x8xf32>
    %27 = math.exp %26 : vector<8x8xf32>
    %cst_25 = arith.constant dense<0.000000e+00> : vector<8xf32>
    %28 = vector.multi_reduction <add>, %27, %cst_25 [1] : vector<8x8xf32> to vector<8xf32>
    %29 = vector.shape_cast %28 : vector<8xf32> to vector<8x1xf32>
    %30 = tpu.reciprocal %29 {approx = true} : vector<8x1xf32> -> vector<8x1xf32>
    %31 = vector.broadcast %30 : vector<8x1xf32> to vector<8x8xf32>
    %32 = arith.mulf %27, %31 : vector<8x8xf32>
    %33 = vector.extract_strided_slice %15 {offsets = [0, 0], sizes = [8, 8], strides = [1, 1]} : vector<8x32xf32> to vector<8x8xf32>
    %cst_26 = arith.constant dense<0.000000e+00> : vector<8x8xf32>
    %34 = tpu.matmul %32, %33, %cst_26 {dimension_numbers = #tpu.dot_dimension_numbers<[1], [0], [0], [1], [0, 0, 1, 1], [], []>} : vector<8x8xf32>, vector<8x8xf32>, vector<8x8xf32> -> vector<8x8xf32>
    %35 = vector.extract_strided_slice %13 {offsets = [0, 8], sizes = [8, 8], strides = [1, 1]} : vector<8x32xf32> to vector<8x8xf32>
    %36 = vector.extract_strided_slice %14 {offsets = [0, 8], sizes = [8, 8], strides = [1, 1]} : vector<8x32xf32> to vector<8x8xf32>
    %cst_27 = arith.constant dense<0.000000e+00> : vector<8x8xf32>
    %37 = tpu.matmul %35, %36, %cst_27 {dimension_numbers = #tpu.dot_dimension_numbers<[1], [1], [0], [0], [0, 0, 1, 0], [], []>} : vector<8x8xf32>, vector<8x8xf32>, vector<8x8xf32> -> vector<8x8xf32>
    %cst_28 = arith.constant -1.000000e+20 : f32
    %38 = vector.broadcast %cst_28 : f32 to vector<8x8xf32>
    %39 = arith.select %17, %38, %37 : vector<8x8xi1>, vector<8x8xf32>
    %cst_29 = arith.constant dense<0xFF800000> : vector<8xf32>
    %40 = vector.multi_reduction <maximumf>, %39, %cst_29 [1] : vector<8x8xf32> to vector<8xf32>
    %41 = vector.shape_cast %40 : vector<8xf32> to vector<8x1xf32>
    %42 = vector.broadcast %41 : vector<8x1xf32> to vector<8x8xf32>
    %43 = arith.subf %39, %42 : vector<8x8xf32>
    %44 = math.exp %43 : vector<8x8xf32>
    %cst_30 = arith.constant dense<0.000000e+00> : vector<8xf32>
    %45 = vector.multi_reduction <add>, %44, %cst_30 [1] : vector<8x8xf32> to vector<8xf32>
    %46 = vector.shape_cast %45 : vector<8xf32> to vector<8x1xf32>
    %47 = tpu.reciprocal %46 {approx = true} : vector<8x1xf32> -> vector<8x1xf32>
    %48 = vector.broadcast %47 : vector<8x1xf32> to vector<8x8xf32>
    %49 = arith.mulf %44, %48 : vector<8x8xf32>
    %50 = vector.extract_strided_slice %15 {offsets = [0, 8], sizes = [8, 8], strides = [1, 1]} : vector<8x32xf32> to vector<8x8xf32>
    %cst_31 = arith.constant dense<0.000000e+00> : vector<8x8xf32>
    %51 = tpu.matmul %49, %50, %cst_31 {dimension_numbers = #tpu.dot_dimension_numbers<[1], [0], [0], [1], [0, 0, 1, 1], [], []>} : vector<8x8xf32>, vector<8x8xf32>, vector<8x8xf32> -> vector<8x8xf32>
    %52 = vector.extract_strided_slice %13 {offsets = [0, 16], sizes = [8, 8], strides = [1, 1]} : vector<8x32xf32> to vector<8x8xf32>
    %53 = vector.extract_strided_slice %14 {offsets = [0, 16], sizes = [8, 8], strides = [1, 1]} : vector<8x32xf32> to vector<8x8xf32>
    %cst_32 = arith.constant dense<0.000000e+00> : vector<8x8xf32>
    %54 = tpu.matmul %52, %53, %cst_32 {dimension_numbers = #tpu.dot_dimension_numbers<[1], [1], [0], [0], [0, 0, 1, 0], [], []>} : vector<8x8xf32>, vector<8x8xf32>, vector<8x8xf32> -> vector<8x8xf32>
    %cst_33 = arith.constant -1.000000e+20 : f32
    %55 = vector.broadcast %cst_33 : f32 to vector<8x8xf32>
    %56 = arith.select %17, %55, %54 : vector<8x8xi1>, vector<8x8xf32>
    %cst_34 = arith.constant dense<0xFF800000> : vector<8xf32>
    %57 = vector.multi_reduction <maximumf>, %56, %cst_34 [1] : vector<8x8xf32> to vector<8xf32>
    %58 = vector.shape_cast %57 : vector<8xf32> to vector<8x1xf32>
    %59 = vector.broadcast %58 : vector<8x1xf32> to vector<8x8xf32>
    %60 = arith.subf %56, %59 : vector<8x8xf32>
    %61 = math.exp %60 : vector<8x8xf32>
    %cst_35 = arith.constant dense<0.000000e+00> : vector<8xf32>
    %62 = vector.multi_reduction <add>, %61, %cst_35 [1] : vector<8x8xf32> to vector<8xf32>
    %63 = vector.shape_cast %62 : vector<8xf32> to vector<8x1xf32>
    %64 = tpu.reciprocal %63 {approx = true} : vector<8x1xf32> -> vector<8x1xf32>
    %65 = vector.broadcast %64 : vector<8x1xf32> to vector<8x8xf32>
    %66 = arith.mulf %61, %65 : vector<8x8xf32>
    %67 = vector.extract_strided_slice %15 {offsets = [0, 16], sizes = [8, 8], strides = [1, 1]} : vector<8x32xf32> to vector<8x8xf32>
    %cst_36 = arith.constant dense<0.000000e+00> : vector<8x8xf32>
    %68 = tpu.matmul %66, %67, %cst_36 {dimension_numbers = #tpu.dot_dimension_numbers<[1], [0], [0], [1], [0, 0, 1, 1], [], []>} : vector<8x8xf32>, vector<8x8xf32>, vector<8x8xf32> -> vector<8x8xf32>
    %69 = vector.extract_strided_slice %13 {offsets = [0, 24], sizes = [8, 8], strides = [1, 1]} : vector<8x32xf32> to vector<8x8xf32>
    %70 = vector.extract_strided_slice %14 {offsets = [0, 24], sizes = [8, 8], strides = [1, 1]} : vector<8x32xf32> to vector<8x8xf32>
    %cst_37 = arith.constant dense<0.000000e+00> : vector<8x8xf32>
    %71 = tpu.matmul %69, %70, %cst_37 {dimension_numbers = #tpu.dot_dimension_numbers<[1], [1], [0], [0], [0, 0, 1, 0], [], []>} : vector<8x8xf32>, vector<8x8xf32>, vector<8x8xf32> -> vector<8x8xf32>
    %cst_38 = arith.constant -1.000000e+20 : f32
    %72 = vector.broadcast %cst_38 : f32 to vector<8x8xf32>
    %73 = arith.select %17, %72, %71 : vector<8x8xi1>, vector<8x8xf32>
    %cst_39 = arith.constant dense<0xFF800000> : vector<8xf32>
    %74 = vector.multi_reduction <maximumf>, %73, %cst_39 [1] : vector<8x8xf32> to vector<8xf32>
    %75 = vector.shape_cast %74 : vector<8xf32> to vector<8x1xf32>
    %76 = vector.broadcast %75 : vector<8x1xf32> to vector<8x8xf32>
    %77 = arith.subf %73, %76 : vector<8x8xf32>
    %78 = math.exp %77 : vector<8x8xf32>
    %cst_40 = arith.constant dense<0.000000e+00> : vector<8xf32>
    %79 = vector.multi_reduction <add>, %78, %cst_40 [1] : vector<8x8xf32> to vector<8xf32>
    %80 = vector.shape_cast %79 : vector<8xf32> to vector<8x1xf32>
    %81 = tpu.reciprocal %80 {approx = true} : vector<8x1xf32> -> vector<8x1xf32>
    %82 = vector.broadcast %81 : vector<8x1xf32> to vector<8x8xf32>
    %83 = arith.mulf %78, %82 : vector<8x8xf32>
    %84 = vector.extract_strided_slice %15 {offsets = [0, 24], sizes = [8, 8], strides = [1, 1]} : vector<8x32xf32> to vector<8x8xf32>
    %cst_41 = arith.constant dense<0.000000e+00> : vector<8x8xf32>
    %85 = tpu.matmul %83, %84, %cst_41 {dimension_numbers = #tpu.dot_dimension_numbers<[1], [0], [0], [1], [0, 0, 1, 1], [], []>} : vector<8x8xf32>, vector<8x8xf32>, vector<8x8xf32> -> vector<8x8xf32>
    %86 = tpu.concatenate %34, %51, %68, %85 in 1 : vector<8x8xf32>, vector<8x8xf32>, vector<8x8xf32>, vector<8x8xf32> -> vector<8x32xf32>
    %cst_42 = arith.constant dense<0.000000e+00> : vector<8x32xf32>
    %87 = tpu.matmul %86, %9, %cst_42 {dimension_numbers = #tpu.dot_dimension_numbers<[1], [0], [0], [1], [0, 0, 1, 1], [], []>} : vector<8x32xf32>, vector<32x32xf32>, vector<8x32xf32> -> vector<8x32xf32>
    %88 = vector.broadcast %10 : vector<1x32xf32> to vector<8x32xf32>
    %89 = arith.addf %87, %88 : vector<8x32xf32>
    %c0_43 = arith.constant 0 : index
    %c0_44 = arith.constant 0 : index
    %90 = vector.load %arg10[%c0_43, %c0_44] : memref<1x32xf32, #tpu.memory_space<vmem>>, vector<1x32xf32>
    %c0_45 = arith.constant 0 : index
    %c0_46 = arith.constant 0 : index
    %91 = vector.load %arg11[%c0_45, %c0_46] : memref<1x32xf32, #tpu.memory_space<vmem>>, vector<1x32xf32>
    %92 = arith.addf %89, %1 : vector<8x32xf32>
    %cst_47 = arith.constant dense<0.000000e+00> : vector<8xf32>
    %93 = vector.multi_reduction <add>, %92, %cst_47 [1] : vector<8x32xf32> to vector<8xf32>
    %94 = vector.shape_cast %93 : vector<8xf32> to vector<8x1xf32>
    %cst_48 = arith.constant 3.200000e+01 : f32
    %95 = vector.broadcast %cst_48 : f32 to vector<8x1xf32>
    %96 = arith.divf %94, %95 : vector<8x1xf32>
    %97 = vector.broadcast %96 : vector<8x1xf32> to vector<8x32xf32>
    %98 = arith.subf %92, %97 : vector<8x32xf32>
    %99 = arith.mulf %98, %98 : vector<8x32xf32>
    %cst_49 = arith.constant dense<0.000000e+00> : vector<8xf32>
    %100 = vector.multi_reduction <add>, %99, %cst_49 [1] : vector<8x32xf32> to vector<8xf32>
    %101 = vector.shape_cast %100 : vector<8xf32> to vector<8x1xf32>
    %cst_50 = arith.constant 3.200000e+01 : f32
    %102 = vector.broadcast %cst_50 : f32 to vector<8x1xf32>
    %103 = arith.divf %101, %102 : vector<8x1xf32>
    %104 = vector.broadcast %96 : vector<8x1xf32> to vector<8x32xf32>
    %105 = arith.subf %92, %104 : vector<8x32xf32>
    %cst_51 = arith.constant 9.99999974E-6 : f32
    %106 = vector.broadcast %cst_51 : f32 to vector<8x1xf32>
    %107 = arith.addf %103, %106 : vector<8x1xf32>
    %108 = math.rsqrt %107 : vector<8x1xf32>
    %109 = vector.broadcast %108 : vector<8x1xf32> to vector<8x32xf32>
    %110 = arith.mulf %105, %109 : vector<8x32xf32>
    %111 = vector.broadcast %90 : vector<1x32xf32> to vector<8x32xf32>
    %112 = arith.mulf %110, %111 : vector<8x32xf32>
    %113 = vector.broadcast %91 : vector<1x32xf32> to vector<8x32xf32>
    %114 = arith.addf %112, %113 : vector<8x32xf32>
    %c0_52 = arith.constant 0 : index
    %c0_53 = arith.constant 0 : index
    %c0_54 = arith.constant 0 : index
    %115 = vector.load %arg4[%c0_52, %c0_53, %c0_54] : memref<1x1x8xf32, #tpu.memory_space<vmem>>, vector<1x1x8xf32>
    %116 = vector.shape_cast %115 : vector<1x1x8xf32> to vector<1x8xf32>
    %c0_55 = arith.constant 0 : index
    %c0_56 = arith.constant 0 : index
    %117 = vector.load %arg12[%c0_55, %c0_56] : memref<32x32xf32, #tpu.memory_space<vmem>>, vector<32x32xf32>
    %c0_57 = arith.constant 0 : index
    %c0_58 = arith.constant 0 : index
    %118 = vector.load %arg13[%c0_57, %c0_58] : memref<32x32xf32, #tpu.memory_space<vmem>>, vector<32x32xf32>
    %c0_59 = arith.constant 0 : index
    %c0_60 = arith.constant 0 : index
    %119 = vector.load %arg14[%c0_59, %c0_60] : memref<32x32xf32, #tpu.memory_space<vmem>>, vector<32x32xf32>
    %c0_61 = arith.constant 0 : index
    %c0_62 = arith.constant 0 : index
    %120 = vector.load %arg15[%c0_61, %c0_62] : memref<32x32xf32, #tpu.memory_space<vmem>>, vector<32x32xf32>
    %c0_63 = arith.constant 0 : index
    %c0_64 = arith.constant 0 : index
    %121 = vector.load %arg16[%c0_63, %c0_64] : memref<1x32xf32, #tpu.memory_space<vmem>>, vector<1x32xf32>
    %cst_65 = arith.constant dense<0.000000e+00> : vector<8x32xf32>
    %122 = tpu.matmul %114, %117, %cst_65 {dimension_numbers = #tpu.dot_dimension_numbers<[1], [0], [0], [1], [0, 0, 1, 1], [], []>} : vector<8x32xf32>, vector<32x32xf32>, vector<8x32xf32> -> vector<8x32xf32>
    %cst_66 = arith.constant 0.176776692 : f32
    %123 = vector.broadcast %cst_66 : f32 to vector<8x32xf32>
    %124 = arith.mulf %122, %123 : vector<8x32xf32>
    %cst_67 = arith.constant dense<0.000000e+00> : vector<8x32xf32>
    %125 = tpu.matmul %3, %118, %cst_67 {dimension_numbers = #tpu.dot_dimension_numbers<[1], [0], [0], [1], [0, 0, 1, 1], [], []>} : vector<8x32xf32>, vector<32x32xf32>, vector<8x32xf32> -> vector<8x32xf32>
    %cst_68 = arith.constant dense<0.000000e+00> : vector<8x32xf32>
    %126 = tpu.matmul %3, %119, %cst_68 {dimension_numbers = #tpu.dot_dimension_numbers<[1], [0], [0], [1], [0, 0, 1, 1], [], []>} : vector<8x32xf32>, vector<32x32xf32>, vector<8x32xf32> -> vector<8x32xf32>
    %cst_69 = arith.constant 0.000000e+00 : f32
    %127 = vector.broadcast %cst_69 : f32 to vector<1x8xf32>
    %128 = arith.cmpf oeq, %116, %127 : vector<1x8xf32>
    %129 = vector.extract_strided_slice %124 {offsets = [0, 0], sizes = [8, 8], strides = [1, 1]} : vector<8x32xf32> to vector<8x8xf32>
    %130 = vector.extract_strided_slice %125 {offsets = [0, 0], sizes = [8, 8], strides = [1, 1]} : vector<8x32xf32> to vector<8x8xf32>
    %cst_70 = arith.constant dense<0.000000e+00> : vector<8x8xf32>
    %131 = tpu.matmul %129, %130, %cst_70 {dimension_numbers = #tpu.dot_dimension_numbers<[1], [1], [0], [0], [0, 0, 1, 0], [], []>} : vector<8x8xf32>, vector<8x8xf32>, vector<8x8xf32> -> vector<8x8xf32>
    %cst_71 = arith.constant -1.000000e+20 : f32
    %132 = vector.shape_cast %128 : vector<1x8xi1> to vector<1x8xi1>
    %133 = vector.broadcast %132 : vector<1x8xi1> to vector<8x8xi1>
    %134 = vector.broadcast %cst_71 : f32 to vector<8x8xf32>
    %135 = arith.select %133, %134, %131 : vector<8x8xi1>, vector<8x8xf32>
    %cst_72 = arith.constant dense<0xFF800000> : vector<8xf32>
    %136 = vector.multi_reduction <maximumf>, %135, %cst_72 [1] : vector<8x8xf32> to vector<8xf32>
    %137 = vector.shape_cast %136 : vector<8xf32> to vector<8x1xf32>
    %138 = vector.broadcast %137 : vector<8x1xf32> to vector<8x8xf32>
    %139 = arith.subf %135, %138 : vector<8x8xf32>
    %140 = math.exp %139 : vector<8x8xf32>
    %cst_73 = arith.constant dense<0.000000e+00> : vector<8xf32>
    %141 = vector.multi_reduction <add>, %140, %cst_73 [1] : vector<8x8xf32> to vector<8xf32>
    %142 = vector.shape_cast %141 : vector<8xf32> to vector<8x1xf32>
    %143 = tpu.reciprocal %142 {approx = true} : vector<8x1xf32> -> vector<8x1xf32>
    %144 = vector.broadcast %143 : vector<8x1xf32> to vector<8x8xf32>
    %145 = arith.mulf %140, %144 : vector<8x8xf32>
    %146 = vector.extract_strided_slice %126 {offsets = [0, 0], sizes = [8, 8], strides = [1, 1]} : vector<8x32xf32> to vector<8x8xf32>
    %cst_74 = arith.constant dense<0.000000e+00> : vector<8x8xf32>
    %147 = tpu.matmul %145, %146, %cst_74 {dimension_numbers = #tpu.dot_dimension_numbers<[1], [0], [0], [1], [0, 0, 1, 1], [], []>} : vector<8x8xf32>, vector<8x8xf32>, vector<8x8xf32> -> vector<8x8xf32>
    %148 = vector.extract_strided_slice %124 {offsets = [0, 8], sizes = [8, 8], strides = [1, 1]} : vector<8x32xf32> to vector<8x8xf32>
    %149 = vector.extract_strided_slice %125 {offsets = [0, 8], sizes = [8, 8], strides = [1, 1]} : vector<8x32xf32> to vector<8x8xf32>
    %cst_75 = arith.constant dense<0.000000e+00> : vector<8x8xf32>
    %150 = tpu.matmul %148, %149, %cst_75 {dimension_numbers = #tpu.dot_dimension_numbers<[1], [1], [0], [0], [0, 0, 1, 0], [], []>} : vector<8x8xf32>, vector<8x8xf32>, vector<8x8xf32> -> vector<8x8xf32>
    %cst_76 = arith.constant -1.000000e+20 : f32
    %151 = vector.shape_cast %128 : vector<1x8xi1> to vector<1x8xi1>
    %152 = vector.broadcast %151 : vector<1x8xi1> to vector<8x8xi1>
    %153 = vector.broadcast %cst_76 : f32 to vector<8x8xf32>
    %154 = arith.select %152, %153, %150 : vector<8x8xi1>, vector<8x8xf32>
    %cst_77 = arith.constant dense<0xFF800000> : vector<8xf32>
    %155 = vector.multi_reduction <maximumf>, %154, %cst_77 [1] : vector<8x8xf32> to vector<8xf32>
    %156 = vector.shape_cast %155 : vector<8xf32> to vector<8x1xf32>
    %157 = vector.broadcast %156 : vector<8x1xf32> to vector<8x8xf32>
    %158 = arith.subf %154, %157 : vector<8x8xf32>
    %159 = math.exp %158 : vector<8x8xf32>
    %cst_78 = arith.constant dense<0.000000e+00> : vector<8xf32>
    %160 = vector.multi_reduction <add>, %159, %cst_78 [1] : vector<8x8xf32> to vector<8xf32>
    %161 = vector.shape_cast %160 : vector<8xf32> to vector<8x1xf32>
    %162 = tpu.reciprocal %161 {approx = true} : vector<8x1xf32> -> vector<8x1xf32>
    %163 = vector.broadcast %162 : vector<8x1xf32> to vector<8x8xf32>
    %164 = arith.mulf %159, %163 : vector<8x8xf32>
    %165 = vector.extract_strided_slice %126 {offsets = [0, 8], sizes = [8, 8], strides = [1, 1]} : vector<8x32xf32> to vector<8x8xf32>
    %cst_79 = arith.constant dense<0.000000e+00> : vector<8x8xf32>
    %166 = tpu.matmul %164, %165, %cst_79 {dimension_numbers = #tpu.dot_dimension_numbers<[1], [0], [0], [1], [0, 0, 1, 1], [], []>} : vector<8x8xf32>, vector<8x8xf32>, vector<8x8xf32> -> vector<8x8xf32>
    %167 = vector.extract_strided_slice %124 {offsets = [0, 16], sizes = [8, 8], strides = [1, 1]} : vector<8x32xf32> to vector<8x8xf32>
    %168 = vector.extract_strided_slice %125 {offsets = [0, 16], sizes = [8, 8], strides = [1, 1]} : vector<8x32xf32> to vector<8x8xf32>
    %cst_80 = arith.constant dense<0.000000e+00> : vector<8x8xf32>
    %169 = tpu.matmul %167, %168, %cst_80 {dimension_numbers = #tpu.dot_dimension_numbers<[1], [1], [0], [0], [0, 0, 1, 0], [], []>} : vector<8x8xf32>, vector<8x8xf32>, vector<8x8xf32> -> vector<8x8xf32>
    %cst_81 = arith.constant -1.000000e+20 : f32
    %170 = vector.shape_cast %128 : vector<1x8xi1> to vector<1x8xi1>
    %171 = vector.broadcast %170 : vector<1x8xi1> to vector<8x8xi1>
    %172 = vector.broadcast %cst_81 : f32 to vector<8x8xf32>
    %173 = arith.select %171, %172, %169 : vector<8x8xi1>, vector<8x8xf32>
    %cst_82 = arith.constant dense<0xFF800000> : vector<8xf32>
    %174 = vector.multi_reduction <maximumf>, %173, %cst_82 [1] : vector<8x8xf32> to vector<8xf32>
    %175 = vector.shape_cast %174 : vector<8xf32> to vector<8x1xf32>
    %176 = vector.broadcast %175 : vector<8x1xf32> to vector<8x8xf32>
    %177 = arith.subf %173, %176 : vector<8x8xf32>
    %178 = math.exp %177 : vector<8x8xf32>
    %cst_83 = arith.constant dense<0.000000e+00> : vector<8xf32>
    %179 = vector.multi_reduction <add>, %178, %cst_83 [1] : vector<8x8xf32> to vector<8xf32>
    %180 = vector.shape_cast %179 : vector<8xf32> to vector<8x1xf32>
    %181 = tpu.reciprocal %180 {approx = true} : vector<8x1xf32> -> vector<8x1xf32>
    %182 = vector.broadcast %181 : vector<8x1xf32> to vector<8x8xf32>
    %183 = arith.mulf %178, %182 : vector<8x8xf32>
    %184 = vector.extract_strided_slice %126 {offsets = [0, 16], sizes = [8, 8], strides = [1, 1]} : vector<8x32xf32> to vector<8x8xf32>
    %cst_84 = arith.constant dense<0.000000e+00> : vector<8x8xf32>
    %185 = tpu.matmul %183, %184, %cst_84 {dimension_numbers = #tpu.dot_dimension_numbers<[1], [0], [0], [1], [0, 0, 1, 1], [], []>} : vector<8x8xf32>, vector<8x8xf32>, vector<8x8xf32> -> vector<8x8xf32>
    %186 = vector.extract_strided_slice %124 {offsets = [0, 24], sizes = [8, 8], strides = [1, 1]} : vector<8x32xf32> to vector<8x8xf32>
    %187 = vector.extract_strided_slice %125 {offsets = [0, 24], sizes = [8, 8], strides = [1, 1]} : vector<8x32xf32> to vector<8x8xf32>
    %cst_85 = arith.constant dense<0.000000e+00> : vector<8x8xf32>
    %188 = tpu.matmul %186, %187, %cst_85 {dimension_numbers = #tpu.dot_dimension_numbers<[1], [1], [0], [0], [0, 0, 1, 0], [], []>} : vector<8x8xf32>, vector<8x8xf32>, vector<8x8xf32> -> vector<8x8xf32>
    %cst_86 = arith.constant -1.000000e+20 : f32
    %189 = vector.shape_cast %128 : vector<1x8xi1> to vector<1x8xi1>
    %190 = vector.broadcast %189 : vector<1x8xi1> to vector<8x8xi1>
    %191 = vector.broadcast %cst_86 : f32 to vector<8x8xf32>
    %192 = arith.select %190, %191, %188 : vector<8x8xi1>, vector<8x8xf32>
    %cst_87 = arith.constant dense<0xFF800000> : vector<8xf32>
    %193 = vector.multi_reduction <maximumf>, %192, %cst_87 [1] : vector<8x8xf32> to vector<8xf32>
    %194 = vector.shape_cast %193 : vector<8xf32> to vector<8x1xf32>
    %195 = vector.broadcast %194 : vector<8x1xf32> to vector<8x8xf32>
    %196 = arith.subf %192, %195 : vector<8x8xf32>
    %197 = math.exp %196 : vector<8x8xf32>
    %cst_88 = arith.constant dense<0.000000e+00> : vector<8xf32>
    %198 = vector.multi_reduction <add>, %197, %cst_88 [1] : vector<8x8xf32> to vector<8xf32>
    %199 = vector.shape_cast %198 : vector<8xf32> to vector<8x1xf32>
    %200 = tpu.reciprocal %199 {approx = true} : vector<8x1xf32> -> vector<8x1xf32>
    %201 = vector.broadcast %200 : vector<8x1xf32> to vector<8x8xf32>
    %202 = arith.mulf %197, %201 : vector<8x8xf32>
    %203 = vector.extract_strided_slice %126 {offsets = [0, 24], sizes = [8, 8], strides = [1, 1]} : vector<8x32xf32> to vector<8x8xf32>
    %cst_89 = arith.constant dense<0.000000e+00> : vector<8x8xf32>
    %204 = tpu.matmul %202, %203, %cst_89 {dimension_numbers = #tpu.dot_dimension_numbers<[1], [0], [0], [1], [0, 0, 1, 1], [], []>} : vector<8x8xf32>, vector<8x8xf32>, vector<8x8xf32> -> vector<8x8xf32>
    %205 = tpu.concatenate %147, %166, %185, %204 in 1 : vector<8x8xf32>, vector<8x8xf32>, vector<8x8xf32>, vector<8x8xf32> -> vector<8x32xf32>
    %cst_90 = arith.constant dense<0.000000e+00> : vector<8x32xf32>
    %206 = tpu.matmul %205, %120, %cst_90 {dimension_numbers = #tpu.dot_dimension_numbers<[1], [0], [0], [1], [0, 0, 1, 1], [], []>} : vector<8x32xf32>, vector<32x32xf32>, vector<8x32xf32> -> vector<8x32xf32>
    %207 = vector.broadcast %121 : vector<1x32xf32> to vector<8x32xf32>
    %208 = arith.addf %206, %207 : vector<8x32xf32>
    %c0_91 = arith.constant 0 : index
    %c0_92 = arith.constant 0 : index
    %209 = vector.load %arg17[%c0_91, %c0_92] : memref<1x32xf32, #tpu.memory_space<vmem>>, vector<1x32xf32>
    %c0_93 = arith.constant 0 : index
    %c0_94 = arith.constant 0 : index
    %210 = vector.load %arg18[%c0_93, %c0_94] : memref<1x32xf32, #tpu.memory_space<vmem>>, vector<1x32xf32>
    %211 = arith.addf %208, %114 : vector<8x32xf32>
    %cst_95 = arith.constant dense<0.000000e+00> : vector<8xf32>
    %212 = vector.multi_reduction <add>, %211, %cst_95 [1] : vector<8x32xf32> to vector<8xf32>
    %213 = vector.shape_cast %212 : vector<8xf32> to vector<8x1xf32>
    %cst_96 = arith.constant 3.200000e+01 : f32
    %214 = vector.broadcast %cst_96 : f32 to vector<8x1xf32>
    %215 = arith.divf %213, %214 : vector<8x1xf32>
    %216 = vector.broadcast %215 : vector<8x1xf32> to vector<8x32xf32>
    %217 = arith.subf %211, %216 : vector<8x32xf32>
    %218 = arith.mulf %217, %217 : vector<8x32xf32>
    %cst_97 = arith.constant dense<0.000000e+00> : vector<8xf32>
    %219 = vector.multi_reduction <add>, %218, %cst_97 [1] : vector<8x32xf32> to vector<8xf32>
    %220 = vector.shape_cast %219 : vector<8xf32> to vector<8x1xf32>
    %cst_98 = arith.constant 3.200000e+01 : f32
    %221 = vector.broadcast %cst_98 : f32 to vector<8x1xf32>
    %222 = arith.divf %220, %221 : vector<8x1xf32>
    %223 = vector.broadcast %215 : vector<8x1xf32> to vector<8x32xf32>
    %224 = arith.subf %211, %223 : vector<8x32xf32>
    %cst_99 = arith.constant 9.99999974E-6 : f32
    %225 = vector.broadcast %cst_99 : f32 to vector<8x1xf32>
    %226 = arith.addf %222, %225 : vector<8x1xf32>
    %227 = math.rsqrt %226 : vector<8x1xf32>
    %228 = vector.broadcast %227 : vector<8x1xf32> to vector<8x32xf32>
    %229 = arith.mulf %224, %228 : vector<8x32xf32>
    %230 = vector.broadcast %209 : vector<1x32xf32> to vector<8x32xf32>
    %231 = arith.mulf %229, %230 : vector<8x32xf32>
    %232 = vector.broadcast %210 : vector<1x32xf32> to vector<8x32xf32>
    %233 = arith.addf %231, %232 : vector<8x32xf32>
    %c0_100 = arith.constant 0 : index
    %c0_101 = arith.constant 0 : index
    %234 = vector.load %arg19[%c0_100, %c0_101] : memref<32x128xf32, #tpu.memory_space<vmem>>, vector<32x128xf32>
    %c0_102 = arith.constant 0 : index
    %c0_103 = arith.constant 0 : index
    %235 = vector.load %arg20[%c0_102, %c0_103] : memref<1x128xf32, #tpu.memory_space<vmem>>, vector<1x128xf32>
    %c0_104 = arith.constant 0 : index
    %c0_105 = arith.constant 0 : index
    %236 = vector.load %arg21[%c0_104, %c0_105] : memref<128x32xf32, #tpu.memory_space<vmem>>, vector<128x32xf32>
    %c0_106 = arith.constant 0 : index
    %c0_107 = arith.constant 0 : index
    %237 = vector.load %arg22[%c0_106, %c0_107] : memref<1x32xf32, #tpu.memory_space<vmem>>, vector<1x32xf32>
    %cst_108 = arith.constant dense<0.000000e+00> : vector<8x128xf32>
    %238 = tpu.matmul %233, %234, %cst_108 {dimension_numbers = #tpu.dot_dimension_numbers<[1], [0], [0], [1], [0, 0, 1, 1], [], []>} : vector<8x32xf32>, vector<32x128xf32>, vector<8x128xf32> -> vector<8x128xf32>
    %239 = vector.broadcast %235 : vector<1x128xf32> to vector<8x128xf32>
    %240 = arith.addf %238, %239 : vector<8x128xf32>
    %cst_109 = arith.constant 0.000000e+00 : f32
    %241 = vector.broadcast %cst_109 : f32 to vector<8x128xf32>
    %242 = arith.maximumf %240, %241 : vector<8x128xf32>
    %cst_110 = arith.constant dense<0.000000e+00> : vector<8x32xf32>
    %243 = tpu.matmul %242, %236, %cst_110 {dimension_numbers = #tpu.dot_dimension_numbers<[1], [0], [0], [1], [0, 0, 1, 1], [], []>} : vector<8x128xf32>, vector<128x32xf32>, vector<8x32xf32> -> vector<8x32xf32>
    %244 = vector.broadcast %237 : vector<1x32xf32> to vector<8x32xf32>
    %245 = arith.addf %243, %244 : vector<8x32xf32>
    %c0_111 = arith.constant 0 : index
    %c0_112 = arith.constant 0 : index
    %246 = vector.load %arg23[%c0_111, %c0_112] : memref<1x32xf32, #tpu.memory_space<vmem>>, vector<1x32xf32>
    %c0_113 = arith.constant 0 : index
    %c0_114 = arith.constant 0 : index
    %247 = vector.load %arg24[%c0_113, %c0_114] : memref<1x32xf32, #tpu.memory_space<vmem>>, vector<1x32xf32>
    %248 = arith.addf %245, %233 : vector<8x32xf32>
    %cst_115 = arith.constant dense<0.000000e+00> : vector<8xf32>
    %249 = vector.multi_reduction <add>, %248, %cst_115 [1] : vector<8x32xf32> to vector<8xf32>
    %250 = vector.shape_cast %249 : vector<8xf32> to vector<8x1xf32>
    %cst_116 = arith.constant 3.200000e+01 : f32
    %251 = vector.broadcast %cst_116 : f32 to vector<8x1xf32>
    %252 = arith.divf %250, %251 : vector<8x1xf32>
    %253 = vector.broadcast %252 : vector<8x1xf32> to vector<8x32xf32>
    %254 = arith.subf %248, %253 : vector<8x32xf32>
    %255 = arith.mulf %254, %254 : vector<8x32xf32>
    %cst_117 = arith.constant dense<0.000000e+00> : vector<8xf32>
    %256 = vector.multi_reduction <add>, %255, %cst_117 [1] : vector<8x32xf32> to vector<8xf32>
    %257 = vector.shape_cast %256 : vector<8xf32> to vector<8x1xf32>
    %cst_118 = arith.constant 3.200000e+01 : f32
    %258 = vector.broadcast %cst_118 : f32 to vector<8x1xf32>
    %259 = arith.divf %257, %258 : vector<8x1xf32>
    %260 = vector.broadcast %252 : vector<8x1xf32> to vector<8x32xf32>
    %261 = arith.subf %248, %260 : vector<8x32xf32>
    %cst_119 = arith.constant 9.99999974E-6 : f32
    %262 = vector.broadcast %cst_119 : f32 to vector<8x1xf32>
    %263 = arith.addf %259, %262 : vector<8x1xf32>
    %264 = math.rsqrt %263 : vector<8x1xf32>
    %265 = vector.broadcast %264 : vector<8x1xf32> to vector<8x32xf32>
    %266 = arith.mulf %261, %265 : vector<8x32xf32>
    %267 = vector.broadcast %246 : vector<1x32xf32> to vector<8x32xf32>
    %268 = arith.mulf %266, %267 : vector<8x32xf32>
    %269 = vector.broadcast %247 : vector<1x32xf32> to vector<8x32xf32>
    %270 = arith.addf %268, %269 : vector<8x32xf32>
    %c0_120 = arith.constant 0 : index
    %c0_121 = arith.constant 0 : index
    %c0_122 = arith.constant 0 : index
    %271 = vector.load %arg25[%c0_120, %c0_121, %c0_122] : memref<1x8x32xf32, #tpu.memory_space<vmem>>, vector<1x8x32xf32>
    %272 = vector.shape_cast %271 : vector<1x8x32xf32> to vector<8x32xf32>
    %273 = vector.shape_cast %270 : vector<8x32xf32> to vector<1x8x32xf32>
    tpu.vector_store %arg25[%c0_120, %c0_121, %c0_122], %273 {strides = array<i32>} : memref<1x8x32xf32, #tpu.memory_space<vmem>>, vector<1x8x32xf32>,
    return
  }
  func.func @transform_0(%arg0: i32) -> (i32, i32, i32) {
    %c0_i32 = arith.constant 0 : i32
    %c0_i32_0 = arith.constant 0 : i32
    %c0_i32_1 = arith.constant 0 : i32
    return %arg0, %c0_i32, %c0_i32_0 : i32, i32, i32
  }
  func.func @transform_1(%arg0: i32) -> (i32, i32, i32) {
    %c0_i32 = arith.constant 0 : i32
    %c0_i32_0 = arith.constant 0 : i32
    %c0_i32_1 = arith.constant 0 : i32
    return %arg0, %c0_i32, %c0_i32_0 : i32, i32, i32
  }
  func.func @transform_2(%arg0: i32) -> (i32, i32, i32) {
    %c0_i32 = arith.constant 0 : i32
    %c0_i32_0 = arith.constant 0 : i32
    %c0_i32_1 = arith.constant 0 : i32
    %c0_i32_2 = arith.constant 0 : i32
    return %c0_i32, %c0_i32_0, %c0_i32_1 : i32, i32, i32
  }
  func.func @transform_3(%arg0: i32) -> (i32, i32, i32) {
    %c0_i32 = arith.constant 0 : i32
    %c0_i32_0 = arith.constant 0 : i32
    %c0_i32_1 = arith.constant 0 : i32
    return %arg0, %c0_i32, %c0_i32_0 : i32, i32, i32
  }
  func.func @transform_4(%arg0: i32) -> (i32, i32) {
    %c0_i32 = arith.constant 0 : i32
    %c0_i32_0 = arith.constant 0 : i32
    %c0_i32_1 = arith.constant 0 : i32
    return %c0_i32, %c0_i32_0 : i32, i32
  }
  func.func @transform_5(%arg0: i32) -> (i32, i32) {
    %c0_i32 = arith.constant 0 : i32
    %c0_i32_0 = arith.constant 0 : i32
    %c0_i32_1 = arith.constant 0 : i32
    return %c0_i32, %c0_i32_0 : i32, i32
  }
  func.func @transform_6(%arg0: i32) -> (i32, i32) {
    %c0_i32 = arith.constant 0 : i32
    %c0_i32_0 = arith.constant 0 : i32
    %c0_i32_1 = arith.constant 0 : i32
    return %c0_i32, %c0_i32_0 : i32, i32
  }
  func.func @transform_7(%arg0: i32) -> (i32, i32) {
    %c0_i32 = arith.constant 0 : i32
    %c0_i32_0 = arith.constant 0 : i32
    %c0_i32_1 = arith.constant 0 : i32
    return %c0_i32, %c0_i32_0 : i32, i32
  }
  func.func @transform_8(%arg0: i32) -> (i32, i32) {
    %c0_i32 = arith.constant 0 : i32
    %c0_i32_0 = arith.constant 0 : i32
    %c0_i32_1 = arith.constant 0 : i32
    return %c0_i32, %c0_i32_0 : i32, i32
  }
  func.func @transform_9(%arg0: i32) -> (i32, i32) {
    %c0_i32 = arith.constant 0 : i32
    %c0_i32_0 = arith.constant 0 : i32
    %c0_i32_1 = arith.constant 0 : i32
    return %c0_i32, %c0_i32_0 : i32, i32
  }
  func.func @transform_10(%arg0: i32) -> (i32, i32) {
    %c0_i32 = arith.constant 0 : i32
    %c0_i32_0 = arith.constant 0 : i32
    %c0_i32_1 = arith.constant 0 : i32
    return %c0_i32, %c0_i32_0 : i32, i32
  }
  func.func @transform_11(%arg0: i32) -> (i32, i32) {
    %c0_i32 = arith.constant 0 : i32
    %c0_i32_0 = arith.constant 0 : i32
    %c0_i32_1 = arith.constant 0 : i32
    return %c0_i32, %c0_i32_0 : i32, i32
  }
  func.func @transform_12(%arg0: i32) -> (i32, i32) {
    %c0_i32 = arith.constant 0 : i32
    %c0_i32_0 = arith.constant 0 : i32
    %c0_i32_1 = arith.constant 0 : i32
    return %c0_i32, %c0_i32_0 : i32, i32
  }
  func.func @transform_13(%arg0: i32) -> (i32, i32) {
    %c0_i32 = arith.constant 0 : i32
    %c0_i32_0 = arith.constant 0 : i32
    %c0_i32_1 = arith.constant 0 : i32
    return %c0_i32, %c0_i32_0 : i32, i32
  }
  func.func @transform_14(%arg0: i32) -> (i32, i32) {
    %c0_i32 = arith.constant 0 : i32
    %c0_i32_0 = arith.constant 0 : i32
    %c0_i32_1 = arith.constant 0 : i32
    return %c0_i32, %c0_i32_0 : i32, i32
  }
  func.func @transform_15(%arg0: i32) -> (i32, i32) {
    %c0_i32 = arith.constant 0 : i32
    %c0_i32_0 = arith.constant 0 : i32
    %c0_i32_1 = arith.constant 0 : i32
    return %c0_i32, %c0_i32_0 : i32, i32
  }
  func.func @transform_16(%arg0: i32) -> (i32, i32) {
    %c0_i32 = arith.constant 0 : i32
    %c0_i32_0 = arith.constant 0 : i32
    %c0_i32_1 = arith.constant 0 : i32
    return %c0_i32, %c0_i32_0 : i32, i32
  }
  func.func @transform_17(%arg0: i32) -> (i32, i32) {
    %c0_i32 = arith.constant 0 : i32
    %c0_i32_0 = arith.constant 0 : i32
    %c0_i32_1 = arith.constant 0 : i32
    return %c0_i32, %c0_i32_0 : i32, i32
  }
  func.func @transform_18(%arg0: i32) -> (i32, i32) {
    %c0_i32 = arith.constant 0 : i32
    %c0_i32_0 = arith.constant 0 : i32
    %c0_i32_1 = arith.constant 0 : i32
    return %c0_i32, %c0_i32_0 : i32, i32
  }
  func.func @transform_19(%arg0: i32) -> (i32, i32) {
    %c0_i32 = arith.constant 0 : i32
    %c0_i32_0 = arith.constant 0 : i32
    %c0_i32_1 = arith.constant 0 : i32
    return %c0_i32, %c0_i32_0 : i32, i32
  }
  func.func @transform_20(%arg0: i32) -> (i32, i32) {
    %c0_i32 = arith.constant 0 : i32
    %c0_i32_0 = arith.constant 0 : i32
    %c0_i32_1 = arith.constant 0 : i32
    return %c0_i32, %c0_i32_0 : i32, i32
  }
  func.func @transform_21(%arg0: i32) -> (i32, i32) {
    %c0_i32 = arith.constant 0 : i32
    %c0_i32_0 = arith.constant 0 : i32
    %c0_i32_1 = arith.constant 0 : i32
    return %c0_i32, %c0_i32_0 : i32, i32
  }
  func.func @transform_22(%arg0: i32) -> (i32, i32) {
    %c0_i32 = arith.constant 0 : i32
    %c0_i32_0 = arith.constant 0 : i32
    %c0_i32_1 = arith.constant 0 : i32
    return %c0_i32, %c0_i32_0 : i32, i32
  }
  func.func @transform_23(%arg0: i32) -> (i32, i32) {
    %c0_i32 = arith.constant 0 : i32
    %c0_i32_0 = arith.constant 0 : i32
    %c0_i32_1 = arith.constant 0 : i32
    return %c0_i32, %c0_i32_0 : i32, i32
  }
  func.func @transform_24(%arg0: i32) -> (i32, i32, i32) {
    %c0_i32 = arith.constant 0 : i32
    %c0_i32_0 = arith.constant 0 : i32
    %c0_i32_1 = arith.constant 0 : i32
    return %arg0, %c0_i32, %c0_i32_0 : i32, i32, i32
  }
}

module attributes {stable_mosaic.version = 11 : i64} {
  func.func @_encoder_block_kernel(%arg0: i32, %arg1: memref<1x8x32xf32, #tpu.memory_space<vmem>>, %arg2: memref<1x1x8xf32, #tpu.memory_space<vmem>>, %arg3: memref<32x32xf32, #tpu.memory_space<vmem>>, %arg4: memref<32x32xf32, #tpu.memory_space<vmem>>, %arg5: memref<32x32xf32, #tpu.memory_space<vmem>>, %arg6: memref<32x32xf32, #tpu.memory_space<vmem>>, %arg7: memref<1x32xf32, #tpu.memory_space<vmem>>, %arg8: memref<1x32xf32, #tpu.memory_space<vmem>>, %arg9: memref<1x32xf32, #tpu.memory_space<vmem>>, %arg10: memref<32x128xf32, #tpu.memory_space<vmem>>, %arg11: memref<1x128xf32, #tpu.memory_space<vmem>>, %arg12: memref<128x32xf32, #tpu.memory_space<vmem>>, %arg13: memref<1x32xf32, #tpu.memory_space<vmem>>, %arg14: memref<1x32xf32, #tpu.memory_space<vmem>>, %arg15: memref<1x32xf32, #tpu.memory_space<vmem>>, %arg16: memref<1x8x32xf32, #tpu.memory_space<vmem>>) attributes {dimension_semantics = [#tpu.dimension_semantics<parallel>], iteration_bounds = array<i64: 2>, scalar_prefetch = 0 : i64, scratch_operands = 0 : i64, tpu.core_type = #tpu.core_type<tc>, window_params = [{transform_indices = @transform_0, window_bounds = array<i64: 1, 8, 32>}, {transform_indices = @transform_1, window_bounds = array<i64: 1, 1, 8>}, {pipeline_mode = #tpu.pipeline_mode<synchronous>, transform_indices = @transform_2, window_bounds = array<i64: 32, 32>}, {pipeline_mode = #tpu.pipeline_mode<synchronous>, transform_indices = @transform_3, window_bounds = array<i64: 32, 32>}, {pipeline_mode = #tpu.pipeline_mode<synchronous>, transform_indices = @transform_4, window_bounds = array<i64: 32, 32>}, {pipeline_mode = #tpu.pipeline_mode<synchronous>, transform_indices = @transform_5, window_bounds = array<i64: 32, 32>}, {pipeline_mode = #tpu.pipeline_mode<synchronous>, transform_indices = @transform_6, window_bounds = array<i64: 1, 32>}, {pipeline_mode = #tpu.pipeline_mode<synchronous>, transform_indices = @transform_7, window_bounds = array<i64: 1, 32>}, {pipeline_mode = #tpu.pipeline_mode<synchronous>, transform_indices = @transform_8, window_bounds = array<i64: 1, 32>}, {pipeline_mode = #tpu.pipeline_mode<synchronous>, transform_indices = @transform_9, window_bounds = array<i64: 32, 128>}, {pipeline_mode = #tpu.pipeline_mode<synchronous>, transform_indices = @transform_10, window_bounds = array<i64: 1, 128>}, {pipeline_mode = #tpu.pipeline_mode<synchronous>, transform_indices = @transform_11, window_bounds = array<i64: 128, 32>}, {pipeline_mode = #tpu.pipeline_mode<synchronous>, transform_indices = @transform_12, window_bounds = array<i64: 1, 32>}, {pipeline_mode = #tpu.pipeline_mode<synchronous>, transform_indices = @transform_13, window_bounds = array<i64: 1, 32>}, {pipeline_mode = #tpu.pipeline_mode<synchronous>, transform_indices = @transform_14, window_bounds = array<i64: 1, 32>}, {transform_indices = @transform_15, window_bounds = array<i64: 1, 8, 32>}]} {
    %c0 = arith.constant 0 : index
    %c0_0 = arith.constant 0 : index
    %c0_1 = arith.constant 0 : index
    %0 = vector.load %arg1[%c0, %c0_0, %c0_1] : memref<1x8x32xf32, #tpu.memory_space<vmem>>, vector<1x8x32xf32>
    %1 = vector.shape_cast %0 : vector<1x8x32xf32> to vector<8x32xf32>
    %c0_2 = arith.constant 0 : index
    %c0_3 = arith.constant 0 : index
    %c0_4 = arith.constant 0 : index
    %2 = vector.load %arg2[%c0_2, %c0_3, %c0_4] : memref<1x1x8xf32, #tpu.memory_space<vmem>>, vector<1x1x8xf32>
    %3 = vector.shape_cast %2 : vector<1x1x8xf32> to vector<1x8xf32>
    %c0_5 = arith.constant 0 : index
    %c0_6 = arith.constant 0 : index
    %4 = vector.load %arg3[%c0_5, %c0_6] : memref<32x32xf32, #tpu.memory_space<vmem>>, vector<32x32xf32>
    %c0_7 = arith.constant 0 : index
    %c0_8 = arith.constant 0 : index
    %5 = vector.load %arg4[%c0_7, %c0_8] : memref<32x32xf32, #tpu.memory_space<vmem>>, vector<32x32xf32>
    %c0_9 = arith.constant 0 : index
    %c0_10 = arith.constant 0 : index
    %6 = vector.load %arg5[%c0_9, %c0_10] : memref<32x32xf32, #tpu.memory_space<vmem>>, vector<32x32xf32>
    %c0_11 = arith.constant 0 : index
    %c0_12 = arith.constant 0 : index
    %7 = vector.load %arg6[%c0_11, %c0_12] : memref<32x32xf32, #tpu.memory_space<vmem>>, vector<32x32xf32>
    %c0_13 = arith.constant 0 : index
    %c0_14 = arith.constant 0 : index
    %8 = vector.load %arg7[%c0_13, %c0_14] : memref<1x32xf32, #tpu.memory_space<vmem>>, vector<1x32xf32>
    %cst = arith.constant dense<0.000000e+00> : vector<8x32xf32>
    %9 = tpu.matmul %1, %4, %cst {dimension_numbers = #tpu.dot_dimension_numbers<[1], [0], [0], [1], [0, 0, 1, 1], [], []>} : vector<8x32xf32>, vector<32x32xf32>, vector<8x32xf32> -> vector<8x32xf32>
    %cst_15 = arith.constant 0.176776692 : f32
    %10 = vector.broadcast %cst_15 : f32 to vector<8x32xf32>
    %11 = arith.mulf %9, %10 : vector<8x32xf32>
    %cst_16 = arith.constant dense<0.000000e+00> : vector<8x32xf32>
    %12 = tpu.matmul %1, %5, %cst_16 {dimension_numbers = #tpu.dot_dimension_numbers<[1], [0], [0], [1], [0, 0, 1, 1], [], []>} : vector<8x32xf32>, vector<32x32xf32>, vector<8x32xf32> -> vector<8x32xf32>
    %cst_17 = arith.constant dense<0.000000e+00> : vector<8x32xf32>
    %13 = tpu.matmul %1, %6, %cst_17 {dimension_numbers = #tpu.dot_dimension_numbers<[1], [0], [0], [1], [0, 0, 1, 1], [], []>} : vector<8x32xf32>, vector<32x32xf32>, vector<8x32xf32> -> vector<8x32xf32>
    %cst_18 = arith.constant 0.000000e+00 : f32
    %14 = vector.broadcast %cst_18 : f32 to vector<1x8xf32>
    %15 = arith.cmpf oeq, %3, %14 : vector<1x8xf32>
    %16 = vector.extract_strided_slice %11 {offsets = [0, 0], sizes = [8, 8], strides = [1, 1]} : vector<8x32xf32> to vector<8x8xf32>
    %17 = vector.extract_strided_slice %12 {offsets = [0, 0], sizes = [8, 8], strides = [1, 1]} : vector<8x32xf32> to vector<8x8xf32>
    %cst_19 = arith.constant dense<0.000000e+00> : vector<8x8xf32>
    %18 = tpu.matmul %16, %17, %cst_19 {dimension_numbers = #tpu.dot_dimension_numbers<[1], [1], [0], [0], [0, 0, 1, 0], [], []>} : vector<8x8xf32>, vector<8x8xf32>, vector<8x8xf32> -> vector<8x8xf32>
    %cst_20 = arith.constant -1.000000e+20 : f32
    %19 = vector.shape_cast %15 : vector<1x8xi1> to vector<1x8xi1>
    %20 = vector.broadcast %19 : vector<1x8xi1> to vector<8x8xi1>
    %21 = vector.broadcast %cst_20 : f32 to vector<8x8xf32>
    %22 = arith.select %20, %21, %18 : vector<8x8xi1>, vector<8x8xf32>
    %cst_21 = arith.constant dense<0xFF800000> : vector<8xf32>
    %23 = vector.multi_reduction <maximumf>, %22, %cst_21 [1] : vector<8x8xf32> to vector<8xf32>
    %24 = vector.shape_cast %23 : vector<8xf32> to vector<8x1xf32>
    %25 = vector.broadcast %24 : vector<8x1xf32> to vector<8x8xf32>
    %26 = arith.subf %22, %25 : vector<8x8xf32>
    %27 = math.exp %26 : vector<8x8xf32>
    %cst_22 = arith.constant dense<0.000000e+00> : vector<8xf32>
    %28 = vector.multi_reduction <add>, %27, %cst_22 [1] : vector<8x8xf32> to vector<8xf32>
    %29 = vector.shape_cast %28 : vector<8xf32> to vector<8x1xf32>
    %30 = tpu.reciprocal %29 {approx = true} : vector<8x1xf32> -> vector<8x1xf32>
    %31 = vector.broadcast %30 : vector<8x1xf32> to vector<8x8xf32>
    %32 = arith.mulf %27, %31 : vector<8x8xf32>
    %33 = vector.extract_strided_slice %13 {offsets = [0, 0], sizes = [8, 8], strides = [1, 1]} : vector<8x32xf32> to vector<8x8xf32>
    %cst_23 = arith.constant dense<0.000000e+00> : vector<8x8xf32>
    %34 = tpu.matmul %32, %33, %cst_23 {dimension_numbers = #tpu.dot_dimension_numbers<[1], [0], [0], [1], [0, 0, 1, 1], [], []>} : vector<8x8xf32>, vector<8x8xf32>, vector<8x8xf32> -> vector<8x8xf32>
    %35 = vector.extract_strided_slice %11 {offsets = [0, 8], sizes = [8, 8], strides = [1, 1]} : vector<8x32xf32> to vector<8x8xf32>
    %36 = vector.extract_strided_slice %12 {offsets = [0, 8], sizes = [8, 8], strides = [1, 1]} : vector<8x32xf32> to vector<8x8xf32>
    %cst_24 = arith.constant dense<0.000000e+00> : vector<8x8xf32>
    %37 = tpu.matmul %35, %36, %cst_24 {dimension_numbers = #tpu.dot_dimension_numbers<[1], [1], [0], [0], [0, 0, 1, 0], [], []>} : vector<8x8xf32>, vector<8x8xf32>, vector<8x8xf32> -> vector<8x8xf32>
    %cst_25 = arith.constant -1.000000e+20 : f32
    %38 = vector.shape_cast %15 : vector<1x8xi1> to vector<1x8xi1>
    %39 = vector.broadcast %38 : vector<1x8xi1> to vector<8x8xi1>
    %40 = vector.broadcast %cst_25 : f32 to vector<8x8xf32>
    %41 = arith.select %39, %40, %37 : vector<8x8xi1>, vector<8x8xf32>
    %cst_26 = arith.constant dense<0xFF800000> : vector<8xf32>
    %42 = vector.multi_reduction <maximumf>, %41, %cst_26 [1] : vector<8x8xf32> to vector<8xf32>
    %43 = vector.shape_cast %42 : vector<8xf32> to vector<8x1xf32>
    %44 = vector.broadcast %43 : vector<8x1xf32> to vector<8x8xf32>
    %45 = arith.subf %41, %44 : vector<8x8xf32>
    %46 = math.exp %45 : vector<8x8xf32>
    %cst_27 = arith.constant dense<0.000000e+00> : vector<8xf32>
    %47 = vector.multi_reduction <add>, %46, %cst_27 [1] : vector<8x8xf32> to vector<8xf32>
    %48 = vector.shape_cast %47 : vector<8xf32> to vector<8x1xf32>
    %49 = tpu.reciprocal %48 {approx = true} : vector<8x1xf32> -> vector<8x1xf32>
    %50 = vector.broadcast %49 : vector<8x1xf32> to vector<8x8xf32>
    %51 = arith.mulf %46, %50 : vector<8x8xf32>
    %52 = vector.extract_strided_slice %13 {offsets = [0, 8], sizes = [8, 8], strides = [1, 1]} : vector<8x32xf32> to vector<8x8xf32>
    %cst_28 = arith.constant dense<0.000000e+00> : vector<8x8xf32>
    %53 = tpu.matmul %51, %52, %cst_28 {dimension_numbers = #tpu.dot_dimension_numbers<[1], [0], [0], [1], [0, 0, 1, 1], [], []>} : vector<8x8xf32>, vector<8x8xf32>, vector<8x8xf32> -> vector<8x8xf32>
    %54 = vector.extract_strided_slice %11 {offsets = [0, 16], sizes = [8, 8], strides = [1, 1]} : vector<8x32xf32> to vector<8x8xf32>
    %55 = vector.extract_strided_slice %12 {offsets = [0, 16], sizes = [8, 8], strides = [1, 1]} : vector<8x32xf32> to vector<8x8xf32>
    %cst_29 = arith.constant dense<0.000000e+00> : vector<8x8xf32>
    %56 = tpu.matmul %54, %55, %cst_29 {dimension_numbers = #tpu.dot_dimension_numbers<[1], [1], [0], [0], [0, 0, 1, 0], [], []>} : vector<8x8xf32>, vector<8x8xf32>, vector<8x8xf32> -> vector<8x8xf32>
    %cst_30 = arith.constant -1.000000e+20 : f32
    %57 = vector.shape_cast %15 : vector<1x8xi1> to vector<1x8xi1>
    %58 = vector.broadcast %57 : vector<1x8xi1> to vector<8x8xi1>
    %59 = vector.broadcast %cst_30 : f32 to vector<8x8xf32>
    %60 = arith.select %58, %59, %56 : vector<8x8xi1>, vector<8x8xf32>
    %cst_31 = arith.constant dense<0xFF800000> : vector<8xf32>
    %61 = vector.multi_reduction <maximumf>, %60, %cst_31 [1] : vector<8x8xf32> to vector<8xf32>
    %62 = vector.shape_cast %61 : vector<8xf32> to vector<8x1xf32>
    %63 = vector.broadcast %62 : vector<8x1xf32> to vector<8x8xf32>
    %64 = arith.subf %60, %63 : vector<8x8xf32>
    %65 = math.exp %64 : vector<8x8xf32>
    %cst_32 = arith.constant dense<0.000000e+00> : vector<8xf32>
    %66 = vector.multi_reduction <add>, %65, %cst_32 [1] : vector<8x8xf32> to vector<8xf32>
    %67 = vector.shape_cast %66 : vector<8xf32> to vector<8x1xf32>
    %68 = tpu.reciprocal %67 {approx = true} : vector<8x1xf32> -> vector<8x1xf32>
    %69 = vector.broadcast %68 : vector<8x1xf32> to vector<8x8xf32>
    %70 = arith.mulf %65, %69 : vector<8x8xf32>
    %71 = vector.extract_strided_slice %13 {offsets = [0, 16], sizes = [8, 8], strides = [1, 1]} : vector<8x32xf32> to vector<8x8xf32>
    %cst_33 = arith.constant dense<0.000000e+00> : vector<8x8xf32>
    %72 = tpu.matmul %70, %71, %cst_33 {dimension_numbers = #tpu.dot_dimension_numbers<[1], [0], [0], [1], [0, 0, 1, 1], [], []>} : vector<8x8xf32>, vector<8x8xf32>, vector<8x8xf32> -> vector<8x8xf32>
    %73 = vector.extract_strided_slice %11 {offsets = [0, 24], sizes = [8, 8], strides = [1, 1]} : vector<8x32xf32> to vector<8x8xf32>
    %74 = vector.extract_strided_slice %12 {offsets = [0, 24], sizes = [8, 8], strides = [1, 1]} : vector<8x32xf32> to vector<8x8xf32>
    %cst_34 = arith.constant dense<0.000000e+00> : vector<8x8xf32>
    %75 = tpu.matmul %73, %74, %cst_34 {dimension_numbers = #tpu.dot_dimension_numbers<[1], [1], [0], [0], [0, 0, 1, 0], [], []>} : vector<8x8xf32>, vector<8x8xf32>, vector<8x8xf32> -> vector<8x8xf32>
    %cst_35 = arith.constant -1.000000e+20 : f32
    %76 = vector.shape_cast %15 : vector<1x8xi1> to vector<1x8xi1>
    %77 = vector.broadcast %76 : vector<1x8xi1> to vector<8x8xi1>
    %78 = vector.broadcast %cst_35 : f32 to vector<8x8xf32>
    %79 = arith.select %77, %78, %75 : vector<8x8xi1>, vector<8x8xf32>
    %cst_36 = arith.constant dense<0xFF800000> : vector<8xf32>
    %80 = vector.multi_reduction <maximumf>, %79, %cst_36 [1] : vector<8x8xf32> to vector<8xf32>
    %81 = vector.shape_cast %80 : vector<8xf32> to vector<8x1xf32>
    %82 = vector.broadcast %81 : vector<8x1xf32> to vector<8x8xf32>
    %83 = arith.subf %79, %82 : vector<8x8xf32>
    %84 = math.exp %83 : vector<8x8xf32>
    %cst_37 = arith.constant dense<0.000000e+00> : vector<8xf32>
    %85 = vector.multi_reduction <add>, %84, %cst_37 [1] : vector<8x8xf32> to vector<8xf32>
    %86 = vector.shape_cast %85 : vector<8xf32> to vector<8x1xf32>
    %87 = tpu.reciprocal %86 {approx = true} : vector<8x1xf32> -> vector<8x1xf32>
    %88 = vector.broadcast %87 : vector<8x1xf32> to vector<8x8xf32>
    %89 = arith.mulf %84, %88 : vector<8x8xf32>
    %90 = vector.extract_strided_slice %13 {offsets = [0, 24], sizes = [8, 8], strides = [1, 1]} : vector<8x32xf32> to vector<8x8xf32>
    %cst_38 = arith.constant dense<0.000000e+00> : vector<8x8xf32>
    %91 = tpu.matmul %89, %90, %cst_38 {dimension_numbers = #tpu.dot_dimension_numbers<[1], [0], [0], [1], [0, 0, 1, 1], [], []>} : vector<8x8xf32>, vector<8x8xf32>, vector<8x8xf32> -> vector<8x8xf32>
    %92 = tpu.concatenate %34, %53, %72, %91 in 1 : vector<8x8xf32>, vector<8x8xf32>, vector<8x8xf32>, vector<8x8xf32> -> vector<8x32xf32>
    %cst_39 = arith.constant dense<0.000000e+00> : vector<8x32xf32>
    %93 = tpu.matmul %92, %7, %cst_39 {dimension_numbers = #tpu.dot_dimension_numbers<[1], [0], [0], [1], [0, 0, 1, 1], [], []>} : vector<8x32xf32>, vector<32x32xf32>, vector<8x32xf32> -> vector<8x32xf32>
    %94 = vector.broadcast %8 : vector<1x32xf32> to vector<8x32xf32>
    %95 = arith.addf %93, %94 : vector<8x32xf32>
    %c0_40 = arith.constant 0 : index
    %c0_41 = arith.constant 0 : index
    %96 = vector.load %arg8[%c0_40, %c0_41] : memref<1x32xf32, #tpu.memory_space<vmem>>, vector<1x32xf32>
    %c0_42 = arith.constant 0 : index
    %c0_43 = arith.constant 0 : index
    %97 = vector.load %arg9[%c0_42, %c0_43] : memref<1x32xf32, #tpu.memory_space<vmem>>, vector<1x32xf32>
    %98 = arith.addf %95, %1 : vector<8x32xf32>
    %cst_44 = arith.constant dense<0.000000e+00> : vector<8xf32>
    %99 = vector.multi_reduction <add>, %98, %cst_44 [1] : vector<8x32xf32> to vector<8xf32>
    %100 = vector.shape_cast %99 : vector<8xf32> to vector<8x1xf32>
    %cst_45 = arith.constant 3.200000e+01 : f32
    %101 = vector.broadcast %cst_45 : f32 to vector<8x1xf32>
    %102 = arith.divf %100, %101 : vector<8x1xf32>
    %103 = vector.broadcast %102 : vector<8x1xf32> to vector<8x32xf32>
    %104 = arith.subf %98, %103 : vector<8x32xf32>
    %105 = arith.mulf %104, %104 : vector<8x32xf32>
    %cst_46 = arith.constant dense<0.000000e+00> : vector<8xf32>
    %106 = vector.multi_reduction <add>, %105, %cst_46 [1] : vector<8x32xf32> to vector<8xf32>
    %107 = vector.shape_cast %106 : vector<8xf32> to vector<8x1xf32>
    %cst_47 = arith.constant 3.200000e+01 : f32
    %108 = vector.broadcast %cst_47 : f32 to vector<8x1xf32>
    %109 = arith.divf %107, %108 : vector<8x1xf32>
    %110 = vector.broadcast %102 : vector<8x1xf32> to vector<8x32xf32>
    %111 = arith.subf %98, %110 : vector<8x32xf32>
    %cst_48 = arith.constant 9.99999974E-6 : f32
    %112 = vector.broadcast %cst_48 : f32 to vector<8x1xf32>
    %113 = arith.addf %109, %112 : vector<8x1xf32>
    %114 = math.rsqrt %113 : vector<8x1xf32>
    %115 = vector.broadcast %114 : vector<8x1xf32> to vector<8x32xf32>
    %116 = arith.mulf %111, %115 : vector<8x32xf32>
    %117 = vector.broadcast %96 : vector<1x32xf32> to vector<8x32xf32>
    %118 = arith.mulf %116, %117 : vector<8x32xf32>
    %119 = vector.broadcast %97 : vector<1x32xf32> to vector<8x32xf32>
    %120 = arith.addf %118, %119 : vector<8x32xf32>
    %c0_49 = arith.constant 0 : index
    %c0_50 = arith.constant 0 : index
    %121 = vector.load %arg10[%c0_49, %c0_50] : memref<32x128xf32, #tpu.memory_space<vmem>>, vector<32x128xf32>
    %c0_51 = arith.constant 0 : index
    %c0_52 = arith.constant 0 : index
    %122 = vector.load %arg11[%c0_51, %c0_52] : memref<1x128xf32, #tpu.memory_space<vmem>>, vector<1x128xf32>
    %c0_53 = arith.constant 0 : index
    %c0_54 = arith.constant 0 : index
    %123 = vector.load %arg12[%c0_53, %c0_54] : memref<128x32xf32, #tpu.memory_space<vmem>>, vector<128x32xf32>
    %c0_55 = arith.constant 0 : index
    %c0_56 = arith.constant 0 : index
    %124 = vector.load %arg13[%c0_55, %c0_56] : memref<1x32xf32, #tpu.memory_space<vmem>>, vector<1x32xf32>
    %cst_57 = arith.constant dense<0.000000e+00> : vector<8x128xf32>
    %125 = tpu.matmul %120, %121, %cst_57 {dimension_numbers = #tpu.dot_dimension_numbers<[1], [0], [0], [1], [0, 0, 1, 1], [], []>} : vector<8x32xf32>, vector<32x128xf32>, vector<8x128xf32> -> vector<8x128xf32>
    %126 = vector.broadcast %122 : vector<1x128xf32> to vector<8x128xf32>
    %127 = arith.addf %125, %126 : vector<8x128xf32>
    %cst_58 = arith.constant 0.000000e+00 : f32
    %128 = vector.broadcast %cst_58 : f32 to vector<8x128xf32>
    %129 = arith.maximumf %127, %128 : vector<8x128xf32>
    %cst_59 = arith.constant dense<0.000000e+00> : vector<8x32xf32>
    %130 = tpu.matmul %129, %123, %cst_59 {dimension_numbers = #tpu.dot_dimension_numbers<[1], [0], [0], [1], [0, 0, 1, 1], [], []>} : vector<8x128xf32>, vector<128x32xf32>, vector<8x32xf32> -> vector<8x32xf32>
    %131 = vector.broadcast %124 : vector<1x32xf32> to vector<8x32xf32>
    %132 = arith.addf %130, %131 : vector<8x32xf32>
    %c0_60 = arith.constant 0 : index
    %c0_61 = arith.constant 0 : index
    %133 = vector.load %arg14[%c0_60, %c0_61] : memref<1x32xf32, #tpu.memory_space<vmem>>, vector<1x32xf32>
    %c0_62 = arith.constant 0 : index
    %c0_63 = arith.constant 0 : index
    %134 = vector.load %arg15[%c0_62, %c0_63] : memref<1x32xf32, #tpu.memory_space<vmem>>, vector<1x32xf32>
    %135 = arith.addf %132, %120 : vector<8x32xf32>
    %cst_64 = arith.constant dense<0.000000e+00> : vector<8xf32>
    %136 = vector.multi_reduction <add>, %135, %cst_64 [1] : vector<8x32xf32> to vector<8xf32>
    %137 = vector.shape_cast %136 : vector<8xf32> to vector<8x1xf32>
    %cst_65 = arith.constant 3.200000e+01 : f32
    %138 = vector.broadcast %cst_65 : f32 to vector<8x1xf32>
    %139 = arith.divf %137, %138 : vector<8x1xf32>
    %140 = vector.broadcast %139 : vector<8x1xf32> to vector<8x32xf32>
    %141 = arith.subf %135, %140 : vector<8x32xf32>
    %142 = arith.mulf %141, %141 : vector<8x32xf32>
    %cst_66 = arith.constant dense<0.000000e+00> : vector<8xf32>
    %143 = vector.multi_reduction <add>, %142, %cst_66 [1] : vector<8x32xf32> to vector<8xf32>
    %144 = vector.shape_cast %143 : vector<8xf32> to vector<8x1xf32>
    %cst_67 = arith.constant 3.200000e+01 : f32
    %145 = vector.broadcast %cst_67 : f32 to vector<8x1xf32>
    %146 = arith.divf %144, %145 : vector<8x1xf32>
    %147 = vector.broadcast %139 : vector<8x1xf32> to vector<8x32xf32>
    %148 = arith.subf %135, %147 : vector<8x32xf32>
    %cst_68 = arith.constant 9.99999974E-6 : f32
    %149 = vector.broadcast %cst_68 : f32 to vector<8x1xf32>
    %150 = arith.addf %146, %149 : vector<8x1xf32>
    %151 = math.rsqrt %150 : vector<8x1xf32>
    %152 = vector.broadcast %151 : vector<8x1xf32> to vector<8x32xf32>
    %153 = arith.mulf %148, %152 : vector<8x32xf32>
    %154 = vector.broadcast %133 : vector<1x32xf32> to vector<8x32xf32>
    %155 = arith.mulf %153, %154 : vector<8x32xf32>
    %156 = vector.broadcast %134 : vector<1x32xf32> to vector<8x32xf32>
    %157 = arith.addf %155, %156 : vector<8x32xf32>
    %c0_69 = arith.constant 0 : index
    %c0_70 = arith.constant 0 : index
    %c0_71 = arith.constant 0 : index
    %158 = vector.load %arg16[%c0_69, %c0_70, %c0_71] : memref<1x8x32xf32, #tpu.memory_space<vmem>>, vector<1x8x32xf32>
    %159 = vector.shape_cast %158 : vector<1x8x32xf32> to vector<8x32xf32>
    %160 = vector.shape_cast %157 : vector<8x32xf32> to vector<1x8x32xf32>
    tpu.vector_store %arg16[%c0_69, %c0_70, %c0_71], %160 {strides = array<i32>} : memref<1x8x32xf32, #tpu.memory_space<vmem>>, vector<1x8x32xf32>,
    return
  }
  func.func @transform_0(%arg0: i32) -> (i32, i32, i32) {
    %c0_i32 = arith.constant 0 : i32
    %c0_i32_0 = arith.constant 0 : i32
    %c0_i32_1 = arith.constant 0 : i32
    return %arg0, %c0_i32, %c0_i32_0 : i32, i32, i32
  }
  func.func @transform_1(%arg0: i32) -> (i32, i32, i32) {
    %c0_i32 = arith.constant 0 : i32
    %c0_i32_0 = arith.constant 0 : i32
    %c0_i32_1 = arith.constant 0 : i32
    return %arg0, %c0_i32, %c0_i32_0 : i32, i32, i32
  }
  func.func @transform_2(%arg0: i32) -> (i32, i32) {
    %c0_i32 = arith.constant 0 : i32
    %c0_i32_0 = arith.constant 0 : i32
    %c0_i32_1 = arith.constant 0 : i32
    return %c0_i32, %c0_i32_0 : i32, i32
  }
  func.func @transform_3(%arg0: i32) -> (i32, i32) {
    %c0_i32 = arith.constant 0 : i32
    %c0_i32_0 = arith.constant 0 : i32
    %c0_i32_1 = arith.constant 0 : i32
    return %c0_i32, %c0_i32_0 : i32, i32
  }
  func.func @transform_4(%arg0: i32) -> (i32, i32) {
    %c0_i32 = arith.constant 0 : i32
    %c0_i32_0 = arith.constant 0 : i32
    %c0_i32_1 = arith.constant 0 : i32
    return %c0_i32, %c0_i32_0 : i32, i32
  }
  func.func @transform_5(%arg0: i32) -> (i32, i32) {
    %c0_i32 = arith.constant 0 : i32
    %c0_i32_0 = arith.constant 0 : i32
    %c0_i32_1 = arith.constant 0 : i32
    return %c0_i32, %c0_i32_0 : i32, i32
  }
  func.func @transform_6(%arg0: i32) -> (i32, i32) {
    %c0_i32 = arith.constant 0 : i32
    %c0_i32_0 = arith.constant 0 : i32
    %c0_i32_1 = arith.constant 0 : i32
    return %c0_i32, %c0_i32_0 : i32, i32
  }
  func.func @transform_7(%arg0: i32) -> (i32, i32) {
    %c0_i32 = arith.constant 0 : i32
    %c0_i32_0 = arith.constant 0 : i32
    %c0_i32_1 = arith.constant 0 : i32
    return %c0_i32, %c0_i32_0 : i32, i32
  }
  func.func @transform_8(%arg0: i32) -> (i32, i32) {
    %c0_i32 = arith.constant 0 : i32
    %c0_i32_0 = arith.constant 0 : i32
    %c0_i32_1 = arith.constant 0 : i32
    return %c0_i32, %c0_i32_0 : i32, i32
  }
  func.func @transform_9(%arg0: i32) -> (i32, i32) {
    %c0_i32 = arith.constant 0 : i32
    %c0_i32_0 = arith.constant 0 : i32
    %c0_i32_1 = arith.constant 0 : i32
    return %c0_i32, %c0_i32_0 : i32, i32
  }
  func.func @transform_10(%arg0: i32) -> (i32, i32) {
    %c0_i32 = arith.constant 0 : i32
    %c0_i32_0 = arith.constant 0 : i32
    %c0_i32_1 = arith.constant 0 : i32
    return %c0_i32, %c0_i32_0 : i32, i32
  }
  func.func @transform_11(%arg0: i32) -> (i32, i32) {
    %c0_i32 = arith.constant 0 : i32
    %c0_i32_0 = arith.constant 0 : i32
    %c0_i32_1 = arith.constant 0 : i32
    return %c0_i32, %c0_i32_0 : i32, i32
  }
  func.func @transform_12(%arg0: i32) -> (i32, i32) {
    %c0_i32 = arith.constant 0 : i32
    %c0_i32_0 = arith.constant 0 : i32
    %c0_i32_1 = arith.constant 0 : i32
    return %c0_i32, %c0_i32_0 : i32, i32
  }
  func.func @transform_13(%arg0: i32) -> (i32, i32) {
    %c0_i32 = arith.constant 0 : i32
    %c0_i32_0 = arith.constant 0 : i32
    %c0_i32_1 = arith.constant 0 : i32
    return %c0_i32, %c0_i32_0 : i32, i32
  }
  func.func @transform_14(%arg0: i32) -> (i32, i32) {
    %c0_i32 = arith.constant 0 : i32
    %c0_i32_0 = arith.constant 0 : i32
    %c0_i32_1 = arith.constant 0 : i32
    return %c0_i32, %c0_i32_0 : i32, i32
  }
  func.func @transform_15(%arg0: i32) -> (i32, i32, i32) {
    %c0_i32 = arith.constant 0 : i32
    %c0_i32_0 = arith.constant 0 : i32
    %c0_i32_1 = arith.constant 0 : i32
    return %arg0, %c0_i32, %c0_i32_0 : i32, i32, i32
  }
}

module attributes {stable_mosaic.version = 11 : i64} {
  func.func @_linear_kernel(%arg0: i32, %arg1: memref<1x8x32xf32, #tpu.memory_space<vmem>>, %arg2: memref<32x20xf32, #tpu.memory_space<vmem>>, %arg3: memref<1x20xf32, #tpu.memory_space<vmem>>, %arg4: memref<1x8x20xf32, #tpu.memory_space<vmem>>) attributes {dimension_semantics = [#tpu.dimension_semantics<parallel>], iteration_bounds = array<i64: 2>, scalar_prefetch = 0 : i64, scratch_operands = 0 : i64, tpu.core_type = #tpu.core_type<tc>, window_params = [{transform_indices = @transform_0, window_bounds = array<i64: 1, 8, 32>}, {pipeline_mode = #tpu.pipeline_mode<synchronous>, transform_indices = @transform_1, window_bounds = array<i64: 32, 20>}, {pipeline_mode = #tpu.pipeline_mode<synchronous>, transform_indices = @transform_2, window_bounds = array<i64: 1, 20>}, {transform_indices = @transform_3, window_bounds = array<i64: 1, 8, 20>}]} {
    %c0 = arith.constant 0 : index
    %c0_0 = arith.constant 0 : index
    %c0_1 = arith.constant 0 : index
    %0 = vector.load %arg1[%c0, %c0_0, %c0_1] : memref<1x8x32xf32, #tpu.memory_space<vmem>>, vector<1x8x32xf32>
    %1 = vector.shape_cast %0 : vector<1x8x32xf32> to vector<8x32xf32>
    %c0_2 = arith.constant 0 : index
    %c0_3 = arith.constant 0 : index
    %2 = vector.load %arg2[%c0_2, %c0_3] : memref<32x20xf32, #tpu.memory_space<vmem>>, vector<32x20xf32>
    %cst = arith.constant dense<0.000000e+00> : vector<8x20xf32>
    %3 = tpu.matmul %1, %2, %cst {dimension_numbers = #tpu.dot_dimension_numbers<[1], [0], [0], [1], [0, 0, 1, 1], [], []>} : vector<8x32xf32>, vector<32x20xf32>, vector<8x20xf32> -> vector<8x20xf32>
    %c0_4 = arith.constant 0 : index
    %c0_5 = arith.constant 0 : index
    %4 = vector.load %arg3[%c0_4, %c0_5] : memref<1x20xf32, #tpu.memory_space<vmem>>, vector<1x20xf32>
    %5 = vector.broadcast %4 : vector<1x20xf32> to vector<8x20xf32>
    %6 = arith.addf %3, %5 : vector<8x20xf32>
    %c0_6 = arith.constant 0 : index
    %c0_7 = arith.constant 0 : index
    %c0_8 = arith.constant 0 : index
    %7 = vector.load %arg4[%c0_6, %c0_7, %c0_8] : memref<1x8x20xf32, #tpu.memory_space<vmem>>, vector<1x8x20xf32>
    %8 = vector.shape_cast %7 : vector<1x8x20xf32> to vector<8x20xf32>
    %9 = vector.shape_cast %6 : vector<8x20xf32> to vector<1x8x20xf32>
    tpu.vector_store %arg4[%c0_6, %c0_7, %c0_8], %9 {strides = array<i32>} : memref<1x8x20xf32, #tpu.memory_space<vmem>>, vector<1x8x20xf32>,
    return
  }
  func.func @transform_0(%arg0: i32) -> (i32, i32, i32) {
    %c0_i32 = arith.constant 0 : i32
    %c0_i32_0 = arith.constant 0 : i32
    %c0_i32_1 = arith.constant 0 : i32
    return %arg0, %c0_i32, %c0_i32_0 : i32, i32, i32
  }
  func.func @transform_1(%arg0: i32) -> (i32, i32) {
    %c0_i32 = arith.constant 0 : i32
    %c0_i32_0 = arith.constant 0 : i32
    %c0_i32_1 = arith.constant 0 : i32
    return %c0_i32, %c0_i32_0 : i32, i32
  }
  func.func @transform_2(%arg0: i32) -> (i32, i32) {
    %c0_i32 = arith.constant 0 : i32
    %c0_i32_0 = arith.constant 0 : i32
    %c0_i32_1 = arith.constant 0 : i32
    return %c0_i32, %c0_i32_0 : i32, i32
  }
  func.func @transform_3(%arg0: i32) -> (i32, i32, i32) {
    %c0_i32 = arith.constant 0 : i32
    %c0_i32_0 = arith.constant 0 : i32
    %c0_i32_1 = arith.constant 0 : i32
    return %arg0, %c0_i32, %c0_i32_0 : i32, i32, i32
  }
}

module attributes {stable_mosaic.version = 11 : i64} {
  func.func @_decoder_block_kernel(%arg0: i32, %arg1: memref<1x8x32xf32, #tpu.memory_space<vmem>>, %arg2: memref<1x8x32xf32, #tpu.memory_space<vmem>>, %arg3: memref<1x8x8xf32, #tpu.memory_space<vmem>>, %arg4: memref<1x1x8xf32, #tpu.memory_space<vmem>>, %arg5: memref<32x32xf32, #tpu.memory_space<vmem>>, %arg6: memref<32x32xf32, #tpu.memory_space<vmem>>, %arg7: memref<32x32xf32, #tpu.memory_space<vmem>>, %arg8: memref<32x32xf32, #tpu.memory_space<vmem>>, %arg9: memref<1x32xf32, #tpu.memory_space<vmem>>, %arg10: memref<1x32xf32, #tpu.memory_space<vmem>>, %arg11: memref<1x32xf32, #tpu.memory_space<vmem>>, %arg12: memref<32x32xf32, #tpu.memory_space<vmem>>, %arg13: memref<32x32xf32, #tpu.memory_space<vmem>>, %arg14: memref<32x32xf32, #tpu.memory_space<vmem>>, %arg15: memref<32x32xf32, #tpu.memory_space<vmem>>, %arg16: memref<1x32xf32, #tpu.memory_space<vmem>>, %arg17: memref<1x32xf32, #tpu.memory_space<vmem>>, %arg18: memref<1x32xf32, #tpu.memory_space<vmem>>, %arg19: memref<32x128xf32, #tpu.memory_space<vmem>>, %arg20: memref<1x128xf32, #tpu.memory_space<vmem>>, %arg21: memref<128x32xf32, #tpu.memory_space<vmem>>, %arg22: memref<1x32xf32, #tpu.memory_space<vmem>>, %arg23: memref<1x32xf32, #tpu.memory_space<vmem>>, %arg24: memref<1x32xf32, #tpu.memory_space<vmem>>, %arg25: memref<1x8x32xf32, #tpu.memory_space<vmem>>) attributes {dimension_semantics = [#tpu.dimension_semantics<parallel>], iteration_bounds = array<i64: 2>, scalar_prefetch = 0 : i64, scratch_operands = 0 : i64, tpu.core_type = #tpu.core_type<tc>, window_params = [{transform_indices = @transform_0, window_bounds = array<i64: 1, 8, 32>}, {transform_indices = @transform_1, window_bounds = array<i64: 1, 8, 32>}, {pipeline_mode = #tpu.pipeline_mode<synchronous>, transform_indices = @transform_2, window_bounds = array<i64: 1, 8, 8>}, {transform_indices = @transform_3, window_bounds = array<i64: 1, 1, 8>}, {pipeline_mode = #tpu.pipeline_mode<synchronous>, transform_indices = @transform_4, window_bounds = array<i64: 32, 32>}, {pipeline_mode = #tpu.pipeline_mode<synchronous>, transform_indices = @transform_5, window_bounds = array<i64: 32, 32>}, {pipeline_mode = #tpu.pipeline_mode<synchronous>, transform_indices = @transform_6, window_bounds = array<i64: 32, 32>}, {pipeline_mode = #tpu.pipeline_mode<synchronous>, transform_indices = @transform_7, window_bounds = array<i64: 32, 32>}, {pipeline_mode = #tpu.pipeline_mode<synchronous>, transform_indices = @transform_8, window_bounds = array<i64: 1, 32>}, {pipeline_mode = #tpu.pipeline_mode<synchronous>, transform_indices = @transform_9, window_bounds = array<i64: 1, 32>}, {pipeline_mode = #tpu.pipeline_mode<synchronous>, transform_indices = @transform_10, window_bounds = array<i64: 1, 32>}, {pipeline_mode = #tpu.pipeline_mode<synchronous>, transform_indices = @transform_11, window_bounds = array<i64: 32, 32>}, {pipeline_mode = #tpu.pipeline_mode<synchronous>, transform_indices = @transform_12, window_bounds = array<i64: 32, 32>}, {pipeline_mode = #tpu.pipeline_mode<synchronous>, transform_indices = @transform_13, window_bounds = array<i64: 32, 32>}, {pipeline_mode = #tpu.pipeline_mode<synchronous>, transform_indices = @transform_14, window_bounds = array<i64: 32, 32>}, {pipeline_mode = #tpu.pipeline_mode<synchronous>, transform_indices = @transform_15, window_bounds = array<i64: 1, 32>}, {pipeline_mode = #tpu.pipeline_mode<synchronous>, transform_indices = @transform_16, window_bounds = array<i64: 1, 32>}, {pipeline_mode = #tpu.pipeline_mode<synchronous>, transform_indices = @transform_17, window_bounds = array<i64: 1, 32>}, {pipeline_mode = #tpu.pipeline_mode<synchronous>, transform_indices = @transform_18, window_bounds = array<i64: 32, 128>}, {pipeline_mode = #tpu.pipeline_mode<synchronous>, transform_indices = @transform_19, window_bounds = array<i64: 1, 128>}, {pipeline_mode = #tpu.pipeline_mode<synchronous>, transform_indices = @transform_20, window_bounds = array<i64: 128, 32>}, {pipeline_mode = #tpu.pipeline_mode<synchronous>, transform_indices = @transform_21, window_bounds = array<i64: 1, 32>}, {pipeline_mode = #tpu.pipeline_mode<synchronous>, transform_indices = @transform_22, window_bounds = array<i64: 1, 32>}, {pipeline_mode = #tpu.pipeline_mode<synchronous>, transform_indices = @transform_23, window_bounds = array<i64: 1, 32>}, {transform_indices = @transform_24, window_bounds = array<i64: 1, 8, 32>}]} {
    %c0 = arith.constant 0 : index
    %c0_0 = arith.constant 0 : index
    %c0_1 = arith.constant 0 : index
    %0 = vector.load %arg1[%c0, %c0_0, %c0_1] : memref<1x8x32xf32, #tpu.memory_space<vmem>>, vector<1x8x32xf32>
    %1 = vector.shape_cast %0 : vector<1x8x32xf32> to vector<8x32xf32>
    %c0_2 = arith.constant 0 : index
    %c0_3 = arith.constant 0 : index
    %c0_4 = arith.constant 0 : index
    %2 = vector.load %arg2[%c0_2, %c0_3, %c0_4] : memref<1x8x32xf32, #tpu.memory_space<vmem>>, vector<1x8x32xf32>
    %3 = vector.shape_cast %2 : vector<1x8x32xf32> to vector<8x32xf32>
    %c0_5 = arith.constant 0 : index
    %c0_6 = arith.constant 0 : index
    %c0_7 = arith.constant 0 : index
    %4 = vector.load %arg3[%c0_5, %c0_6, %c0_7] : memref<1x8x8xf32, #tpu.memory_space<vmem>>, vector<1x8x8xf32>
    %5 = vector.shape_cast %4 : vector<1x8x8xf32> to vector<8x8xf32>
    %c0_8 = arith.constant 0 : index
    %c0_9 = arith.constant 0 : index
    %6 = vector.load %arg5[%c0_8, %c0_9] : memref<32x32xf32, #tpu.memory_space<vmem>>, vector<32x32xf32>
    %c0_10 = arith.constant 0 : index
    %c0_11 = arith.constant 0 : index
    %7 = vector.load %arg6[%c0_10, %c0_11] : memref<32x32xf32, #tpu.memory_space<vmem>>, vector<32x32xf32>
    %c0_12 = arith.constant 0 : index
    %c0_13 = arith.constant 0 : index
    %8 = vector.load %arg7[%c0_12, %c0_13] : memref<32x32xf32, #tpu.memory_space<vmem>>, vector<32x32xf32>
    %c0_14 = arith.constant 0 : index
    %c0_15 = arith.constant 0 : index
    %9 = vector.load %arg8[%c0_14, %c0_15] : memref<32x32xf32, #tpu.memory_space<vmem>>, vector<32x32xf32>
    %c0_16 = arith.constant 0 : index
    %c0_17 = arith.constant 0 : index
    %10 = vector.load %arg9[%c0_16, %c0_17] : memref<1x32xf32, #tpu.memory_space<vmem>>, vector<1x32xf32>
    %cst = arith.constant dense<0.000000e+00> : vector<8x32xf32>
    %11 = tpu.matmul %1, %6, %cst {dimension_numbers = #tpu.dot_dimension_numbers<[1], [0], [0], [1], [0, 0, 1, 1], [], []>} : vector<8x32xf32>, vector<32x32xf32>, vector<8x32xf32> -> vector<8x32xf32>
    %cst_18 = arith.constant 0.176776692 : f32
    %12 = vector.broadcast %cst_18 : f32 to vector<8x32xf32>
    %13 = arith.mulf %11, %12 : vector<8x32xf32>
    %cst_19 = arith.constant dense<0.000000e+00> : vector<8x32xf32>
    %14 = tpu.matmul %1, %7, %cst_19 {dimension_numbers = #tpu.dot_dimension_numbers<[1], [0], [0], [1], [0, 0, 1, 1], [], []>} : vector<8x32xf32>, vector<32x32xf32>, vector<8x32xf32> -> vector<8x32xf32>
    %cst_20 = arith.constant dense<0.000000e+00> : vector<8x32xf32>
    %15 = tpu.matmul %1, %8, %cst_20 {dimension_numbers = #tpu.dot_dimension_numbers<[1], [0], [0], [1], [0, 0, 1, 1], [], []>} : vector<8x32xf32>, vector<32x32xf32>, vector<8x32xf32> -> vector<8x32xf32>
    %cst_21 = arith.constant 0.000000e+00 : f32
    %16 = vector.broadcast %cst_21 : f32 to vector<8x8xf32>
    %17 = arith.cmpf oeq, %5, %16 : vector<8x8xf32>
    %18 = vector.extract_strided_slice %13 {offsets = [0, 0], sizes = [8, 8], strides = [1, 1]} : vector<8x32xf32> to vector<8x8xf32>
    %19 = vector.extract_strided_slice %14 {offsets = [0, 0], sizes = [8, 8], strides = [1, 1]} : vector<8x32xf32> to vector<8x8xf32>
    %cst_22 = arith.constant dense<0.000000e+00> : vector<8x8xf32>
    %20 = tpu.matmul %18, %19, %cst_22 {dimension_numbers = #tpu.dot_dimension_numbers<[1], [1], [0], [0], [0, 0, 1, 0], [], []>} : vector<8x8xf32>, vector<8x8xf32>, vector<8x8xf32> -> vector<8x8xf32>
    %cst_23 = arith.constant -1.000000e+20 : f32
    %21 = vector.broadcast %cst_23 : f32 to vector<8x8xf32>
    %22 = arith.select %17, %21, %20 : vector<8x8xi1>, vector<8x8xf32>
    %cst_24 = arith.constant dense<0xFF800000> : vector<8xf32>
    %23 = vector.multi_reduction <maximumf>, %22, %cst_24 [1] : vector<8x8xf32> to vector<8xf32>
    %24 = vector.shape_cast %23 : vector<8xf32> to vector<8x1xf32>
    %25 = vector.broadcast %24 : vector<8x1xf32> to vector<8x8xf32>
    %26 = arith.subf %22, %25 : vector<8x8xf32>
    %27 = math.exp %26 : vector<8x8xf32>
    %cst_25 = arith.constant dense<0.000000e+00> : vector<8xf32>
    %28 = vector.multi_reduction <add>, %27, %cst_25 [1] : vector<8x8xf32> to vector<8xf32>
    %29 = vector.shape_cast %28 : vector<8xf32> to vector<8x1xf32>
    %30 = tpu.reciprocal %29 {approx = true} : vector<8x1xf32> -> vector<8x1xf32>
    %31 = vector.broadcast %30 : vector<8x1xf32> to vector<8x8xf32>
    %32 = arith.mulf %27, %31 : vector<8x8xf32>
    %33 = vector.extract_strided_slice %15 {offsets = [0, 0], sizes = [8, 8], strides = [1, 1]} : vector<8x32xf32> to vector<8x8xf32>
    %cst_26 = arith.constant dense<0.000000e+00> : vector<8x8xf32>
    %34 = tpu.matmul %32, %33, %cst_26 {dimension_numbers = #tpu.dot_dimension_numbers<[1], [0], [0], [1], [0, 0, 1, 1], [], []>} : vector<8x8xf32>, vector<8x8xf32>, vector<8x8xf32> -> vector<8x8xf32>
    %35 = vector.extract_strided_slice %13 {offsets = [0, 8], sizes = [8, 8], strides = [1, 1]} : vector<8x32xf32> to vector<8x8xf32>
    %36 = vector.extract_strided_slice %14 {offsets = [0, 8], sizes = [8, 8], strides = [1, 1]} : vector<8x32xf32> to vector<8x8xf32>
    %cst_27 = arith.constant dense<0.000000e+00> : vector<8x8xf32>
    %37 = tpu.matmul %35, %36, %cst_27 {dimension_numbers = #tpu.dot_dimension_numbers<[1], [1], [0], [0], [0, 0, 1, 0], [], []>} : vector<8x8xf32>, vector<8x8xf32>, vector<8x8xf32> -> vector<8x8xf32>
    %cst_28 = arith.constant -1.000000e+20 : f32
    %38 = vector.broadcast %cst_28 : f32 to vector<8x8xf32>
    %39 = arith.select %17, %38, %37 : vector<8x8xi1>, vector<8x8xf32>
    %cst_29 = arith.constant dense<0xFF800000> : vector<8xf32>
    %40 = vector.multi_reduction <maximumf>, %39, %cst_29 [1] : vector<8x8xf32> to vector<8xf32>
    %41 = vector.shape_cast %40 : vector<8xf32> to vector<8x1xf32>
    %42 = vector.broadcast %41 : vector<8x1xf32> to vector<8x8xf32>
    %43 = arith.subf %39, %42 : vector<8x8xf32>
    %44 = math.exp %43 : vector<8x8xf32>
    %cst_30 = arith.constant dense<0.000000e+00> : vector<8xf32>
    %45 = vector.multi_reduction <add>, %44, %cst_30 [1] : vector<8x8xf32> to vector<8xf32>
    %46 = vector.shape_cast %45 : vector<8xf32> to vector<8x1xf32>
    %47 = tpu.reciprocal %46 {approx = true} : vector<8x1xf32> -> vector<8x1xf32>
    %48 = vector.broadcast %47 : vector<8x1xf32> to vector<8x8xf32>
    %49 = arith.mulf %44, %48 : vector<8x8xf32>
    %50 = vector.extract_strided_slice %15 {offsets = [0, 8], sizes = [8, 8], strides = [1, 1]} : vector<8x32xf32> to vector<8x8xf32>
    %cst_31 = arith.constant dense<0.000000e+00> : vector<8x8xf32>
    %51 = tpu.matmul %49, %50, %cst_31 {dimension_numbers = #tpu.dot_dimension_numbers<[1], [0], [0], [1], [0, 0, 1, 1], [], []>} : vector<8x8xf32>, vector<8x8xf32>, vector<8x8xf32> -> vector<8x8xf32>
    %52 = vector.extract_strided_slice %13 {offsets = [0, 16], sizes = [8, 8], strides = [1, 1]} : vector<8x32xf32> to vector<8x8xf32>
    %53 = vector.extract_strided_slice %14 {offsets = [0, 16], sizes = [8, 8], strides = [1, 1]} : vector<8x32xf32> to vector<8x8xf32>
    %cst_32 = arith.constant dense<0.000000e+00> : vector<8x8xf32>
    %54 = tpu.matmul %52, %53, %cst_32 {dimension_numbers = #tpu.dot_dimension_numbers<[1], [1], [0], [0], [0, 0, 1, 0], [], []>} : vector<8x8xf32>, vector<8x8xf32>, vector<8x8xf32> -> vector<8x8xf32>
    %cst_33 = arith.constant -1.000000e+20 : f32
    %55 = vector.broadcast %cst_33 : f32 to vector<8x8xf32>
    %56 = arith.select %17, %55, %54 : vector<8x8xi1>, vector<8x8xf32>
    %cst_34 = arith.constant dense<0xFF800000> : vector<8xf32>
    %57 = vector.multi_reduction <maximumf>, %56, %cst_34 [1] : vector<8x8xf32> to vector<8xf32>
    %58 = vector.shape_cast %57 : vector<8xf32> to vector<8x1xf32>
    %59 = vector.broadcast %58 : vector<8x1xf32> to vector<8x8xf32>
    %60 = arith.subf %56, %59 : vector<8x8xf32>
    %61 = math.exp %60 : vector<8x8xf32>
    %cst_35 = arith.constant dense<0.000000e+00> : vector<8xf32>
    %62 = vector.multi_reduction <add>, %61, %cst_35 [1] : vector<8x8xf32> to vector<8xf32>
    %63 = vector.shape_cast %62 : vector<8xf32> to vector<8x1xf32>
    %64 = tpu.reciprocal %63 {approx = true} : vector<8x1xf32> -> vector<8x1xf32>
    %65 = vector.broadcast %64 : vector<8x1xf32> to vector<8x8xf32>
    %66 = arith.mulf %61, %65 : vector<8x8xf32>
    %67 = vector.extract_strided_slice %15 {offsets = [0, 16], sizes = [8, 8], strides = [1, 1]} : vector<8x32xf32> to vector<8x8xf32>
    %cst_36 = arith.constant dense<0.000000e+00> : vector<8x8xf32>
    %68 = tpu.matmul %66, %67, %cst_36 {dimension_numbers = #tpu.dot_dimension_numbers<[1], [0], [0], [1], [0, 0, 1, 1], [], []>} : vector<8x8xf32>, vector<8x8xf32>, vector<8x8xf32> -> vector<8x8xf32>
    %69 = vector.extract_strided_slice %13 {offsets = [0, 24], sizes = [8, 8], strides = [1, 1]} : vector<8x32xf32> to vector<8x8xf32>
    %70 = vector.extract_strided_slice %14 {offsets = [0, 24], sizes = [8, 8], strides = [1, 1]} : vector<8x32xf32> to vector<8x8xf32>
    %cst_37 = arith.constant dense<0.000000e+00> : vector<8x8xf32>
    %71 = tpu.matmul %69, %70, %cst_37 {dimension_numbers = #tpu.dot_dimension_numbers<[1], [1], [0], [0], [0, 0, 1, 0], [], []>} : vector<8x8xf32>, vector<8x8xf32>, vector<8x8xf32> -> vector<8x8xf32>
    %cst_38 = arith.constant -1.000000e+20 : f32
    %72 = vector.broadcast %cst_38 : f32 to vector<8x8xf32>
    %73 = arith.select %17, %72, %71 : vector<8x8xi1>, vector<8x8xf32>
    %cst_39 = arith.constant dense<0xFF800000> : vector<8xf32>
    %74 = vector.multi_reduction <maximumf>, %73, %cst_39 [1] : vector<8x8xf32> to vector<8xf32>
    %75 = vector.shape_cast %74 : vector<8xf32> to vector<8x1xf32>
    %76 = vector.broadcast %75 : vector<8x1xf32> to vector<8x8xf32>
    %77 = arith.subf %73, %76 : vector<8x8xf32>
    %78 = math.exp %77 : vector<8x8xf32>
    %cst_40 = arith.constant dense<0.000000e+00> : vector<8xf32>
    %79 = vector.multi_reduction <add>, %78, %cst_40 [1] : vector<8x8xf32> to vector<8xf32>
    %80 = vector.shape_cast %79 : vector<8xf32> to vector<8x1xf32>
    %81 = tpu.reciprocal %80 {approx = true} : vector<8x1xf32> -> vector<8x1xf32>
    %82 = vector.broadcast %81 : vector<8x1xf32> to vector<8x8xf32>
    %83 = arith.mulf %78, %82 : vector<8x8xf32>
    %84 = vector.extract_strided_slice %15 {offsets = [0, 24], sizes = [8, 8], strides = [1, 1]} : vector<8x32xf32> to vector<8x8xf32>
    %cst_41 = arith.constant dense<0.000000e+00> : vector<8x8xf32>
    %85 = tpu.matmul %83, %84, %cst_41 {dimension_numbers = #tpu.dot_dimension_numbers<[1], [0], [0], [1], [0, 0, 1, 1], [], []>} : vector<8x8xf32>, vector<8x8xf32>, vector<8x8xf32> -> vector<8x8xf32>
    %86 = tpu.concatenate %34, %51, %68, %85 in 1 : vector<8x8xf32>, vector<8x8xf32>, vector<8x8xf32>, vector<8x8xf32> -> vector<8x32xf32>
    %cst_42 = arith.constant dense<0.000000e+00> : vector<8x32xf32>
    %87 = tpu.matmul %86, %9, %cst_42 {dimension_numbers = #tpu.dot_dimension_numbers<[1], [0], [0], [1], [0, 0, 1, 1], [], []>} : vector<8x32xf32>, vector<32x32xf32>, vector<8x32xf32> -> vector<8x32xf32>
    %88 = vector.broadcast %10 : vector<1x32xf32> to vector<8x32xf32>
    %89 = arith.addf %87, %88 : vector<8x32xf32>
    %c0_43 = arith.constant 0 : index
    %c0_44 = arith.constant 0 : index
    %90 = vector.load %arg10[%c0_43, %c0_44] : memref<1x32xf32, #tpu.memory_space<vmem>>, vector<1x32xf32>
    %c0_45 = arith.constant 0 : index
    %c0_46 = arith.constant 0 : index
    %91 = vector.load %arg11[%c0_45, %c0_46] : memref<1x32xf32, #tpu.memory_space<vmem>>, vector<1x32xf32>
    %92 = arith.addf %89, %1 : vector<8x32xf32>
    %cst_47 = arith.constant dense<0.000000e+00> : vector<8xf32>
    %93 = vector.multi_reduction <add>, %92, %cst_47 [1] : vector<8x32xf32> to vector<8xf32>
    %94 = vector.shape_cast %93 : vector<8xf32> to vector<8x1xf32>
    %cst_48 = arith.constant 3.200000e+01 : f32
    %95 = vector.broadcast %cst_48 : f32 to vector<8x1xf32>
    %96 = arith.divf %94, %95 : vector<8x1xf32>
    %97 = vector.broadcast %96 : vector<8x1xf32> to vector<8x32xf32>
    %98 = arith.subf %92, %97 : vector<8x32xf32>
    %99 = arith.mulf %98, %98 : vector<8x32xf32>
    %cst_49 = arith.constant dense<0.000000e+00> : vector<8xf32>
    %100 = vector.multi_reduction <add>, %99, %cst_49 [1] : vector<8x32xf32> to vector<8xf32>
    %101 = vector.shape_cast %100 : vector<8xf32> to vector<8x1xf32>
    %cst_50 = arith.constant 3.200000e+01 : f32
    %102 = vector.broadcast %cst_50 : f32 to vector<8x1xf32>
    %103 = arith.divf %101, %102 : vector<8x1xf32>
    %104 = vector.broadcast %96 : vector<8x1xf32> to vector<8x32xf32>
    %105 = arith.subf %92, %104 : vector<8x32xf32>
    %cst_51 = arith.constant 9.99999974E-6 : f32
    %106 = vector.broadcast %cst_51 : f32 to vector<8x1xf32>
    %107 = arith.addf %103, %106 : vector<8x1xf32>
    %108 = math.rsqrt %107 : vector<8x1xf32>
    %109 = vector.broadcast %108 : vector<8x1xf32> to vector<8x32xf32>
    %110 = arith.mulf %105, %109 : vector<8x32xf32>
    %111 = vector.broadcast %90 : vector<1x32xf32> to vector<8x32xf32>
    %112 = arith.mulf %110, %111 : vector<8x32xf32>
    %113 = vector.broadcast %91 : vector<1x32xf32> to vector<8x32xf32>
    %114 = arith.addf %112, %113 : vector<8x32xf32>
    %c0_52 = arith.constant 0 : index
    %c0_53 = arith.constant 0 : index
    %c0_54 = arith.constant 0 : index
    %115 = vector.load %arg4[%c0_52, %c0_53, %c0_54] : memref<1x1x8xf32, #tpu.memory_space<vmem>>, vector<1x1x8xf32>
    %116 = vector.shape_cast %115 : vector<1x1x8xf32> to vector<1x8xf32>
    %c0_55 = arith.constant 0 : index
    %c0_56 = arith.constant 0 : index
    %117 = vector.load %arg12[%c0_55, %c0_56] : memref<32x32xf32, #tpu.memory_space<vmem>>, vector<32x32xf32>
    %c0_57 = arith.constant 0 : index
    %c0_58 = arith.constant 0 : index
    %118 = vector.load %arg13[%c0_57, %c0_58] : memref<32x32xf32, #tpu.memory_space<vmem>>, vector<32x32xf32>
    %c0_59 = arith.constant 0 : index
    %c0_60 = arith.constant 0 : index
    %119 = vector.load %arg14[%c0_59, %c0_60] : memref<32x32xf32, #tpu.memory_space<vmem>>, vector<32x32xf32>
    %c0_61 = arith.constant 0 : index
    %c0_62 = arith.constant 0 : index
    %120 = vector.load %arg15[%c0_61, %c0_62] : memref<32x32xf32, #tpu.memory_space<vmem>>, vector<32x32xf32>
    %c0_63 = arith.constant 0 : index
    %c0_64 = arith.constant 0 : index
    %121 = vector.load %arg16[%c0_63, %c0_64] : memref<1x32xf32, #tpu.memory_space<vmem>>, vector<1x32xf32>
    %cst_65 = arith.constant dense<0.000000e+00> : vector<8x32xf32>
    %122 = tpu.matmul %114, %117, %cst_65 {dimension_numbers = #tpu.dot_dimension_numbers<[1], [0], [0], [1], [0, 0, 1, 1], [], []>} : vector<8x32xf32>, vector<32x32xf32>, vector<8x32xf32> -> vector<8x32xf32>
    %cst_66 = arith.constant 0.176776692 : f32
    %123 = vector.broadcast %cst_66 : f32 to vector<8x32xf32>
    %124 = arith.mulf %122, %123 : vector<8x32xf32>
    %cst_67 = arith.constant dense<0.000000e+00> : vector<8x32xf32>
    %125 = tpu.matmul %3, %118, %cst_67 {dimension_numbers = #tpu.dot_dimension_numbers<[1], [0], [0], [1], [0, 0, 1, 1], [], []>} : vector<8x32xf32>, vector<32x32xf32>, vector<8x32xf32> -> vector<8x32xf32>
    %cst_68 = arith.constant dense<0.000000e+00> : vector<8x32xf32>
    %126 = tpu.matmul %3, %119, %cst_68 {dimension_numbers = #tpu.dot_dimension_numbers<[1], [0], [0], [1], [0, 0, 1, 1], [], []>} : vector<8x32xf32>, vector<32x32xf32>, vector<8x32xf32> -> vector<8x32xf32>
    %cst_69 = arith.constant 0.000000e+00 : f32
    %127 = vector.broadcast %cst_69 : f32 to vector<1x8xf32>
    %128 = arith.cmpf oeq, %116, %127 : vector<1x8xf32>
    %129 = vector.extract_strided_slice %124 {offsets = [0, 0], sizes = [8, 8], strides = [1, 1]} : vector<8x32xf32> to vector<8x8xf32>
    %130 = vector.extract_strided_slice %125 {offsets = [0, 0], sizes = [8, 8], strides = [1, 1]} : vector<8x32xf32> to vector<8x8xf32>
    %cst_70 = arith.constant dense<0.000000e+00> : vector<8x8xf32>
    %131 = tpu.matmul %129, %130, %cst_70 {dimension_numbers = #tpu.dot_dimension_numbers<[1], [1], [0], [0], [0, 0, 1, 0], [], []>} : vector<8x8xf32>, vector<8x8xf32>, vector<8x8xf32> -> vector<8x8xf32>
    %cst_71 = arith.constant -1.000000e+20 : f32
    %132 = vector.shape_cast %128 : vector<1x8xi1> to vector<1x8xi1>
    %133 = vector.broadcast %132 : vector<1x8xi1> to vector<8x8xi1>
    %134 = vector.broadcast %cst_71 : f32 to vector<8x8xf32>
    %135 = arith.select %133, %134, %131 : vector<8x8xi1>, vector<8x8xf32>
    %cst_72 = arith.constant dense<0xFF800000> : vector<8xf32>
    %136 = vector.multi_reduction <maximumf>, %135, %cst_72 [1] : vector<8x8xf32> to vector<8xf32>
    %137 = vector.shape_cast %136 : vector<8xf32> to vector<8x1xf32>
    %138 = vector.broadcast %137 : vector<8x1xf32> to vector<8x8xf32>
    %139 = arith.subf %135, %138 : vector<8x8xf32>
    %140 = math.exp %139 : vector<8x8xf32>
    %cst_73 = arith.constant dense<0.000000e+00> : vector<8xf32>
    %141 = vector.multi_reduction <add>, %140, %cst_73 [1] : vector<8x8xf32> to vector<8xf32>
    %142 = vector.shape_cast %141 : vector<8xf32> to vector<8x1xf32>
    %143 = tpu.reciprocal %142 {approx = true} : vector<8x1xf32> -> vector<8x1xf32>
    %144 = vector.broadcast %143 : vector<8x1xf32> to vector<8x8xf32>
    %145 = arith.mulf %140, %144 : vector<8x8xf32>
    %146 = vector.extract_strided_slice %126 {offsets = [0, 0], sizes = [8, 8], strides = [1, 1]} : vector<8x32xf32> to vector<8x8xf32>
    %cst_74 = arith.constant dense<0.000000e+00> : vector<8x8xf32>
    %147 = tpu.matmul %145, %146, %cst_74 {dimension_numbers = #tpu.dot_dimension_numbers<[1], [0], [0], [1], [0, 0, 1, 1], [], []>} : vector<8x8xf32>, vector<8x8xf32>, vector<8x8xf32> -> vector<8x8xf32>
    %148 = vector.extract_strided_slice %124 {offsets = [0, 8], sizes = [8, 8], strides = [1, 1]} : vector<8x32xf32> to vector<8x8xf32>
    %149 = vector.extract_strided_slice %125 {offsets = [0, 8], sizes = [8, 8], strides = [1, 1]} : vector<8x32xf32> to vector<8x8xf32>
    %cst_75 = arith.constant dense<0.000000e+00> : vector<8x8xf32>
    %150 = tpu.matmul %148, %149, %cst_75 {dimension_numbers = #tpu.dot_dimension_numbers<[1], [1], [0], [0], [0, 0, 1, 0], [], []>} : vector<8x8xf32>, vector<8x8xf32>, vector<8x8xf32> -> vector<8x8xf32>
    %cst_76 = arith.constant -1.000000e+20 : f32
    %151 = vector.shape_cast %128 : vector<1x8xi1> to vector<1x8xi1>
    %152 = vector.broadcast %151 : vector<1x8xi1> to vector<8x8xi1>
    %153 = vector.broadcast %cst_76 : f32 to vector<8x8xf32>
    %154 = arith.select %152, %153, %150 : vector<8x8xi1>, vector<8x8xf32>
    %cst_77 = arith.constant dense<0xFF800000> : vector<8xf32>
    %155 = vector.multi_reduction <maximumf>, %154, %cst_77 [1] : vector<8x8xf32> to vector<8xf32>
    %156 = vector.shape_cast %155 : vector<8xf32> to vector<8x1xf32>
    %157 = vector.broadcast %156 : vector<8x1xf32> to vector<8x8xf32>
    %158 = arith.subf %154, %157 : vector<8x8xf32>
    %159 = math.exp %158 : vector<8x8xf32>
    %cst_78 = arith.constant dense<0.000000e+00> : vector<8xf32>
    %160 = vector.multi_reduction <add>, %159, %cst_78 [1] : vector<8x8xf32> to vector<8xf32>
    %161 = vector.shape_cast %160 : vector<8xf32> to vector<8x1xf32>
    %162 = tpu.reciprocal %161 {approx = true} : vector<8x1xf32> -> vector<8x1xf32>
    %163 = vector.broadcast %162 : vector<8x1xf32> to vector<8x8xf32>
    %164 = arith.mulf %159, %163 : vector<8x8xf32>
    %165 = vector.extract_strided_slice %126 {offsets = [0, 8], sizes = [8, 8], strides = [1, 1]} : vector<8x32xf32> to vector<8x8xf32>
    %cst_79 = arith.constant dense<0.000000e+00> : vector<8x8xf32>
    %166 = tpu.matmul %164, %165, %cst_79 {dimension_numbers = #tpu.dot_dimension_numbers<[1], [0], [0], [1], [0, 0, 1, 1], [], []>} : vector<8x8xf32>, vector<8x8xf32>, vector<8x8xf32> -> vector<8x8xf32>
    %167 = vector.extract_strided_slice %124 {offsets = [0, 16], sizes = [8, 8], strides = [1, 1]} : vector<8x32xf32> to vector<8x8xf32>
    %168 = vector.extract_strided_slice %125 {offsets = [0, 16], sizes = [8, 8], strides = [1, 1]} : vector<8x32xf32> to vector<8x8xf32>
    %cst_80 = arith.constant dense<0.000000e+00> : vector<8x8xf32>
    %169 = tpu.matmul %167, %168, %cst_80 {dimension_numbers = #tpu.dot_dimension_numbers<[1], [1], [0], [0], [0, 0, 1, 0], [], []>} : vector<8x8xf32>, vector<8x8xf32>, vector<8x8xf32> -> vector<8x8xf32>
    %cst_81 = arith.constant -1.000000e+20 : f32
    %170 = vector.shape_cast %128 : vector<1x8xi1> to vector<1x8xi1>
    %171 = vector.broadcast %170 : vector<1x8xi1> to vector<8x8xi1>
    %172 = vector.broadcast %cst_81 : f32 to vector<8x8xf32>
    %173 = arith.select %171, %172, %169 : vector<8x8xi1>, vector<8x8xf32>
    %cst_82 = arith.constant dense<0xFF800000> : vector<8xf32>
    %174 = vector.multi_reduction <maximumf>, %173, %cst_82 [1] : vector<8x8xf32> to vector<8xf32>
    %175 = vector.shape_cast %174 : vector<8xf32> to vector<8x1xf32>
    %176 = vector.broadcast %175 : vector<8x1xf32> to vector<8x8xf32>
    %177 = arith.subf %173, %176 : vector<8x8xf32>
    %178 = math.exp %177 : vector<8x8xf32>
    %cst_83 = arith.constant dense<0.000000e+00> : vector<8xf32>
    %179 = vector.multi_reduction <add>, %178, %cst_83 [1] : vector<8x8xf32> to vector<8xf32>
    %180 = vector.shape_cast %179 : vector<8xf32> to vector<8x1xf32>
    %181 = tpu.reciprocal %180 {approx = true} : vector<8x1xf32> -> vector<8x1xf32>
    %182 = vector.broadcast %181 : vector<8x1xf32> to vector<8x8xf32>
    %183 = arith.mulf %178, %182 : vector<8x8xf32>
    %184 = vector.extract_strided_slice %126 {offsets = [0, 16], sizes = [8, 8], strides = [1, 1]} : vector<8x32xf32> to vector<8x8xf32>
    %cst_84 = arith.constant dense<0.000000e+00> : vector<8x8xf32>
    %185 = tpu.matmul %183, %184, %cst_84 {dimension_numbers = #tpu.dot_dimension_numbers<[1], [0], [0], [1], [0, 0, 1, 1], [], []>} : vector<8x8xf32>, vector<8x8xf32>, vector<8x8xf32> -> vector<8x8xf32>
    %186 = vector.extract_strided_slice %124 {offsets = [0, 24], sizes = [8, 8], strides = [1, 1]} : vector<8x32xf32> to vector<8x8xf32>
    %187 = vector.extract_strided_slice %125 {offsets = [0, 24], sizes = [8, 8], strides = [1, 1]} : vector<8x32xf32> to vector<8x8xf32>
    %cst_85 = arith.constant dense<0.000000e+00> : vector<8x8xf32>
    %188 = tpu.matmul %186, %187, %cst_85 {dimension_numbers = #tpu.dot_dimension_numbers<[1], [1], [0], [0], [0, 0, 1, 0], [], []>} : vector<8x8xf32>, vector<8x8xf32>, vector<8x8xf32> -> vector<8x8xf32>
    %cst_86 = arith.constant -1.000000e+20 : f32
    %189 = vector.shape_cast %128 : vector<1x8xi1> to vector<1x8xi1>
    %190 = vector.broadcast %189 : vector<1x8xi1> to vector<8x8xi1>
    %191 = vector.broadcast %cst_86 : f32 to vector<8x8xf32>
    %192 = arith.select %190, %191, %188 : vector<8x8xi1>, vector<8x8xf32>
    %cst_87 = arith.constant dense<0xFF800000> : vector<8xf32>
    %193 = vector.multi_reduction <maximumf>, %192, %cst_87 [1] : vector<8x8xf32> to vector<8xf32>
    %194 = vector.shape_cast %193 : vector<8xf32> to vector<8x1xf32>
    %195 = vector.broadcast %194 : vector<8x1xf32> to vector<8x8xf32>
    %196 = arith.subf %192, %195 : vector<8x8xf32>
    %197 = math.exp %196 : vector<8x8xf32>
    %cst_88 = arith.constant dense<0.000000e+00> : vector<8xf32>
    %198 = vector.multi_reduction <add>, %197, %cst_88 [1] : vector<8x8xf32> to vector<8xf32>
    %199 = vector.shape_cast %198 : vector<8xf32> to vector<8x1xf32>
    %200 = tpu.reciprocal %199 {approx = true} : vector<8x1xf32> -> vector<8x1xf32>
    %201 = vector.broadcast %200 : vector<8x1xf32> to vector<8x8xf32>
    %202 = arith.mulf %197, %201 : vector<8x8xf32>
    %203 = vector.extract_strided_slice %126 {offsets = [0, 24], sizes = [8, 8], strides = [1, 1]} : vector<8x32xf32> to vector<8x8xf32>
    %cst_89 = arith.constant dense<0.000000e+00> : vector<8x8xf32>
    %204 = tpu.matmul %202, %203, %cst_89 {dimension_numbers = #tpu.dot_dimension_numbers<[1], [0], [0], [1], [0, 0, 1, 1], [], []>} : vector<8x8xf32>, vector<8x8xf32>, vector<8x8xf32> -> vector<8x8xf32>
    %205 = tpu.concatenate %147, %166, %185, %204 in 1 : vector<8x8xf32>, vector<8x8xf32>, vector<8x8xf32>, vector<8x8xf32> -> vector<8x32xf32>
    %cst_90 = arith.constant dense<0.000000e+00> : vector<8x32xf32>
    %206 = tpu.matmul %205, %120, %cst_90 {dimension_numbers = #tpu.dot_dimension_numbers<[1], [0], [0], [1], [0, 0, 1, 1], [], []>} : vector<8x32xf32>, vector<32x32xf32>, vector<8x32xf32> -> vector<8x32xf32>
    %207 = vector.broadcast %121 : vector<1x32xf32> to vector<8x32xf32>
    %208 = arith.addf %206, %207 : vector<8x32xf32>
    %c0_91 = arith.constant 0 : index
    %c0_92 = arith.constant 0 : index
    %209 = vector.load %arg17[%c0_91, %c0_92] : memref<1x32xf32, #tpu.memory_space<vmem>>, vector<1x32xf32>
    %c0_93 = arith.constant 0 : index
    %c0_94 = arith.constant 0 : index
    %210 = vector.load %arg18[%c0_93, %c0_94] : memref<1x32xf32, #tpu.memory_space<vmem>>, vector<1x32xf32>
    %211 = arith.addf %208, %114 : vector<8x32xf32>
    %cst_95 = arith.constant dense<0.000000e+00> : vector<8xf32>
    %212 = vector.multi_reduction <add>, %211, %cst_95 [1] : vector<8x32xf32> to vector<8xf32>
    %213 = vector.shape_cast %212 : vector<8xf32> to vector<8x1xf32>
    %cst_96 = arith.constant 3.200000e+01 : f32
    %214 = vector.broadcast %cst_96 : f32 to vector<8x1xf32>
    %215 = arith.divf %213, %214 : vector<8x1xf32>
    %216 = vector.broadcast %215 : vector<8x1xf32> to vector<8x32xf32>
    %217 = arith.subf %211, %216 : vector<8x32xf32>
    %218 = arith.mulf %217, %217 : vector<8x32xf32>
    %cst_97 = arith.constant dense<0.000000e+00> : vector<8xf32>
    %219 = vector.multi_reduction <add>, %218, %cst_97 [1] : vector<8x32xf32> to vector<8xf32>
    %220 = vector.shape_cast %219 : vector<8xf32> to vector<8x1xf32>
    %cst_98 = arith.constant 3.200000e+01 : f32
    %221 = vector.broadcast %cst_98 : f32 to vector<8x1xf32>
    %222 = arith.divf %220, %221 : vector<8x1xf32>
    %223 = vector.broadcast %215 : vector<8x1xf32> to vector<8x32xf32>
    %224 = arith.subf %211, %223 : vector<8x32xf32>
    %cst_99 = arith.constant 9.99999974E-6 : f32
    %225 = vector.broadcast %cst_99 : f32 to vector<8x1xf32>
    %226 = arith.addf %222, %225 : vector<8x1xf32>
    %227 = math.rsqrt %226 : vector<8x1xf32>
    %228 = vector.broadcast %227 : vector<8x1xf32> to vector<8x32xf32>
    %229 = arith.mulf %224, %228 : vector<8x32xf32>
    %230 = vector.broadcast %209 : vector<1x32xf32> to vector<8x32xf32>
    %231 = arith.mulf %229, %230 : vector<8x32xf32>
    %232 = vector.broadcast %210 : vector<1x32xf32> to vector<8x32xf32>
    %233 = arith.addf %231, %232 : vector<8x32xf32>
    %c0_100 = arith.constant 0 : index
    %c0_101 = arith.constant 0 : index
    %234 = vector.load %arg19[%c0_100, %c0_101] : memref<32x128xf32, #tpu.memory_space<vmem>>, vector<32x128xf32>
    %c0_102 = arith.constant 0 : index
    %c0_103 = arith.constant 0 : index
    %235 = vector.load %arg20[%c0_102, %c0_103] : memref<1x128xf32, #tpu.memory_space<vmem>>, vector<1x128xf32>
    %c0_104 = arith.constant 0 : index
    %c0_105 = arith.constant 0 : index
    %236 = vector.load %arg21[%c0_104, %c0_105] : memref<128x32xf32, #tpu.memory_space<vmem>>, vector<128x32xf32>
    %c0_106 = arith.constant 0 : index
    %c0_107 = arith.constant 0 : index
    %237 = vector.load %arg22[%c0_106, %c0_107] : memref<1x32xf32, #tpu.memory_space<vmem>>, vector<1x32xf32>
    %cst_108 = arith.constant dense<0.000000e+00> : vector<8x128xf32>
    %238 = tpu.matmul %233, %234, %cst_108 {dimension_numbers = #tpu.dot_dimension_numbers<[1], [0], [0], [1], [0, 0, 1, 1], [], []>} : vector<8x32xf32>, vector<32x128xf32>, vector<8x128xf32> -> vector<8x128xf32>
    %239 = vector.broadcast %235 : vector<1x128xf32> to vector<8x128xf32>
    %240 = arith.addf %238, %239 : vector<8x128xf32>
    %cst_109 = arith.constant 0.000000e+00 : f32
    %241 = vector.broadcast %cst_109 : f32 to vector<8x128xf32>
    %242 = arith.maximumf %240, %241 : vector<8x128xf32>
    %cst_110 = arith.constant dense<0.000000e+00> : vector<8x32xf32>
    %243 = tpu.matmul %242, %236, %cst_110 {dimension_numbers = #tpu.dot_dimension_numbers<[1], [0], [0], [1], [0, 0, 1, 1], [], []>} : vector<8x128xf32>, vector<128x32xf32>, vector<8x32xf32> -> vector<8x32xf32>
    %244 = vector.broadcast %237 : vector<1x32xf32> to vector<8x32xf32>
    %245 = arith.addf %243, %244 : vector<8x32xf32>
    %c0_111 = arith.constant 0 : index
    %c0_112 = arith.constant 0 : index
    %246 = vector.load %arg23[%c0_111, %c0_112] : memref<1x32xf32, #tpu.memory_space<vmem>>, vector<1x32xf32>
    %c0_113 = arith.constant 0 : index
    %c0_114 = arith.constant 0 : index
    %247 = vector.load %arg24[%c0_113, %c0_114] : memref<1x32xf32, #tpu.memory_space<vmem>>, vector<1x32xf32>
    %248 = arith.addf %245, %233 : vector<8x32xf32>
    %cst_115 = arith.constant dense<0.000000e+00> : vector<8xf32>
    %249 = vector.multi_reduction <add>, %248, %cst_115 [1] : vector<8x32xf32> to vector<8xf32>
    %250 = vector.shape_cast %249 : vector<8xf32> to vector<8x1xf32>
    %cst_116 = arith.constant 3.200000e+01 : f32
    %251 = vector.broadcast %cst_116 : f32 to vector<8x1xf32>
    %252 = arith.divf %250, %251 : vector<8x1xf32>
    %253 = vector.broadcast %252 : vector<8x1xf32> to vector<8x32xf32>
    %254 = arith.subf %248, %253 : vector<8x32xf32>
    %255 = arith.mulf %254, %254 : vector<8x32xf32>
    %cst_117 = arith.constant dense<0.000000e+00> : vector<8xf32>
    %256 = vector.multi_reduction <add>, %255, %cst_117 [1] : vector<8x32xf32> to vector<8xf32>
    %257 = vector.shape_cast %256 : vector<8xf32> to vector<8x1xf32>
    %cst_118 = arith.constant 3.200000e+01 : f32
    %258 = vector.broadcast %cst_118 : f32 to vector<8x1xf32>
    %259 = arith.divf %257, %258 : vector<8x1xf32>
    %260 = vector.broadcast %252 : vector<8x1xf32> to vector<8x32xf32>
    %261 = arith.subf %248, %260 : vector<8x32xf32>
    %cst_119 = arith.constant 9.99999974E-6 : f32
    %262 = vector.broadcast %cst_119 : f32 to vector<8x1xf32>
    %263 = arith.addf %259, %262 : vector<8x1xf32>
    %264 = math.rsqrt %263 : vector<8x1xf32>
    %265 = vector.broadcast %264 : vector<8x1xf32> to vector<8x32xf32>
    %266 = arith.mulf %261, %265 : vector<8x32xf32>
    %267 = vector.broadcast %246 : vector<1x32xf32> to vector<8x32xf32>
    %268 = arith.mulf %266, %267 : vector<8x32xf32>
    %269 = vector.broadcast %247 : vector<1x32xf32> to vector<8x32xf32>
    %270 = arith.addf %268, %269 : vector<8x32xf32>
    %c0_120 = arith.constant 0 : index
    %c0_121 = arith.constant 0 : index
    %c0_122 = arith.constant 0 : index
    %271 = vector.load %arg25[%c0_120, %c0_121, %c0_122] : memref<1x8x32xf32, #tpu.memory_space<vmem>>, vector<1x8x32xf32>
    %272 = vector.shape_cast %271 : vector<1x8x32xf32> to vector<8x32xf32>
    %273 = vector.shape_cast %270 : vector<8x32xf32> to vector<1x8x32xf32>
    tpu.vector_store %arg25[%c0_120, %c0_121, %c0_122], %273 {strides = array<i32>} : memref<1x8x32xf32, #tpu.memory_space<vmem>>, vector<1x8x32xf32>,
    return
  }
  func.func @transform_0(%arg0: i32) -> (i32, i32, i32) {
    %c0_i32 = arith.constant 0 : i32
    %c0_i32_0 = arith.constant 0 : i32
    %c0_i32_1 = arith.constant 0 : i32
    return %arg0, %c0_i32, %c0_i32_0 : i32, i32, i32
  }
  func.func @transform_1(%arg0: i32) -> (i32, i32, i32) {
    %c0_i32 = arith.constant 0 : i32
    %c0_i32_0 = arith.constant 0 : i32
    %c0_i32_1 = arith.constant 0 : i32
    return %arg0, %c0_i32, %c0_i32_0 : i32, i32, i32
  }
  func.func @transform_2(%arg0: i32) -> (i32, i32, i32) {
    %c0_i32 = arith.constant 0 : i32
    %c0_i32_0 = arith.constant 0 : i32
    %c0_i32_1 = arith.constant 0 : i32
    %c0_i32_2 = arith.constant 0 : i32
    return %c0_i32, %c0_i32_0, %c0_i32_1 : i32, i32, i32
  }
  func.func @transform_3(%arg0: i32) -> (i32, i32, i32) {
    %c0_i32 = arith.constant 0 : i32
    %c0_i32_0 = arith.constant 0 : i32
    %c0_i32_1 = arith.constant 0 : i32
    return %arg0, %c0_i32, %c0_i32_0 : i32, i32, i32
  }
  func.func @transform_4(%arg0: i32) -> (i32, i32) {
    %c0_i32 = arith.constant 0 : i32
    %c0_i32_0 = arith.constant 0 : i32
    %c0_i32_1 = arith.constant 0 : i32
    return %c0_i32, %c0_i32_0 : i32, i32
  }
  func.func @transform_5(%arg0: i32) -> (i32, i32) {
    %c0_i32 = arith.constant 0 : i32
    %c0_i32_0 = arith.constant 0 : i32
    %c0_i32_1 = arith.constant 0 : i32
    return %c0_i32, %c0_i32_0 : i32, i32
  }
  func.func @transform_6(%arg0: i32) -> (i32, i32) {
    %c0_i32 = arith.constant 0 : i32
    %c0_i32_0 = arith.constant 0 : i32
    %c0_i32_1 = arith.constant 0 : i32
    return %c0_i32, %c0_i32_0 : i32, i32
  }
  func.func @transform_7(%arg0: i32) -> (i32, i32) {
    %c0_i32 = arith.constant 0 : i32
    %c0_i32_0 = arith.constant 0 : i32
    %c0_i32_1 = arith.constant 0 : i32
    return %c0_i32, %c0_i32_0 : i32, i32
  }
  func.func @transform_8(%arg0: i32) -> (i32, i32) {
    %c0_i32 = arith.constant 0 : i32
    %c0_i32_0 = arith.constant 0 : i32
    %c0_i32_1 = arith.constant 0 : i32
    return %c0_i32, %c0_i32_0 : i32, i32
  }
  func.func @transform_9(%arg0: i32) -> (i32, i32) {
    %c0_i32 = arith.constant 0 : i32
    %c0_i32_0 = arith.constant 0 : i32
    %c0_i32_1 = arith.constant 0 : i32
    return %c0_i32, %c0_i32_0 : i32, i32
  }
  func.func @transform_10(%arg0: i32) -> (i32, i32) {
    %c0_i32 = arith.constant 0 : i32
    %c0_i32_0 = arith.constant 0 : i32
    %c0_i32_1 = arith.constant 0 : i32
    return %c0_i32, %c0_i32_0 : i32, i32
  }
  func.func @transform_11(%arg0: i32) -> (i32, i32) {
    %c0_i32 = arith.constant 0 : i32
    %c0_i32_0 = arith.constant 0 : i32
    %c0_i32_1 = arith.constant 0 : i32
    return %c0_i32, %c0_i32_0 : i32, i32
  }
  func.func @transform_12(%arg0: i32) -> (i32, i32) {
    %c0_i32 = arith.constant 0 : i32
    %c0_i32_0 = arith.constant 0 : i32
    %c0_i32_1 = arith.constant 0 : i32
    return %c0_i32, %c0_i32_0 : i32, i32
  }
  func.func @transform_13(%arg0: i32) -> (i32, i32) {
    %c0_i32 = arith.constant 0 : i32
    %c0_i32_0 = arith.constant 0 : i32
    %c0_i32_1 = arith.constant 0 : i32
    return %c0_i32, %c0_i32_0 : i32, i32
  }
  func.func @transform_14(%arg0: i32) -> (i32, i32) {
    %c0_i32 = arith.constant 0 : i32
    %c0_i32_0 = arith.constant 0 : i32
    %c0_i32_1 = arith.constant 0 : i32
    return %c0_i32, %c0_i32_0 : i32, i32
  }
  func.func @transform_15(%arg0: i32) -> (i32, i32) {
    %c0_i32 = arith.constant 0 : i32
    %c0_i32_0 = arith.constant 0 : i32
    %c0_i32_1 = arith.constant 0 : i32
    return %c0_i32, %c0_i32_0 : i32, i32
  }
  func.func @transform_16(%arg0: i32) -> (i32, i32) {
    %c0_i32 = arith.constant 0 : i32
    %c0_i32_0 = arith.constant 0 : i32
    %c0_i32_1 = arith.constant 0 : i32
    return %c0_i32, %c0_i32_0 : i32, i32
  }
  func.func @transform_17(%arg0: i32) -> (i32, i32) {
    %c0_i32 = arith.constant 0 : i32
    %c0_i32_0 = arith.constant 0 : i32
    %c0_i32_1 = arith.constant 0 : i32
    return %c0_i32, %c0_i32_0 : i32, i32
  }
  func.func @transform_18(%arg0: i32) -> (i32, i32) {
    %c0_i32 = arith.constant 0 : i32
    %c0_i32_0 = arith.constant 0 : i32
    %c0_i32_1 = arith.constant 0 : i32
    return %c0_i32, %c0_i32_0 : i32, i32
  }
  func.func @transform_19(%arg0: i32) -> (i32, i32) {
    %c0_i32 = arith.constant 0 : i32
    %c0_i32_0 = arith.constant 0 : i32
    %c0_i32_1 = arith.constant 0 : i32
    return %c0_i32, %c0_i32_0 : i32, i32
  }
  func.func @transform_20(%arg0: i32) -> (i32, i32) {
    %c0_i32 = arith.constant 0 : i32
    %c0_i32_0 = arith.constant 0 : i32
    %c0_i32_1 = arith.constant 0 : i32
    return %c0_i32, %c0_i32_0 : i32, i32
  }
  func.func @transform_21(%arg0: i32) -> (i32, i32) {
    %c0_i32 = arith.constant 0 : i32
    %c0_i32_0 = arith.constant 0 : i32
    %c0_i32_1 = arith.constant 0 : i32
    return %c0_i32, %c0_i32_0 : i32, i32
  }
  func.func @transform_22(%arg0: i32) -> (i32, i32) {
    %c0_i32 = arith.constant 0 : i32
    %c0_i32_0 = arith.constant 0 : i32
    %c0_i32_1 = arith.constant 0 : i32
    return %c0_i32, %c0_i32_0 : i32, i32
  }
  func.func @transform_23(%arg0: i32) -> (i32, i32) {
    %c0_i32 = arith.constant 0 : i32
    %c0_i32_0 = arith.constant 0 : i32
    %c0_i32_1 = arith.constant 0 : i32
    return %c0_i32, %c0_i32_0 : i32, i32
  }
  func.func @transform_24(%arg0: i32) -> (i32, i32, i32) {
    %c0_i32 = arith.constant 0 : i32
    %c0_i32_0 = arith.constant 0 : i32
    %c0_i32_1 = arith.constant 0 : i32
    return %arg0, %c0_i32, %c0_i32_0 : i32, i32, i32
  }
}

</mosaic_0001>

<bundles_post_ra>
// kernel: transformer_fwd.7
= control target key start
LH: loop header
LB: loop body
LE: loop exit
PB: predicated region body
PF: predicated region fallthrough
CT: control target
= control target key end

     0   :  { %8 = vsyncpa [#allocation3], 0  ;;  %s606_s0 = inlined_call_operand.vmem [shape: f32[2,8,32], index: 0, kind: input, shape index: {}]   ;;  %s607_s1 = inlined_call_operand.vmem [shape: f32[32,20], index: 1, kind: input, shape index: {}]   ;;  %s608_s2 = inlined_call_operand.vmem [shape: f32[1,20], index: 2, kind: input, shape index: {}]   ;;  %s609_s3 = inlined_call_operand.hbm [shape: f32[2,8,20], index: 3, kind: output, shape index: {}]  }
   0x1   :  { %10 = vsyncpa [#allocation3 + $0x1], 0  ;;  %s491_s12 = smov 0   ;;  %s493_s13 = smov 0  }
   0x2   :  { %s495_s14 = smov 0   ;;  %s497_s15 = smov 0  }
   0x3 LB: > { %s512_s16 = sadd.s32 4294967295, %s465_s15   ;;  %s327_s17 = sadd.s32 4294967294, %s465_s15   ;;  %s465_s15 = sphi %s497_s15, %s615_s15   ;;  %s461_s14 = sphi %s495_s14, %s614_s14   ;;  %s457_s13 = sphi %s493_s13, %s613_s13   ;;  %s453_s12 = sphi %s491_s12, %s612_s12  }
   0x4   : > { %s516_s18 = sadd.s32 1, %s465_s15   ;;  %s91_s19 = sadd.s32 1, %s461_s14 }
   0x5   : > { %s88_s20 = ssub.s32 %s465_s15, %s516_s18  ;;  %p101_p0 = scmp.ne.s32.totalorder %s461_s14, %s457_s13 }
   0x6   : > { %p89_p1 = scmp.eq.s32.totalorder %s88_s20, 0  ;;  %p102_p2 = scmp.eq.s32.totalorder %s512_s16, 1 }
   0x7   : > { %p107_p3 = scmp.ne.s32.totalorder %s457_s13, %s453_s12  ;;  %p108_p4 = scmp.eq.s32.totalorder %s327_s17, 1 }
   0x8   : > { %s527_s21 = scalar_select %p89_p1, %s461_s14, %s91_s19  }
   0x9   : > { %p529_p5 = por %p102_p2, %p101_p0  ;;  %p533_p6 = por %p108_p4, %p107_p3 }
   0xa   : > { %p330_p7 = scmp.ge.s32.totalorder %s465_s15, 1  ;;  %p139_p8 = scmp.lt.s32.totalorder %s465_s15, 3 }
   0xc   : > { %p140_p9 = pnand %p330_p7, %p139_p8 }
   0xd   : > { %v167_v0 = vld [vmem:[%s607_s1] sm:$0xff] (!%p140_p9)  ;;  %v168_v1 = vld [vmem:[%s607_s1 + $0x8] sm:$0xff] (!%p140_p9)  ;;  %v169_v2 = vld [vmem:[%s607_s1 + $0x10] sm:$0xff] (!%p140_p9)  ;;  %v467_v3 = vmov (!%p140_p9), 0.0|0.0   ;;  %vm468_vm0 = vmmov (!%p140_p9), 0   ;;  %v469_v6 = vmov (!%p140_p9), 0.0  }
   0xe   : > { %143 = sbr.rel (%p140_p9) target bundleno = 254 (0xfe), region = 32  ;;  %355 = vmatprep.subr.bf16.mxu0 (!%p140_p9), %v467_v3  ;;  %v356_v4 = vpack.c.bf16 (!%p140_p9), %v168_v1, %v167_v0  ;;  %v170_v5 = vld [vmem:[%s607_s1 + $0x18] sm:$0xff] (!%p140_p9)  ;;  %352 = vmatprep.mubr.msk.f32.mxu0 (!%p140_p9), %vm468_vm0, %v469_v6  ;;  %p162_p10 = scmp.lt.s32.totalorder (!%p140_p9), %s512_s16, 1  ;;  %vm178_vm1 = vcmask (!%p140_p9), 261120   ;;  %v333_v9 = vld [vmem:[%s608_s2] ss:$0 sm:$0xff] (!%p140_p9) }
   0xf   : > { %v359_v7 = vpack.c.bf16 (!%p140_p9), %v170_v5, %v169_v2  ;;  %s159_s10 = sand.u32 (!%p140_p9), 1, %s457_s13   ;;  %s336_s20 = sshll.u32 (!%p140_p9), %s512_s16, 7  ;;  %vm252_vm2 = vcmask (!%p140_p9), 162816  }
  0x10   : > { %357 = vmatpush3.bf16.msra.mxu0 (!%p140_p9), %v356_v4  ;;  %s331_s11 = sshll.u32 (!%p140_p9), %s159_s10, 3  ;;  %s564_s28 = scalar_lea.hbm (!%p140_p9), %s609_s3, %s336_s20 }
  0x11   : > { %358 = vmatprep.subr.bf16.mxu0 (!%p140_p9), %v467_v3  ;;  %s161_s24 = scalar_lea.vmem (!%p140_p9), [#allocation2], %s331_s11  ;;  %s255_s29 = scalar_lea.sflag (!%p140_p9), [#allocation3], %s159_s10 }
  0x12   : > { %s268_s25 = sshll.u32 (!%p140_p9), %s161_s24, 4  ;;  %s566_s25 = int_to_ptr.vmem [resolvable:$true] %s268_s25 }
  0x13   : > { %s403_s30 = scalar_lea.vmem (!%p140_p9), %s566_s25, 128 }
  0x14   : > { %360 = vmatpush3.bf16.msra.mxu0 (!%p140_p9), %v359_v7  ;;  %p404_p11 = scmp.ne.s32.totalorder (!%p140_p9), %s566_s25, %s403_s30 }
  0x15   : > { %s163_s5 = scalar_select %p162_p10, %s512_s16, 1 }
  0x16   : > { %p405_p12 = pnand %p404_p11, %p529_p5  ;;  %s470_s16 = smov [#allocation2]  }
  0x17   : > { %s332_s6 = sshll.u32 %s163_s5, 3  ;;  %s407_s4 = sshll.u32 %s470_s16, 4  ;;  %s408_s4 = int_to_ptr.vmem [resolvable:$false] %s407_s4 }
  0x18   : > { %s165_s9 = scalar_lea.vmem %s606_s0, %s332_s6  ;;  %p406_p13 = pneg %p405_p12 }
  0x19   : > { %v166_v8 = vld [vmem:[%s165_s9] sm:$0xff]  ;;  %s409_s5 = scalar_lea.vmem %s408_s4, 256  ;;  %p410_p0 = scmp.lt.s32.totalorder %s566_s25, %s408_s4 }
  0x1a   : > { %353 = vmatmul.mubr.msk.f32.vlgmr.msra.gmra.mrb[0].mxu0 %vm178_vm1, %v166_v8  ;;  %p411_p1 = scmp.lt.s32.totalorder %s409_s5, %s403_s30 }
  0x1c   : > { %p412_p2 = por %p411_p1, %p410_p0 }
  0x1e   : > { %p413_p3 = pnand %p412_p2, %p406_p13 }
  0xed   : > { %v248_v10 = vpop.f32.mrb[0].mxu0 }
  0xee   : > { %v249_v11 = vadd.f32 %v333_v9, %v248_v10  ;;  %v354_v12 = vpop.f32.mrb[1].mxu0 }
  0xf0   : > { %253 = vst.msk [vmem:[%s161_s24] sm:$0xff] %vm252_vm2, %v249_v11 }
  0xf1   : > { %416 = shalt.err (!%p413_p3)
}
  0xf2   : > { %s417_s6 = scalar_lea.hbm %s564_s28, 128  ;;  %s421_s9 = scalar_lea.hbm %s609_s3, 256 }
  0xf3   : > { %p418_p4 = scmp.ne.s32.totalorder %s564_s28, %s417_s6  ;;  %p422_p9 = scmp.lt.u32.totalorder %s564_s28, %s609_s3 }
  0xf4   : > { %p423_p10 = scmp.lt.u32.totalorder %s421_s9, %s417_s6  ;;  %p425_p12 = scmp.lt.u32.totalorder %s417_s6, %s564_s28 }
  0xf5   : > { %p419_p7 = pnand %p418_p4, %p529_p5 }
  0xf6   : > { %p424_p11 = por %p423_p10, %p422_p9 }
  0xf7   : > { %p420_p8 = pneg %p419_p7 }
  0xf8   : > { %p426_p13 = por %p425_p12, %p424_p11 }
  0xfa   : > { %p427_p0 = pnand %p426_p13, %p420_p8 }
  0xfc   : > { %430 = shalt.err (!%p427_p0)
}
  0xfd   : > { %361 = dma.vmem_to_hbm [thread:$0]  (%p529_p5), %s566_s25, 128, %s564_s28, %s255_s29  }
  0xfe PF: > { %p367_p1 = scmp.ge.s32.totalorder %s465_s15, 2  ;;  %s280_s17 = sand.u32 1, %s453_s12  }
  0xff   : > { %s281_s19 = scalar_lea.sflag [#allocation3], %s280_s17 }
 0x100   : > { %p364_p2 = pnand %p367_p1, %p533_p6 }
 0x102   : > { %448 = dma.done.wait (!%p364_p2), %s281_s19, 128  }
 0x103   : > { %450 = vsyncadd (!%p364_p2), %s281_s19, 4294967168  ;;  %p13_p3 = scmp.ge.s32.totalorder %s516_s18, 4   ;;  %s612_s12 = smov %s457_s13 }
 0x104   : > { %s613_s13 = smov %s461_s14  ;;  %s614_s14 = smov %s527_s21 }
 0x105   : > { %s615_s15 = smov %s516_s18  ;;  %15 = sbr.rel (!%p13_p3) target bundleno = 3 (0x3), region = 67 }
 0x10c   :  { %286 = vsyncpa [#allocation3], 1 }
 0x10d   :  { %288 = vsyncpa [#allocation3 + $0x1], 1 }

// kernel: transformer_fwd.4
= control target key start
LH: loop header
LB: loop body
LE: loop exit
PB: predicated region body
PF: predicated region fallthrough
CT: control target
= control target key end

     0   :  { %s2215_s18 = smov 0   ;;  %s2482_s0 = inlined_call_operand.vmem [shape: f32[2,8,32], index: 0, kind: input, shape index: {}]   ;;  %s2483_s1 = inlined_call_operand.vmem [shape: f32[2,1,8], index: 1, kind: input, shape index: {}]   ;;  %s2484_s2 = inlined_call_operand.vmem [shape: f32[32,32], index: 2, kind: input, shape index: {}]   ;;  %s2485_s3 = inlined_call_operand.vmem [shape: f32[32,32], index: 3, kind: input, shape index: {}]   ;;  %s2486_s4 = inlined_call_operand.vmem [shape: f32[32,32], index: 4, kind: input, shape index: {}]   ;;  %s2487_s5 = inlined_call_operand.vmem [shape: f32[32,32], index: 5, kind: input, shape index: {}]   ;;  %s2488_s6 = inlined_call_operand.vmem [shape: f32[1,32], index: 6, kind: input, shape index: {}]   ;;  %s2489_s7 = inlined_call_operand.vmem [shape: f32[1,32], index: 7, kind: input, shape index: {}]   ;;  %s2490_s8 = inlined_call_operand.vmem [shape: f32[1,32], index: 8, kind: input, shape index: {}]   ;;  %s2491_s9 = inlined_call_operand.vmem [shape: f32[32,128], index: 9, kind: input, shape index: {}]   ;;  %s2492_s10 = inlined_call_operand.vmem [shape: f32[1,128], index: 10, kind: input, shape index: {}]   ;;  %s2493_s11 = inlined_call_operand.vmem [shape: f32[128,32], index: 11, kind: input, shape index: {}]   ;;  %s2494_s12 = inlined_call_operand.vmem [shape: f32[1,32], index: 12, kind: input, shape index: {}]   ;;  %s2495_s13 = inlined_call_operand.vmem [shape: f32[1,32], index: 13, kind: input, shape index: {}]   ;;  %s2496_s14 = inlined_call_operand.vmem [shape: f32[1,32], index: 14, kind: input, shape index: {}]   ;;  %s2497_s15 = inlined_call_operand.vmem [shape: f32[2,8,32], index: 15, kind: output, shape index: {}]  }
   0x1 LB: > { %s1804_s19 = sadd.s32 4294967295, %s2123_s18   ;;  %p1808_p0 = scmp.ge.s32.totalorder %s2123_s18, 1  ;;  %s2123_s18 = sphi %s2215_s18, %s25_s18  }
   0x2   : > { %p444_p1 = scmp.lt.s32.totalorder %s2123_s18, 3 }
   0x4   : > { %p445_p2 = pnand %p1808_p0, %p444_p1 }
   0x5   : > { %v506_v0 = vld [vmem:[%s2484_s2] sm:$0xff] (!%p445_p2)  ;;  %v507_v1 = vld [vmem:[%s2484_s2 + $0x8] sm:$0xff] (!%p445_p2)  ;;  %v508_v2 = vld [vmem:[%s2484_s2 + $0x10] sm:$0xff] (!%p445_p2)  ;;  %v2125_v3 = vmov (!%p445_p2), 0.0|0.0   ;;  %vm2126_vm0 = vmmov (!%p445_p2), 0   ;;  %v2127_v6 = vmov (!%p445_p2), 0.0   ;;  %v817_v34 = vlaneseq (!%p445_p2) }
   0x6   : > { %448 = sbr.rel (%p445_p2) target bundleno = 2495 (0x9bf), region = 80  ;;  %2025 = vmatprep.subr.bf16.mxu1 (!%p445_p2), %v2125_v3  ;;  %v2026_v4 = vpack.c.bf16 (!%p445_p2), %v507_v1, %v506_v0  ;;  %v509_v5 = vld [vmem:[%s2484_s2 + $0x18] sm:$0xff] (!%p445_p2)  ;;  %1903 = vmatprep.mubr.msk.f32.mxu1 (!%p445_p2), %vm2126_vm0, %v2127_v6  ;;  %p493_p3 = scmp.lt.s32.totalorder (!%p445_p2), %s1804_s19, 1  ;;  %v510_v8 = vld [vmem:[%s2485_s3] sm:$0xff] (!%p445_p2)  ;;  %v511_v9 = vld [vmem:[%s2485_s3 + $0x8] sm:$0xff] (!%p445_p2)  ;;  %vm523_vm1 = vcmask (!%p445_p2), 261120  }
   0x7   : > { %1938 = vmatprep.subr.mxu0 (!%p445_p2), %v2127_v6  ;;  %1940 = vmatprep.mubr.msk.f32.mxu0 (!%p445_p2), %vm2126_vm0, %v2127_v6  ;;  %v2029_v7 = vpack.c.bf16 (!%p445_p2), %v509_v5, %v508_v2  ;;  %v2032_v11 = vpack.c.bf16 (!%p445_p2), %v511_v9, %v510_v8  ;;  %v512_v12 = vld [vmem:[%s2485_s3 + $0x10] sm:$0xff] (!%p445_p2)  ;;  %v513_v13 = vld [vmem:[%s2485_s3 + $0x18] sm:$0xff] (!%p445_p2)  ;;  %v514_v15 = vld [vmem:[%s2486_s4] sm:$0xff] (!%p445_p2)  ;;  %vm739_vm2 = vcmask (!%p445_p2), 64512   ;;  %s2128_s23 = smov (!%p445_p2), 112   ;;  %s2129_s24 = smov (!%p445_p2), 120  }
   0x8   : > { %2027 = vmatpush3.bf16.msra.mxu1 (!%p445_p2), %v2026_v4  ;;  %v2035_v14 = vpack.c.bf16 (!%p445_p2), %v513_v13, %v512_v12  ;;  %v515_v16 = vld [vmem:[%s2486_s4 + $0x8] sm:$0xff] (!%p445_p2)  ;;  %v516_v18 = vld [vmem:[%s2486_s4 + $0x10] sm:$0xff] (!%p445_p2)  ;;  %v517_v19 = vld [vmem:[%s2486_s4 + $0x18] sm:$0xff] (!%p445_p2)  ;;  %s2130_s25 = smov (!%p445_p2), 104   ;;  %v818_v36 = vshrl.u32 (!%p445_p2), %v817_v34, 7  ;;  %v2131_v38 = vmov (!%p445_p2), 0  }
   0x9   : > { %2028 = vmatprep.subr.bf16.mxu1 (!%p445_p2), %v2125_v3  ;;  %v2038_v17 = vpack.c.bf16 (!%p445_p2), %v515_v16, %v514_v15  ;;  %v2041_v20 = vpack.c.bf16 (!%p445_p2), %v517_v19, %v516_v18  ;;  %v519_v34 = vld [vmem:[%s2487_s5 + $0x8] sm:$0xff] (!%p445_p2)  ;;  %s2133_s26 = smov (!%p445_p2), 16   ;;  %s2134_s27 = smov (!%p445_p2), 24   ;;  %vm1419_vm5 = vcmask (!%p445_p2), 130048   ;;  %vm1421_vm6 = vcmask (!%p445_p2), 195584  }
   0xa   : > { %v819_v37 = vsub.s32 (!%p445_p2), 0, %v818_v36  ;;  %v520_v36 = vld [vmem:[%s2487_s5 + $0x10] sm:$0xff] (!%p445_p2) }
   0xc   : > { %2030 = vmatpush3.bf16.msra.mxu1 (!%p445_p2), %v2029_v7 }
   0xd   : > { %s2499_s19 = smov (!%p493_p3, %s1804_s19), 1  ;;  %2031 = vmatprep.subr.bf16.mxu1 %v2125_v3 }
   0xe   : > { %s1809_s17 = sshll.u32 %s2499_s19, 3  ;;  %s499_s28 = scalar_lea.vmem %s2483_s1, %s2499_s19 }
   0xf   : > { %s496_s22 = scalar_lea.vmem %s2482_s0, %s1809_s17  ;;  %v505_v35 = vld [vmem:[%s499_s28] sm:$0x1] }
  0x10   : > { %v2256_v10 = vld [vmem:[%s496_s22] sm:$0xff]  ;;  %vm738_vm3 = vcmp.eq.f32.partialorder %v505_v35, 0.0 }
  0x11   : > { %1904 = vmatmul.mubr.msk.f32.vlgmr.msra.gmra.mrb[0].mxu1 %vm523_vm1, %v2256_v10  ;;  %v816_v39 = vsel %vm738_vm3, 1, %v2131_v38 }
  0x12   : > { %2033 = vmatpush3.bf16.msra.mxu1 %v2032_v11  ;;  %1914 = vmatprep.mubr.msk.f32.mxu1 %vm2126_vm0, %v2127_v6  ;;  %v820_v40 = vrot.slane %v816_v39, %v819_v37  ;;  %v521_v37 = vld [vmem:[%s2487_s5 + $0x18] sm:$0xff] }
  0x13   : > { %2034 = vmatprep.subr.bf16.mxu1 %v2125_v3  ;;  %v2047_v38 = vpack.c.bf16 %v521_v37, %v520_v36  ;;  %v1830_v37 = vld [vmem:[%s2492_s10] ss:$0 sm:$0xff] }
  0x14   : > { %vm821_vm4 = vcmp.eq.s32.totalorder %v820_v40, 1 }
  0x16   : > { %2036 = vmatpush3.bf16.msra.mxu1 %v2035_v14 }
  0x17   : > { %2037 = vmatprep.subr.bf16.mxu1 %v2125_v3 }
  0x19   : > { %1915 = vmatmul.mubr.msk.f32.vlgmr.msra.gmra.mrb[2].mxu1 %vm523_vm1, %v2256_v10 }
  0x1a   : > { %2039 = vmatpush3.bf16.msra.mxu1 %v2038_v17  ;;  %1925 = vmatprep.mubr.msk.f32.mxu1 %vm2126_vm0, %v2127_v6 }
  0x1b   : > { %2040 = vmatprep.subr.bf16.mxu1 %v2125_v3 }
  0x1e   : > { %2042 = vmatpush3.bf16.msra.mxu1 %v2041_v20 }
  0x1f   : > { %1928 = vmatprep.subr.mxu1 %v2127_v6 }
  0x21   : > { %1926 = vmatmul.mubr.msk.f32.vlgmr.msra.gmra.mrb[4].mxu1 %vm523_vm1, %v2256_v10 }
  0x22   : > { %1930 = vmatprep.mubr.msk.f32.mxu1 %vm2126_vm0, %v2127_v6 }
  0xe4   : > { %v593_v21 = vpop.f32.mrb[0].mxu1 }
  0xe5   : > { %v1905_v22 = vpop.f32.mrb[1].mxu1  ;;  %v597_v25 = vmul.f32 0.17677669, %v593_v21 }
  0xec   : > { %v664_v23 = vpop.f32.mrb[2].mxu1 }
  0xed   : > { %1076 = vrot.lane.b32.xlu1 %v664_v23, %s2128_s23  ;;  %909 = vrot.lane.b32.xlu0 %v664_v23, %s2129_s24  ;;  %v1916_v24 = vpop.f32.mrb[3].mxu1 }
  0xee   : > { %1929 = vmatpush3.xpose.msk.msra.mxu1 %vm739_vm2, %v664_v23 }
  0xef   : > { %1933 = vmatprep.subr.mxu1 %v2127_v6 }
  0xf1   : > { %1931 = vmatmul.mubr.msk.f32.vlgmr.msra.gmra.mrb[6].mxu1 %vm739_vm2, %v597_v25  ;;  %1074 = vrot.lane.b32.xlu1 %v597_v25, %s2128_s23 }
  0xf2   : > { %907 = vrot.lane.b32.xlu0 %v597_v25, %s2129_s24  ;;  %1935 = vmatprep.mubr.msk.f32.mxu1 %vm2126_vm0, %v2127_v6 }
  0xf4   : > { %v2304_v26 = vpop.f32.mrb[4].mxu1 }
  0xf5   : > { %1240 = vrot.lane.b32.xlu1 %v597_v25, %s2130_s25  ;;  %v1927_v27 = vpop.f32.mrb[5].mxu1  ;;  %1934 = vmatpush3.msra.mxu1 %v2304_v26 }
  0xf6   : > { %1242 = vrot.lane.b32.xlu0 %v664_v23, %s2130_s25  ;;  %1943 = vmatprep.subr.mxu1 %v2127_v6 }
 0x15f   : > { %v910_v28 = vpop.permute.xlu0 %909  ;;  %v1077_v29 = vpop.permute.xlu1 %1076 }
 0x160   : > { %1939 = vmatpush3.xpose.msk.msra.mxu0 %vm739_vm2, %v910_v28 }
 0x161   : > { %1948 = vmatprep.subr.mxu0 %v2127_v6 }
 0x163   : > { %v1075_v31 = vpop.permute.xlu1 %1074 }
 0x164   : > { %v908_v30 = vpop.permute.xlu0 %907 }
 0x165   : > { %1941 = vmatmul.mubr.msk.f32.vlgmr.msra.gmra.mrb[0].mxu0 %vm739_vm2, %v908_v30 }
 0x166   : > { %1949 = vmatpush3.xpose.msk.msra.mxu0 %vm739_vm2, %v1077_v29  ;;  %1950 = vmatprep.mubr.msk.f32.mxu0 %vm2126_vm0, %v2127_v6 }
 0x167   : > { %1958 = vmatprep.subr.mxu0 %v2127_v6  ;;  %v1241_v33 = vpop.permute.xlu1 %1240 }
 0x168   : > { %v1243_v32 = vpop.permute.xlu0 %1242 }
 0x169   : > { %1951 = vmatmul.mubr.msk.f32.vlgmr.msra.gmra.mrb[2].mxu0 %vm739_vm2, %v1075_v31 }
 0x16a   : > { %1959 = vmatpush3.xpose.msk.msra.mxu0 %vm739_vm2, %v1243_v32  ;;  %1960 = vmatprep.mubr.msk.f32.mxu0 %vm2126_vm0, %v2127_v6 }
 0x16b   : > { %2043 = vmatprep.subr.bf16.mxu0 %v2125_v3 }
 0x16d   : > { %1961 = vmatmul.mubr.msk.f32.vlgmr.msra.gmra.mrb[4].mxu0 %vm739_vm2, %v1241_v33  ;;  %v518_v33 = vld [vmem:[%s2487_s5] sm:$0xff] }
 0x16e   : > { %1976 = vmatprep.mubr.msk.f32.mxu0 %vm2126_vm0, %v2127_v6  ;;  %v2044_v35 = vpack.c.bf16 %v519_v34, %v518_v33 }
 0x170   : > { %2045 = vmatpush3.bf16.msra.mxu0 %v2044_v35  ;;  %v1553_v35 = vld [vmem:[%s2493_s11 + $0x78] sm:$0xff] }
 0x171   : > { %2046 = vmatprep.subr.bf16.mxu0 %v2125_v3 }
 0x174   : > { %2048 = vmatpush3.bf16.msra.mxu0 %v2047_v38 }
 0x175   : > { %2055 = vmatprep.subr.bf16.mxu0 %v2125_v3 }
 0x1c4   : > { %v812_v41 = vpop.f32.mrb[6].mxu1 }
 0x1c5   : > { %v822_v42 = vsel %vm821_vm4, -1e+20, %v812_v41  ;;  %v1932_v43 = vpop.f32.mrb[7].mxu1 }
 0x1c6   : > { %v823_v44 = vsel %vm739_vm2, %v822_v42, -inf }
 0x1c7   : > { %824 = vmax.xlane.f32.xlu0 %v823_v44 }
 0x238   : > { %v981_v45 = vpop.f32.mrb[0].mxu0 }
 0x239   : > { %v985_v46 = vsel %vm821_vm4, -1e+20, %v981_v45  ;;  %v1942_v47 = vpop.f32.mrb[1].mxu0 }
 0x23a   : > { %v986_v48 = vsel %vm739_vm2, %v985_v46, -inf }
 0x23b   : > { %987 = vmax.xlane.f32.xlu1 %v986_v48 }
 0x23c   : > { %v1148_v49 = vpop.f32.mrb[2].mxu0 }
 0x23d   : > { %v1152_v50 = vsel %vm821_vm4, -1e+20, %v1148_v49  ;;  %v1952_v51 = vpop.f32.mrb[3].mxu0 }
 0x23e   : > { %v1153_v52 = vsel %vm739_vm2, %v1152_v50, -inf  ;;  %v1826_v51 = vld [vmem:[%s2488_s6] ss:$0 sm:$0xff] }
 0x23f   : > { %1154 = vmax.xlane.f32.xlu0 %v1153_v52 }
 0x240   : > { %v1314_v53 = vpop.f32.mrb[4].mxu0 }
 0x241   : > { %v1318_v54 = vsel %vm821_vm4, -1e+20, %v1314_v53  ;;  %v1962_v55 = vpop.f32.mrb[5].mxu0 }
 0x242   : > { %v1319_v56 = vsel %vm739_vm2, %v1318_v54, -inf }
 0x243   : > { %1320 = vmax.xlane.f32.xlu0 %v1319_v56 }
 0x24c   : > { %998 = vrot.lane.b32.xlu1 %v2304_v26, %s2129_s24  ;;  %s503_s24 = scalar_lea.vmem %s2497_s15, %s1809_s17 }
 0x254   : > { %v825_v57 = vpop.xlane.xlu0 %824 }
 0x255   : > { %v826_v58 = vsub.f32 %v822_v42, %v825_v57 }
 0x257   : > { %v827_v59 = vmul.f32 1.442695, %v826_v58 }
 0x259   : > { %2097 = vpow2.f32 %v827_v59 }
 0x263   : > { %v2098_v60 = vpop.eup %2097 }
 0x264   : > { %v829_v61 = vsel %vm739_vm2, %v2098_v60, 0.0 }
 0x270   : > { %830 = vadd.xlane.f32.xlu1 %v829_v61 }
 0x2c8   : > { %v988_v62 = vpop.xlane.xlu1 %987 }
 0x2c9   : > { %v989_v63 = vsub.f32 %v985_v46, %v988_v62  ;;  %v1534_v62 = vld [vmem:[%s2491_s9 + $0x8] sm:$0xff] }
 0x2cb   : > { %v990_v0 = vmul.f32 1.442695, %v989_v63 }
 0x2cc   : > { %v1155_v1 = vpop.xlane.xlu0 %1154  ;;  %v999_v16 = vpop.permute.xlu1 %998 }
 0x2cd   : > { %2099 = vpow2.f32 %v990_v0  ;;  %v1156_v2 = vsub.f32 %v1152_v50, %v1155_v1  ;;  %v1536_v0 = vld [vmem:[%s2491_s9 + $0x18] sm:$0xff] }
 0x2cf   : > { %v1157_v4 = vmul.f32 1.442695, %v1156_v2  ;;  %v1538_v2 = vld [vmem:[%s2493_s11] sm:$0xff] }
 0x2d0   : > { %v1321_v5 = vpop.xlane.xlu0 %1320 }
 0x2d1   : > { %2101 = vpow2.f32 %v1157_v4  ;;  %v1322_v7 = vsub.f32 %v1318_v54, %v1321_v5  ;;  %v1539_v4 = vld [vmem:[%s2493_s11 + $0x8] sm:$0xff]  ;;  %v1540_v5 = vld [vmem:[%s2493_s11 + $0x10] sm:$0xff] }
 0x2d3   : > { %v1323_v8 = vmul.f32 1.442695, %v1322_v7  ;;  %v2056_v7 = vpack.c.bf16 %v1539_v4, %v1538_v2 }
 0x2d5   : > { %2103 = vpow2.f32 %v1323_v8  ;;  %v1541_v8 = vld [vmem:[%s2493_s11 + $0x18] sm:$0xff] }
 0x2d7   : > { %v2100_v9 = vpop.eup %2099 }
 0x2d8   : > { %v992_v11 = vsel %vm739_vm2, %v2100_v9, 0.0 }
 0x2d9   : > { %993 = vadd.xlane.f32.xlu0 %v992_v11  ;;  %v1542_v11 = vld [vmem:[%s2493_s11 + $0x20] sm:$0xff] }
 0x2db   : > { %v2102_v12 = vpop.eup %2101 }
 0x2dc   : > { %v1159_v13 = vsel %vm739_vm2, %v2102_v12, 0.0 }
 0x2dd   : > { %1160 = vadd.xlane.f32.xlu1 %v1159_v13 }
 0x2df   : > { %v2104_v14 = vpop.eup %2103 }
 0x2e0   : > { %v1325_v15 = vsel %vm739_vm2, %v2104_v14, 0.0 }
 0x2e1   : > { %1326 = vadd.xlane.f32.xlu0 %v1325_v15  ;;  %v1545_v15 = vld [vmem:[%s2493_s11 + $0x38] sm:$0xff] }
 0x2ee   : > { %1330 = vrot.lane.b32.xlu1 %v2304_v26, %s2130_s25  ;;  %s2132_s25 = smov 8  }
 0x2f7   : > { %1164 = vrot.lane.b32.xlu0 %v2304_v26, %s2128_s23 }
 0x2fd   : > { %v831_v17 = vpop.xlane.xlu1 %830 }
 0x2fe   : > { %2105 = vrcp.f32 %v831_v17  ;;  %v1546_v17 = vld [vmem:[%s2493_s11 + $0x40] sm:$0xff] }
 0x308   : > { %v2106_v18 = vpop.eup %2105 }
 0x309   : > { %v833_v19 = vmul.f32 %v2106_v18, %v2098_v60  ;;  %v1547_v18 = vld [vmem:[%s2493_s11 + $0x48] sm:$0xff] }
 0x30b   : > { %1936 = vmatmul.mubr.msk.f32.vlgmr.msra.gmra.mrb[8].mxu1 %vm739_vm2, %v833_v19  ;;  %v2068_v19 = vpack.c.bf16 %v1547_v18, %v1546_v17 }
 0x30c   : > { %1944 = vmatpush3.msra.mxu1 %v999_v16  ;;  %1945 = vmatprep.mubr.msk.f32.mxu1 %vm2126_vm0, %v2127_v6 }
 0x30d   : > { %1953 = vmatprep.subr.mxu1 %v2127_v6 }
 0x366   : > { %v994_v20 = vpop.xlane.xlu0 %993 }
 0x367   : > { %2107 = vrcp.f32 %v994_v20  ;;  %v1548_v20 = vld [vmem:[%s2493_s11 + $0x50] sm:$0xff] }
 0x36a   : > { %v1161_v21 = vpop.xlane.xlu1 %1160 }
 0x36b   : > { %2109 = vrcp.f32 %v1161_v21  ;;  %v1549_v21 = vld [vmem:[%s2493_s11 + $0x58] sm:$0xff] }
 0x36e   : > { %v1327_v22 = vpop.xlane.xlu0 %1326  ;;  %v1331_v28 = vpop.permute.xlu1 %1330 }
 0x36f   : > { %2111 = vrcp.f32 %v1327_v22  ;;  %v2071_v22 = vpack.c.bf16 %v1549_v21, %v1548_v20 }
 0x371   : > { %v2108_v23 = vpop.eup %2107 }
 0x372   : > { %v996_v24 = vmul.f32 %v2108_v23, %v2100_v9  ;;  %v1165_v25 = vpop.permute.xlu0 %1164  ;;  %v2059_v9 = vpack.c.bf16 %v1541_v8, %v1540_v5  ;;  %v1550_v23 = vld [vmem:[%s2493_s11 + $0x60] sm:$0xff] }
 0x374   : > { %1946 = vmatmul.mubr.msk.f32.vlgmr.msra.gmra.mrb[10].mxu1 %vm739_vm2, %v996_v24  ;;  %v1551_v24 = vld [vmem:[%s2493_s11 + $0x68] sm:$0xff] }
 0x375   : > { %v2110_v26 = vpop.eup %2109  ;;  %1954 = vmatpush3.msra.mxu1 %v1165_v25  ;;  %1955 = vmatprep.mubr.msk.f32.mxu1 %vm2126_vm0, %v2127_v6  ;;  %v2074_v25 = vpack.c.bf16 %v1551_v24, %v1550_v23 }
 0x376   : > { %v1163_v27 = vmul.f32 %v2110_v26, %v2102_v12  ;;  %1963 = vmatprep.subr.mxu1 %v2127_v6  ;;  %v1543_v12 = vld [vmem:[%s2493_s11 + $0x28] sm:$0xff] }
 0x377   : > { %v2062_v13 = vpack.c.bf16 %v1543_v12, %v1542_v11 }
 0x378   : > { %1956 = vmatmul.mubr.msk.f32.vlgmr.msra.gmra.mrb[12].mxu1 %vm739_vm2, %v1163_v27 }
 0x379   : > { %v2112_v29 = vpop.eup %2111  ;;  %1964 = vmatpush3.msra.mxu1 %v1331_v28  ;;  %1965 = vmatprep.mubr.msk.f32.mxu1 %vm2126_vm0, %v2127_v6 }
 0x37a   : > { %v1329_v30 = vmul.f32 %v2112_v29, %v2104_v14  ;;  %2049 = vmatprep.subr.bf16.mxu1 %v2125_v3  ;;  %v1544_v14 = vld [vmem:[%s2493_s11 + $0x30] sm:$0xff] }
 0x37b   : > { %v2065_v16 = vpack.c.bf16 %v1545_v15, %v1544_v14 }
 0x37c   : > { %1966 = vmatmul.mubr.msk.f32.vlgmr.msra.gmra.mrb[14].mxu1 %vm739_vm2, %v1329_v30  ;;  %v1828_v30 = vld [vmem:[%s2489_s7] ss:$0 sm:$0xff] }
 0x37d   : > { %1987 = vmatprep.mubr.msk.f32.mxu1 %vm2126_vm0, %v2127_v6 }
 0x3de   : > { %v903_v31 = vpop.f32.mrb[8].mxu1 }
 0x3df   : > { %v1937_v32 = vpop.f32.mrb[9].mxu1 }
 0x3e0   : > { %v1829_v32 = vld [vmem:[%s2490_s8] ss:$0 sm:$0xff] }
 0x447   : > { %v1070_v39 = vpop.f32.mrb[10].mxu1 }
 0x448   : > { %1407 = vrot.lane.b32.xlu1 %v1070_v39, %s2132_s25  ;;  %v1947_v40 = vpop.f32.mrb[11].mxu1 }
 0x44b   : > { %v1236_v41 = vpop.f32.mrb[12].mxu1 }
 0x44c   : > { %1411 = vrot.lane.b32.xlu0 %v1236_v41, %s2133_s26  ;;  %v1957_v42 = vpop.f32.mrb[13].mxu1 }
 0x44d   : > { %v1832_v42 = vld [vmem:[%s2494_s12] ss:$0 sm:$0xff] }
 0x44f   : > { %v1402_v43 = vpop.f32.mrb[14].mxu1 }
 0x450   : > { %1415 = vrot.lane.b32.xlu1 %v1402_v43, %s2134_s27  ;;  %v1967_v44 = vpop.f32.mrb[15].mxu1 }
 0x4ba   : > { %v1408_v45 = vpop.permute.xlu1 %1407 }
 0x4bb   : > { %v1418_v47 = vsel %vm739_vm2, %v903_v31, %v1408_v45 }
 0x4be   : > { %v1412_v46 = vpop.permute.xlu0 %1411 }
 0x4bf   : > { %v1420_v48 = vsel %vm1419_vm5, %v1418_v47, %v1412_v46 }
 0x4c2   : > { %v1416_v49 = vpop.permute.xlu1 %1415 }
 0x4c3   : > { %v1422_v50 = vsel %vm1421_vm6, %v1420_v48, %v1416_v49 }
 0x4c4   : > { %1977 = vmatmul.mubr.msk.f32.vlgmr.msra.gmra.mrb[6].mxu0 %vm523_vm1, %v1422_v50 }
 0x4c5   : > { %2022 = vmatprep.mubr.msk.f32.mxu0 %vm2126_vm0, %v2127_v6  ;;  %v1533_v6 = vld [vmem:[%s2491_s9] sm:$0xff]  ;;  %2057 = vmatpush3.bf16.msra.mxu0 %v2056_v7 }
 0x4c6   : > { %v2050_v63 = vpack.c.bf16 %v1534_v62, %v1533_v6  ;;  %2058 = vmatprep.subr.bf16.mxu0 %v2125_v3 }
 0x4c8   : > { %2051 = vmatpush3.bf16.msra.mxu1 %v2050_v63 }
 0x4c9   : > { %2052 = vmatprep.subr.bf16.mxu1 %v2125_v3  ;;  %2060 = vmatpush3.bf16.msra.mxu0 %v2059_v9 }
 0x4ca   : > { %2061 = vmatprep.subr.bf16.mxu0 %v2125_v3 }
 0x4cd   : > { %2063 = vmatpush3.bf16.msra.mxu0 %v2062_v13 }
 0x4ce   : > { %2064 = vmatprep.subr.bf16.mxu0 %v2125_v3 }
 0x4d1   : > { %2066 = vmatpush3.bf16.msra.mxu0 %v2065_v16 }
 0x4d2   : > { %2067 = vmatprep.subr.bf16.mxu0 %v2125_v3 }
 0x4d5   : > { %2069 = vmatpush3.bf16.msra.mxu0 %v2068_v19 }
 0x4d6   : > { %2070 = vmatprep.subr.bf16.mxu0 %v2125_v3 }
 0x4d9   : > { %2072 = vmatpush3.bf16.msra.mxu0 %v2071_v22 }
 0x4da   : > { %2073 = vmatprep.subr.bf16.mxu0 %v2125_v3 }
 0x4dd   : > { %2075 = vmatpush3.bf16.msra.mxu0 %v2074_v25 }
 0x4de   : > { %2076 = vmatprep.subr.bf16.mxu0 %v2125_v3  ;;  %v1552_v3 = vld [vmem:[%s2493_s11 + $0x70] sm:$0xff] }
 0x4df   : > { %v2077_v36 = vpack.c.bf16 %v1553_v35, %v1552_v3 }
 0x4e1   : > { %2078 = vmatpush3.bf16.msra.mxu0 %v2077_v36 }
 0x597   : > { %v1498_v52 = vpop.f32.mrb[6].mxu0 }
 0x598   : > { %v1499_v53 = vadd.f32 %v1826_v51, %v1498_v52  ;;  %v1978_v54 = vpop.f32.mrb[7].mxu0 }
 0x59a   : > { %v1504_v55 = vadd.f32 %v1499_v53, %v2256_v10  ;;  %v1535_v10 = vld [vmem:[%s2491_s9 + $0x10] sm:$0xff] }
 0x59b   : > { %v2053_v1 = vpack.c.bf16 %v1536_v0, %v1535_v10 }
 0x59c   : > { %v1505_v56 = vsel %vm523_vm1, %v1504_v55, 0.0 }
 0x59d   : > { %1506 = vadd.xlane.f32.xlu0 %v1505_v56  ;;  %2054 = vmatpush3.bf16.msra.mxu1 %v2053_v1 }
 0x62a   : > { %v1507_v57 = vpop.xlane.xlu0 %1506 }
 0x62b   : > { %v1509_v58 = vmul.f32 0.03125, %v1507_v57  ;;  %v1833_v57 = vld [vmem:[%s2495_s13] ss:$0 sm:$0xff] }
 0x62d   : > { %v1510_v59 = vsub.f32 %v1504_v55, %v1509_v58 }
 0x62f   : > { %v1511_v60 = vmul.f32 %v1510_v59, %v1510_v59 }
 0x631   : > { %v1512_v61 = vsel %vm523_vm1, %v1511_v60, 0.0 }
 0x632   : > { %1513 = vadd.xlane.f32.xlu1 %v1512_v61 }
 0x6bf   : > { %v1514_v26 = vpop.xlane.xlu1 %1513 }
 0x6c0   : > { %v1515_v27 = vmul.f32 0.03125, %v1514_v26 }
 0x6c2   : > { %v1516_v28 = vadd.f32 1e-05, %v1515_v27 }
 0x6c4   : > { %2113 = vrsqrt.f32 %v1516_v28 }
 0x6ce   : > { %v2114_v29 = vpop.eup %2113 }
 0x6cf   : > { %v1518_v31 = vmul.f32 %v2114_v29, %v1510_v59  ;;  %v1834_v59 = vld [vmem:[%s2496_s14] ss:$0 sm:$0xff] }
 0x6d1   : > { %v1525_v33 = vmul.f32 %v1828_v30, %v1518_v31 }
 0x6d3   : > { %v1532_v34 = vadd.f32 %v1829_v32, %v1525_v33 }
 0x6d5   : > { %1988 = vmatmul.mubr.msk.f32.vlgmr.msra.gmra.mrb[16].mxu1 %vm523_vm1, %v1532_v34 }
 0x7a8   : > { %v1630_v38 = vpop.f32.mrb[16].mxu1 }
 0x7a9   : > { %v1631_v39 = vadd.f32 %v1830_v37, %v1630_v38  ;;  %v1989_v40 = vpop.f32.mrb[17].mxu1 }
 0x7ab   : > { %v1634_v41 = vmax.f32 %v1631_v39, 0.0 }
 0x7ad   : > { %2023 = vmatmul.mubr.f32.vlgmr.msra.gmra.mrb[8].mxu0 %v1634_v41 }
 0x880   : > { %v1707_v43 = vpop.f32.mrb[8].mxu0 }
 0x881   : > { %v1708_v44 = vadd.f32 %v1832_v42, %v1707_v43  ;;  %v2024_v45 = vpop.f32.mrb[9].mxu0 }
 0x883   : > { %v1713_v46 = vadd.f32 %v1708_v44, %v1532_v34 }
 0x885   : > { %v1714_v47 = vsel %vm523_vm1, %v1713_v46, 0.0 }
 0x886   : > { %1715 = vadd.xlane.f32.xlu0 %v1714_v47 }
 0x913   : > { %v1716_v48 = vpop.xlane.xlu0 %1715 }
 0x914   : > { %v1717_v49 = vmul.f32 0.03125, %v1716_v48 }
 0x916   : > { %v1718_v50 = vsub.f32 %v1713_v46, %v1717_v49 }
 0x918   : > { %v1719_v51 = vmul.f32 %v1718_v50, %v1718_v50 }
 0x91a   : > { %v1720_v52 = vsel %vm523_vm1, %v1719_v51, 0.0 }
 0x91b   : > { %1721 = vadd.xlane.f32.xlu0 %v1720_v52 }
 0x9a8   : > { %v1722_v53 = vpop.xlane.xlu0 %1721 }
 0x9a9   : > { %v1723_v54 = vmul.f32 0.03125, %v1722_v53 }
 0x9ab   : > { %v1724_v55 = vadd.f32 1e-05, %v1723_v54 }
 0x9ad   : > { %2115 = vrsqrt.f32 %v1724_v55 }
 0x9b7   : > { %v2116_v56 = vpop.eup %2115 }
 0x9b8   : > { %v1726_v58 = vmul.f32 %v2116_v56, %v1718_v50 }
 0x9ba   : > { %v1733_v60 = vmul.f32 %v1833_v57, %v1726_v58 }
 0x9bc   : > { %v1740_v61 = vadd.f32 %v1834_v59, %v1733_v60 }
 0x9be   : > { %1741 = vst.msk [vmem:[%s503_s24] sm:$0xff] %vm523_vm1, %v1740_v61 }
 0x9bf PF: > { %s25_s18 = sadd.s32 1, %s2123_s18  }
 0x9c0   : > { %p22_p4 = scmp.ge.s32.totalorder %s25_s18, 4  }
 0x9c2   :  { %24 = sbr.rel (!%p22_p4) target bundleno = 1 (0x1), region = 113 }

// kernel: transformer_fwd.5
= control target key start
LH: loop header
LB: loop body
LE: loop exit
PB: predicated region body
PF: predicated region fallthrough
CT: control target
= control target key end

     0   :  { %s4160_s0 = inlined_call_operand.vmem [shape: f32[2,8,32], index: 0, kind: input, shape index: {}]   ;;  %s4161_s1 = inlined_call_operand.vmem [shape: f32[2,8,32], index: 1, kind: input, shape index: {}]   ;;  %s4162_s2 = inlined_call_operand.vmem [shape: f32[1,8,8], index: 2, kind: input, shape index: {}]   ;;  %s4163_s3 = inlined_call_operand.vmem [shape: f32[2,1,8], index: 3, kind: input, shape index: {}]   ;;  %s4164_s4 = inlined_call_operand.vmem [shape: f32[32,32], index: 4, kind: input, shape index: {}]   ;;  %s4165_s5 = inlined_call_operand.vmem [shape: f32[32,32], index: 5, kind: input, shape index: {}]   ;;  %s4166_s6 = inlined_call_operand.vmem [shape: f32[32,32], index: 6, kind: input, shape index: {}]   ;;  %s4167_s7 = inlined_call_operand.vmem [shape: f32[32,32], index: 7, kind: input, shape index: {}]   ;;  %s4168_s8 = inlined_call_operand.vmem [shape: f32[1,32], index: 8, kind: input, shape index: {}]   ;;  %s4169_s9 = inlined_call_operand.vmem [shape: f32[1,32], index: 9, kind: input, shape index: {}]   ;;  %s4170_s10 = inlined_call_operand.vmem [shape: f32[1,32], index: 10, kind: input, shape index: {}]   ;;  %s4171_s11 = inlined_call_operand.vmem [shape: f32[32,32], index: 11, kind: input, shape index: {}]   ;;  %s4172_s12 = inlined_call_operand.vmem [shape: f32[32,32], index: 12, kind: input, shape index: {}]   ;;  %s4173_s13 = inlined_call_operand.vmem [shape: f32[32,32], index: 13, kind: input, shape index: {}]   ;;  %s4174_s14 = inlined_call_operand.vmem [shape: f32[32,32], index: 14, kind: input, shape index: {}]   ;;  %s4175_s15 = inlined_call_operand.vmem [shape: f32[1,32], index: 15, kind: input, shape index: {}]   ;;  %s4176_s16 = inlined_call_operand.vmem [shape: f32[1,32], index: 16, kind: input, shape index: {}]   ;;  %s4177_s17 = inlined_call_operand.vmem [shape: f32[1,32], index: 17, kind: input, shape index: {}]   ;;  %s4178_s18 = inlined_call_operand.vmem [shape: f32[32,128], index: 18, kind: input, shape index: {}]   ;;  %s4179_s19 = inlined_call_operand.vmem [shape: f32[1,128], index: 19, kind: input, shape index: {}]   ;;  %s4180_s20 = inlined_call_operand.vmem [shape: f32[128,32], index: 20, kind: input, shape index: {}]   ;;  %s4181_s21 = inlined_call_operand.vmem [shape: f32[1,32], index: 21, kind: input, shape index: {}]   ;;  %s4182_s22 = inlined_call_operand.vmem [shape: f32[1,32], index: 22, kind: input, shape index: {}]   ;;  %s4183_s23 = inlined_call_operand.vmem [shape: f32[1,32], index: 23, kind: input, shape index: {}]   ;;  %s4184_s24 = inlined_call_operand.vmem [shape: f32[2,8,32], index: 24, kind: output, shape index: {}]  }
   0x1   :  { %4201 = sst [smem:[#allocation2_spill]] %s4160_s0 }
   0x2   :  { %4202 = sst [smem:[#allocation3_spill]] %s4161_s1 }
   0x3   :  { %4203 = sst [smem:[#allocation4_spill]] %s4162_s2 }
   0x4   :  { %4204 = sst [smem:[#allocation5_spill]] %s4163_s3 }
   0x5   :  { %4205 = sst [smem:[#allocation6_spill]] %s4164_s4 }
   0x6   :  { %4206 = sst [smem:[#allocation7_spill]] %s4165_s5  ;;  %s3735_s5 = smov 0  }
   0x7   :  { %4207 = sst [smem:[#allocation8_spill]] %s4166_s6 }
   0x8   :  { %4208 = sst [smem:[#allocation9_spill]] %s4167_s7 }
   0x9   :  { %4209 = sst [smem:[#allocation10_spill]] %s4168_s8 }
   0xa LB: > { %s3097_s26 = sadd.s32 4294967295, %s3598_s5   ;;  %p3101_p0 = scmp.ge.s32.totalorder %s3598_s5, 1  ;;  %s3598_s5 = sphi %s3735_s5, %s34_s5  }
   0xb   : > { %p678_p1 = scmp.lt.s32.totalorder %s3598_s5, 3 }
   0xd   : > { %p679_p2 = pnand %p3101_p0, %p678_p1 }
   0xe   : > { %s4210_s6 = sld [smem:[#allocation6_spill]] (!%p679_p2)  ;;  %v3600_v3 = vmov (!%p679_p2), 0.0|0.0   ;;  %vm3601_vm0 = vmmov (!%p679_p2), 0   ;;  %v3602_v6 = vmov (!%p679_p2), 0.0   ;;  %p749_p3 = scmp.lt.s32.totalorder (!%p679_p2), %s3097_s26, 1  ;;  %vm784_vm1 = vcmask (!%p679_p2), 261120  }
   0xf   : > { %682 = sbr.rel (%p679_p2) target bundleno = 4229 (0x1085), region = 116  ;;  %3458 = vmatprep.subr.bf16.mxu1 (!%p679_p2), %v3600_v3  ;;  %3252 = vmatprep.mubr.msk.f32.mxu1 (!%p679_p2), %vm3601_vm0, %v3602_v6  ;;  %s4211_s4 = sld [smem:[#allocation7_spill]] (!%p679_p2)  ;;  %vm1000_vm2 = vcmask (!%p679_p2), 64512   ;;  %vm1674_vm4 = vcmask (!%p679_p2), 130048   ;;  %vm1676_vm5 = vcmask (!%p679_p2), 195584  }
  0x10   : > { %3287 = vmatprep.subr.mxu0 (!%p679_p2), %v3602_v6  ;;  %3289 = vmatprep.mubr.msk.f32.mxu0 (!%p679_p2), %vm3601_vm0, %v3602_v6  ;;  %s4212_s0 = sld [smem:[#allocation2_spill]] (!%p679_p2)  ;;  %s4213_s2 = sld [smem:[#allocation8_spill]] (!%p679_p2) }
  0x11   : > { %s4191_s8 = smov (!%p679_p2), 112   ;;  %s4193_s1 = smov (!%p679_p2), 120  }
  0x12   : > { %s4189_s27 = smov (!%p679_p2), 104   ;;  %s4215_s25 = sld [smem:[#allocation9_spill]] (!%p679_p2) }
  0x13   : > { %s4197_s30 = smov (!%p679_p2), 8   ;;  %s4196_s3 = smov (!%p679_p2), 16  }
  0x14   : > { %v767_v0 = vld [vmem:[%s4210_s6] sm:$0xff] (!%p679_p2)  ;;  %v768_v1 = vld [vmem:[%s4210_s6 + $0x8] sm:$0xff] (!%p679_p2)  ;;  %v769_v2 = vld [vmem:[%s4210_s6 + $0x10] sm:$0xff] (!%p679_p2)  ;;  %s4216_s29 = sld [smem:[#allocation10_spill]] (!%p679_p2) }
  0x15   : > { %v3459_v4 = vpack.c.bf16 (!%p679_p2), %v768_v1, %v767_v0  ;;  %v770_v5 = vld [vmem:[%s4210_s6 + $0x18] sm:$0xff] (!%p679_p2)  ;;  %v771_v8 = vld [vmem:[%s4211_s4] sm:$0xff] (!%p679_p2)  ;;  %v772_v9 = vld [vmem:[%s4211_s4 + $0x8] sm:$0xff] (!%p679_p2) }
  0x16   : > { %v3462_v7 = vpack.c.bf16 %v770_v5, %v769_v2  ;;  %s4226_s26 = smov (!%p749_p3, %s3097_s26), 1  ;;  %v3465_v11 = vpack.c.bf16 %v772_v9, %v771_v8  ;;  %v773_v12 = vld [vmem:[%s4211_s4 + $0x10] sm:$0xff]  ;;  %v774_v13 = vld [vmem:[%s4211_s4 + $0x18] sm:$0xff]  ;;  %v775_v15 = vld [vmem:[%s4213_s2] sm:$0xff] }
  0x17   : > { %3460 = vmatpush3.bf16.msra.mxu1 %v3459_v4  ;;  %s3771_s28 = sshll.u32 %s4226_s26, 3  ;;  %v3468_v14 = vpack.c.bf16 %v774_v13, %v773_v12  ;;  %v776_v16 = vld [vmem:[%s4213_s2 + $0x8] sm:$0xff]  ;;  %v777_v18 = vld [vmem:[%s4213_s2 + $0x10] sm:$0xff]  ;;  %v778_v19 = vld [vmem:[%s4213_s2 + $0x18] sm:$0xff]  ;;  %s4217_s2 = sld [smem:[#allocation3_spill]] }
  0x18   : > { %3461 = vmatprep.subr.bf16.mxu1 %v3600_v3  ;;  %s752_s7 = scalar_lea.vmem %s4212_s0, %s3771_s28  ;;  %v3471_v17 = vpack.c.bf16 %v776_v16, %v775_v15  ;;  %v3474_v20 = vpack.c.bf16 %v778_v19, %v777_v18 }
  0x19   : > { %v3777_v10 = vld [vmem:[%s752_s7] sm:$0xff]  ;;  %s4214_s7 = sld [smem:[#allocation4_spill]] }
  0x1b   : > { %3463 = vmatpush3.bf16.msra.mxu1 %v3462_v7 }
  0x1c   : > { %3464 = vmatprep.subr.bf16.mxu1 %v3600_v3 }
  0x1d   : > { %s756_s4 = scalar_lea.vmem %s4217_s2, %s3771_s28  ;;  %s4223_s2 = smov 16  }
  0x1e   : > { %3253 = vmatmul.mubr.msk.f32.vlgmr.msra.gmra.mrb[0].mxu1 %vm784_vm1, %v3777_v10 }
  0x1f   : > { %3466 = vmatpush3.bf16.msra.mxu1 %v3465_v11  ;;  %3263 = vmatprep.mubr.msk.f32.mxu1 %vm3601_vm0, %v3602_v6  ;;  %v766_v34 = vld [vmem:[%s4214_s7] sm:$0xff]  ;;  %s763_s7 = scalar_lea.vmem %s4184_s24, %s3771_s28 }
  0x20   : > { %3467 = vmatprep.subr.bf16.mxu1 %v3600_v3  ;;  %vm999_vm3 = vcmp.eq.f32.partialorder %v766_v34, 0.0 }
  0x23   : > { %3469 = vmatpush3.bf16.msra.mxu1 %v3468_v14 }
  0x24   : > { %3470 = vmatprep.subr.bf16.mxu1 %v3600_v3 }
  0x26   : > { %3264 = vmatmul.mubr.msk.f32.vlgmr.msra.gmra.mrb[2].mxu1 %vm784_vm1, %v3777_v10 }
  0x27   : > { %3472 = vmatpush3.bf16.msra.mxu1 %v3471_v17  ;;  %3274 = vmatprep.mubr.msk.f32.mxu1 %vm3601_vm0, %v3602_v6 }
  0x28   : > { %3473 = vmatprep.subr.bf16.mxu1 %v3600_v3 }
  0x2b   : > { %3475 = vmatpush3.bf16.msra.mxu1 %v3474_v20 }
  0x2c   : > { %3277 = vmatprep.subr.mxu1 %v3602_v6 }
  0x2e   : > { %3275 = vmatmul.mubr.msk.f32.vlgmr.msra.gmra.mrb[4].mxu1 %vm784_vm1, %v3777_v10 }
  0x2f   : > { %3279 = vmatprep.mubr.msk.f32.mxu1 %vm3601_vm0, %v3602_v6 }
  0xf1   : > { %v854_v21 = vpop.f32.mrb[0].mxu1 }
  0xf2   : > { %v3254_v22 = vpop.f32.mrb[1].mxu1  ;;  %v858_v25 = vmul.f32 0.17677669, %v854_v21 }
  0xf9   : > { %v925_v23 = vpop.f32.mrb[2].mxu1 }
  0xfa   : > { %1331 = vrot.lane.b32.xlu1 %v925_v23, %s4191_s8  ;;  %1164 = vrot.lane.b32.xlu0 %v925_v23, %s4193_s1  ;;  %v3265_v24 = vpop.f32.mrb[3].mxu1 }
  0xfb   : > { %3278 = vmatpush3.xpose.msk.msra.mxu1 %vm1000_vm2, %v925_v23 }
  0xfc   : > { %3282 = vmatprep.subr.mxu1 %v3602_v6 }
  0xfe   : > { %3280 = vmatmul.mubr.msk.f32.vlgmr.msra.gmra.mrb[6].mxu1 %vm1000_vm2, %v858_v25  ;;  %1329 = vrot.lane.b32.xlu1 %v858_v25, %s4191_s8 }
  0xff   : > { %1162 = vrot.lane.b32.xlu0 %v858_v25, %s4193_s1  ;;  %3284 = vmatprep.mubr.msk.f32.mxu1 %vm3601_vm0, %v3602_v6 }
 0x101   : > { %v3825_v26 = vpop.f32.mrb[4].mxu1 }
 0x102   : > { %1495 = vrot.lane.b32.xlu1 %v858_v25, %s4189_s27  ;;  %v3276_v27 = vpop.f32.mrb[5].mxu1  ;;  %3283 = vmatpush3.msra.mxu1 %v3825_v26 }
 0x103   : > { %1497 = vrot.lane.b32.xlu0 %v925_v23, %s4189_s27  ;;  %3292 = vmatprep.subr.mxu1 %v3602_v6  ;;  %v779_v27 = vld [vmem:[%s4215_s25] sm:$0xff] }
 0x16c   : > { %v1165_v28 = vpop.permute.xlu0 %1164  ;;  %v1332_v29 = vpop.permute.xlu1 %1331 }
 0x16d   : > { %3288 = vmatpush3.xpose.msk.msra.mxu0 %vm1000_vm2, %v1165_v28  ;;  %v780_v28 = vld [vmem:[%s4215_s25 + $0x8] sm:$0xff] }
 0x16e   : > { %3297 = vmatprep.subr.mxu0 %v3602_v6 }
 0x170   : > { %v1330_v31 = vpop.permute.xlu1 %1329 }
 0x171   : > { %v1163_v30 = vpop.permute.xlu0 %1162 }
 0x172   : > { %3290 = vmatmul.mubr.msk.f32.vlgmr.msra.gmra.mrb[0].mxu0 %vm1000_vm2, %v1163_v30  ;;  %v781_v30 = vld [vmem:[%s4215_s25 + $0x10] sm:$0xff] }
 0x173   : > { %3298 = vmatpush3.xpose.msk.msra.mxu0 %vm1000_vm2, %v1332_v29  ;;  %3299 = vmatprep.mubr.msk.f32.mxu0 %vm3601_vm0, %v3602_v6  ;;  %v3477_v29 = vpack.c.bf16 %v780_v28, %v779_v27 }
 0x174   : > { %3307 = vmatprep.subr.mxu0 %v3602_v6  ;;  %v1496_v33 = vpop.permute.xlu1 %1495 }
 0x175   : > { %v1498_v32 = vpop.permute.xlu0 %1497 }
 0x176   : > { %3300 = vmatmul.mubr.msk.f32.vlgmr.msra.gmra.mrb[2].mxu0 %vm1000_vm2, %v1330_v31  ;;  %v782_v31 = vld [vmem:[%s4215_s25 + $0x18] sm:$0xff] }
 0x177   : > { %3308 = vmatpush3.xpose.msk.msra.mxu0 %vm1000_vm2, %v1498_v32  ;;  %3309 = vmatprep.mubr.msk.f32.mxu0 %vm3601_vm0, %v3602_v6  ;;  %v3480_v32 = vpack.c.bf16 %v782_v31, %v781_v30 }
 0x178   : > { %3476 = vmatprep.subr.bf16.mxu0 %v3600_v3 }
 0x17a   : > { %3310 = vmatmul.mubr.msk.f32.vlgmr.msra.gmra.mrb[4].mxu0 %vm1000_vm2, %v1496_v33 }
 0x17b   : > { %3325 = vmatprep.mubr.msk.f32.mxu0 %vm3601_vm0, %v3602_v6  ;;  %3478 = vmatpush3.bf16.msra.mxu0 %v3477_v29 }
 0x17c   : > { %3479 = vmatprep.subr.bf16.mxu0 %v3600_v3 }
 0x17f   : > { %3481 = vmatpush3.bf16.msra.mxu0 %v3480_v32 }
 0x180   : > { %3488 = vmatprep.subr.bf16.mxu0 %v3600_v3 }
 0x1d1   : > { %v1073_v35 = vpop.f32.mrb[6].mxu1 }
 0x1d2   : > { %v1077_v36 = vsel %vm999_vm3, -1e+20, %v1073_v35  ;;  %v3281_v37 = vpop.f32.mrb[7].mxu1 }
 0x1d3   : > { %v1078_v38 = vsel %vm1000_vm2, %v1077_v36, -inf }
 0x1d4   : > { %1079 = vmax.xlane.f32.xlu0 %v1078_v38 }
 0x245   : > { %v1236_v39 = vpop.f32.mrb[0].mxu0 }
 0x246   : > { %v1240_v40 = vsel %vm999_vm3, -1e+20, %v1236_v39  ;;  %v3291_v41 = vpop.f32.mrb[1].mxu0 }
 0x247   : > { %v1241_v42 = vsel %vm1000_vm2, %v1240_v40, -inf }
 0x248   : > { %1242 = vmax.xlane.f32.xlu1 %v1241_v42 }
 0x249   : > { %v1403_v43 = vpop.f32.mrb[2].mxu0 }
 0x24a   : > { %v1407_v44 = vsel %vm999_vm3, -1e+20, %v1403_v43  ;;  %v3301_v45 = vpop.f32.mrb[3].mxu0 }
 0x24b   : > { %v1408_v46 = vsel %vm1000_vm2, %v1407_v44, -inf  ;;  %v3120_v45 = vld [vmem:[%s4216_s29] ss:$0 sm:$0xff] }
 0x24c   : > { %1409 = vmax.xlane.f32.xlu0 %v1408_v46 }
 0x24d   : > { %v1569_v47 = vpop.f32.mrb[4].mxu0 }
 0x24e   : > { %v1573_v48 = vsel %vm999_vm3, -1e+20, %v1569_v47  ;;  %v3311_v49 = vpop.f32.mrb[5].mxu0 }
 0x24f   : > { %v1574_v50 = vsel %vm1000_vm2, %v1573_v48, -inf }
 0x250   : > { %1575 = vmax.xlane.f32.xlu0 %v1574_v50 }
 0x259   : > { %1253 = vrot.lane.b32.xlu1 %v3825_v26, %s4193_s1  ;;  %s4219_s1 = smov 112  }
 0x261   : > { %v1080_v51 = vpop.xlane.xlu0 %1079 }
 0x262   : > { %v1081_v52 = vsub.f32 %v1077_v36, %v1080_v51 }
 0x264   : > { %v1082_v53 = vmul.f32 1.442695, %v1081_v52 }
 0x266   : > { %3554 = vpow2.f32 %v1082_v53 }
 0x270   : > { %v3555_v54 = vpop.eup %3554 }
 0x271   : > { %v1084_v55 = vsel %vm1000_vm2, %v3555_v54, 0.0 }
 0x27d   : > { %1085 = vadd.xlane.f32.xlu1 %v1084_v55 }
 0x2d5   : > { %v1243_v56 = vpop.xlane.xlu1 %1242 }
 0x2d6   : > { %v1244_v57 = vsub.f32 %v1240_v40, %v1243_v56  ;;  %v1793_v56 = vld [vmem:[%s4172_s12] sm:$0xff] }
 0x2d8   : > { %v1245_v58 = vmul.f32 1.442695, %v1244_v57  ;;  %v1794_v57 = vld [vmem:[%s4172_s12 + $0x8] sm:$0xff] }
 0x2d9   : > { %v1410_v59 = vpop.xlane.xlu0 %1409  ;;  %v1254_v9 = vpop.permute.xlu1 %1253 }
 0x2da   : > { %3556 = vpow2.f32 %v1245_v58  ;;  %v1411_v60 = vsub.f32 %v1407_v44, %v1410_v59  ;;  %v1795_v58 = vld [vmem:[%s4172_s12 + $0x10] sm:$0xff]  ;;  %v1796_v59 = vld [vmem:[%s4172_s12 + $0x18] sm:$0xff] }
 0x2dc   : > { %v1412_v61 = vmul.f32 1.442695, %v1411_v60  ;;  %v3492_v60 = vpack.c.bf16 %v1796_v59, %v1795_v58 }
 0x2dd   : > { %v1576_v62 = vpop.xlane.xlu0 %1575 }
 0x2de   : > { %3558 = vpow2.f32 %v1412_v61  ;;  %v1577_v63 = vsub.f32 %v1573_v48, %v1576_v62  ;;  %v765_v61 = vld [vmem:[%s756_s4] sm:$0xff]  ;;  %s4221_s4 = sld [smem:[#allocation5_spill]] }
 0x2df   : > { %v1789_v62 = vld [vmem:[%s4171_s11] sm:$0xff] }
 0x2e0   : > { %v1578_v0 = vmul.f32 1.442695, %v1577_v63  ;;  %v1790_v63 = vld [vmem:[%s4171_s11 + $0x8] sm:$0xff] }
 0x2e2   : > { %3560 = vpow2.f32 %v1578_v0  ;;  %v3483_v0 = vpack.c.bf16 %v1790_v63, %v1789_v62 }
 0x2e4   : > { %v3557_v1 = vpop.eup %3556 }
 0x2e5   : > { %v1247_v2 = vsel %vm1000_vm2, %v3557_v1, 0.0 }
 0x2e6   : > { %1248 = vadd.xlane.f32.xlu0 %v1247_v2  ;;  %v1792_v2 = vld [vmem:[%s4171_s11 + $0x18] sm:$0xff] }
 0x2e8   : > { %v3559_v4 = vpop.eup %3558 }
 0x2e9   : > { %v1414_v5 = vsel %vm1000_vm2, %v3559_v4, 0.0 }
 0x2ea   : > { %1415 = vadd.xlane.f32.xlu1 %v1414_v5 }
 0x2ec   : > { %v3561_v7 = vpop.eup %3560 }
 0x2ed   : > { %v1580_v8 = vsel %vm1000_vm2, %v3561_v7, 0.0 }
 0x2ee   : > { %1581 = vadd.xlane.f32.xlu0 %v1580_v8 }
 0x2fb   : > { %1585 = vrot.lane.b32.xlu1 %v3825_v26, %s4189_s27  ;;  %s4195_s27 = smov 24  }
 0x304   : > { %1419 = vrot.lane.b32.xlu0 %v3825_v26, %s4191_s8  ;;  %s4218_s8 = smov 120  }
 0x30a   : > { %v1086_v11 = vpop.xlane.xlu1 %1085 }
 0x30b   : > { %3562 = vrcp.f32 %v1086_v11  ;;  %v3122_v11 = vld [vmem:[%s4169_s9] ss:$0 sm:$0xff] }
 0x315   : > { %v3563_v12 = vpop.eup %3562 }
 0x316   : > { %v1088_v13 = vmul.f32 %v3563_v12, %v3555_v54 }
 0x318   : > { %3285 = vmatmul.mubr.msk.f32.vlgmr.msra.gmra.mrb[8].mxu1 %vm1000_vm2, %v1088_v13  ;;  %v3123_v13 = vld [vmem:[%s4170_s10] ss:$0 sm:$0xff] }
 0x319   : > { %3293 = vmatpush3.msra.mxu1 %v1254_v9  ;;  %3294 = vmatprep.mubr.msk.f32.mxu1 %vm3601_vm0, %v3602_v6 }
 0x31a   : > { %3302 = vmatprep.subr.mxu1 %v3602_v6 }
 0x373   : > { %v1249_v14 = vpop.xlane.xlu0 %1248 }
 0x374   : > { %3564 = vrcp.f32 %v1249_v14 }
 0x377   : > { %v1416_v15 = vpop.xlane.xlu1 %1415 }
 0x378   : > { %3566 = vrcp.f32 %v1416_v15 }
 0x37b   : > { %v1582_v16 = vpop.xlane.xlu0 %1581  ;;  %v1586_v22 = vpop.permute.xlu1 %1585 }
 0x37c   : > { %3568 = vrcp.f32 %v1582_v16 }
 0x37e   : > { %v3565_v17 = vpop.eup %3564 }
 0x37f   : > { %v1251_v18 = vmul.f32 %v3565_v17, %v3557_v1  ;;  %v1420_v19 = vpop.permute.xlu0 %1419  ;;  %v1791_v1 = vld [vmem:[%s4171_s11 + $0x10] sm:$0xff] }
 0x381   : > { %3295 = vmatmul.mubr.msk.f32.vlgmr.msra.gmra.mrb[10].mxu1 %vm1000_vm2, %v1251_v18  ;;  %v1797_v18 = vld [vmem:[%s4173_s13] sm:$0xff] }
 0x382   : > { %v3567_v20 = vpop.eup %3566  ;;  %3303 = vmatpush3.msra.mxu1 %v1420_v19  ;;  %3304 = vmatprep.mubr.msk.f32.mxu1 %vm3601_vm0, %v3602_v6  ;;  %v1798_v19 = vld [vmem:[%s4173_s13 + $0x8] sm:$0xff] }
 0x383   : > { %v1418_v21 = vmul.f32 %v3567_v20, %v3559_v4  ;;  %3312 = vmatprep.subr.mxu1 %v3602_v6  ;;  %v3486_v4 = vpack.c.bf16 %v1792_v2, %v1791_v1  ;;  %v1799_v20 = vld [vmem:[%s4173_s13 + $0x10] sm:$0xff] }
 0x385   : > { %3305 = vmatmul.mubr.msk.f32.vlgmr.msra.gmra.mrb[12].mxu1 %vm1000_vm2, %v1418_v21  ;;  %v3495_v21 = vpack.c.bf16 %v1798_v19, %v1797_v18 }
 0x386   : > { %v3569_v23 = vpop.eup %3568  ;;  %3313 = vmatpush3.msra.mxu1 %v1586_v22  ;;  %3314 = vmatprep.mubr.msk.f32.mxu1 %vm3601_vm0, %v3602_v6  ;;  %v1800_v22 = vld [vmem:[%s4173_s13 + $0x18] sm:$0xff] }
 0x387   : > { %v1584_v24 = vmul.f32 %v3569_v23, %v3561_v7  ;;  %3482 = vmatprep.subr.bf16.mxu1 %v3600_v3 }
 0x389   : > { %3315 = vmatmul.mubr.msk.f32.vlgmr.msra.gmra.mrb[14].mxu1 %vm1000_vm2, %v1584_v24 }
 0x38a   : > { %3336 = vmatprep.mubr.msk.f32.mxu1 %vm3601_vm0, %v3602_v6  ;;  %3484 = vmatpush3.bf16.msra.mxu1 %v3483_v0 }
 0x38b   : > { %3485 = vmatprep.subr.bf16.mxu1 %v3600_v3 }
 0x38e   : > { %3487 = vmatpush3.bf16.msra.mxu1 %v3486_v4 }
 0x38f   : > { %3494 = vmatprep.subr.bf16.mxu1 %v3600_v3 }
 0x3eb   : > { %v1158_v25 = vpop.f32.mrb[8].mxu1 }
 0x3ec   : > { %v3286_v26 = vpop.f32.mrb[9].mxu1 }
 0x3ed   : > { %v3498_v26 = vpack.c.bf16 %v1800_v22, %v1799_v20 }
 0x454   : > { %v1325_v33 = vpop.f32.mrb[10].mxu1 }
 0x455   : > { %1662 = vrot.lane.b32.xlu1 %v1325_v33, %s4197_s30  ;;  %v3296_v34 = vpop.f32.mrb[11].mxu1  ;;  %v2101_v33 = vlaneseq  ;;  %s4222_s30 = smov 8  }
 0x458   : > { %v1491_v35 = vpop.f32.mrb[12].mxu1 }
 0x459   : > { %1666 = vrot.lane.b32.xlu0 %v1491_v35, %s4196_s3  ;;  %v3306_v36 = vpop.f32.mrb[13].mxu1  ;;  %s759_s3 = scalar_lea.vmem %s4221_s4, %s4226_s26  ;;  %v2102_v35 = vshrl.u32 %v2101_v33, 7  ;;  %s4224_s4 = smov 24  }
 0x45a   : > { %v1788_v34 = vld [vmem:[%s759_s3] sm:$0x1] }
 0x45b   : > { %vm2023_vm6 = vcmp.eq.f32.partialorder %v1788_v34, 0.0  ;;  %v2103_v36 = vsub.s32 0, %v2102_v35  ;;  %v1801_v34 = vld [vmem:[%s4174_s14] sm:$0xff]  ;;  %v1802_v35 = vld [vmem:[%s4174_s14 + $0x8] sm:$0xff] }
 0x45c   : > { %v1657_v37 = vpop.f32.mrb[14].mxu1 }
 0x45d   : > { %1670 = vrot.lane.b32.xlu1 %v1657_v37, %s4195_s27  ;;  %v3316_v38 = vpop.f32.mrb[15].mxu1  ;;  %s4220_s27 = smov 104   ;;  %v3609_v37 = vmov 0  }
 0x45e   : > { %v2100_v38 = vsel %vm2023_vm6, 1, %v3609_v37  ;;  %v1803_v37 = vld [vmem:[%s4174_s14 + $0x10] sm:$0xff] }
 0x4c7   : > { %v1663_v39 = vpop.permute.xlu1 %1662 }
 0x4c8   : > { %v1673_v41 = vsel %vm1000_vm2, %v1158_v25, %v1663_v39  ;;  %v2104_v39 = vrot.slane %v2100_v38, %v2103_v36  ;;  %v3501_v36 = vpack.c.bf16 %v1802_v35, %v1801_v34  ;;  %v1804_v38 = vld [vmem:[%s4174_s14 + $0x18] sm:$0xff] }
 0x4ca   : > { %vm2105_vm7 = vcmp.eq.s32.totalorder %v2104_v39, 1  ;;  %v3504_v39 = vpack.c.bf16 %v1804_v38, %v1803_v37  ;;  %v3143_v38 = vld [vmem:[%s4179_s19] ss:$0 sm:$0xff] }
 0x4cb   : > { %v1667_v40 = vpop.permute.xlu0 %1666 }
 0x4cc   : > { %v1675_v42 = vsel %vm1674_vm4, %v1673_v41, %v1667_v40 }
 0x4cf   : > { %v1671_v43 = vpop.permute.xlu1 %1670 }
 0x4d0   : > { %v1677_v44 = vsel %vm1676_vm5, %v1675_v42, %v1671_v43 }
 0x4d1   : > { %3326 = vmatmul.mubr.msk.f32.vlgmr.msra.gmra.mrb[6].mxu0 %vm784_vm1, %v1677_v44 }
 0x4d2   : > { %3347 = vmatprep.mubr.msk.f32.mxu0 %vm3601_vm0, %v3602_v6 }
 0x5a4   : > { %v1753_v46 = vpop.f32.mrb[6].mxu0 }
 0x5a5   : > { %v1754_v47 = vadd.f32 %v3120_v45, %v1753_v46  ;;  %v3327_v48 = vpop.f32.mrb[7].mxu0 }
 0x5a7   : > { %v1759_v49 = vadd.f32 %v1754_v47, %v3777_v10  ;;  %v3489_v10 = vpack.c.bf16 %v1794_v57, %v1793_v56 }
 0x5a9   : > { %v1760_v50 = vsel %vm784_vm1, %v1759_v49, 0.0  ;;  %3490 = vmatpush3.bf16.msra.mxu0 %v3489_v10 }
 0x5aa   : > { %1761 = vadd.xlane.f32.xlu0 %v1760_v50  ;;  %3491 = vmatprep.subr.bf16.mxu0 %v3600_v3 }
 0x5ad   : > { %3493 = vmatpush3.bf16.msra.mxu0 %v3492_v60 }
 0x5ae   : > { %3361 = vmatprep.subr.mxu0 %v3602_v6 }
 0x5b0   : > { %3348 = vmatmul.mubr.msk.f32.vlgmr.msra.gmra.mrb[8].mxu0 %vm784_vm1, %v765_v61 }
 0x5b1   : > { %3363 = vmatprep.mubr.msk.f32.mxu0 %vm3601_vm0, %v3602_v6 }
 0x637   : > { %v1762_v51 = vpop.xlane.xlu0 %1761 }
 0x638   : > { %v1764_v52 = vmul.f32 0.03125, %v1762_v51 }
 0x63a   : > { %v1765_v53 = vsub.f32 %v1759_v49, %v1764_v52 }
 0x63c   : > { %v1766_v54 = vmul.f32 %v1765_v53, %v1765_v53 }
 0x63e   : > { %v1767_v55 = vsel %vm784_vm1, %v1766_v54, 0.0 }
 0x63f   : > { %1768 = vadd.xlane.f32.xlu1 %v1767_v55 }
 0x683   : > { %v1949_v16 = vpop.f32.mrb[8].mxu0 }
 0x684   : > { %2193 = vrot.lane.b32.xlu0 %v1949_v16, %s4218_s8  ;;  %v3349_v17 = vpop.f32.mrb[9].mxu0  ;;  %3362 = vmatpush3.xpose.msk.msra.mxu0 %vm1000_vm2, %v1949_v16 }
 0x685   : > { %3371 = vmatprep.subr.mxu0 %v3602_v6 }
 0x688   : > { %2360 = vrot.lane.b32.xlu0 %v1949_v16, %s4219_s1 }
 0x68c   : > { %2526 = vrot.lane.b32.xlu0 %v1949_v16, %s4220_s27 }
 0x6cc   : > { %v1769_v5 = vpop.xlane.xlu1 %1768 }
 0x6cd   : > { %v1770_v7 = vmul.f32 0.03125, %v1769_v5 }
 0x6cf   : > { %v1771_v8 = vadd.f32 1e-05, %v1770_v7 }
 0x6d1   : > { %3570 = vrsqrt.f32 %v1771_v8 }
 0x6db   : > { %v3571_v9 = vpop.eup %3570 }
 0x6dc   : > { %v1773_v12 = vmul.f32 %v3571_v9, %v1765_v53 }
 0x6de   : > { %v1780_v14 = vmul.f32 %v3122_v11, %v1773_v12 }
 0x6e0   : > { %v3950_v15 = vadd.f32 %v3123_v13, %v1780_v14 }
 0x6e2   : > { %3337 = vmatmul.mubr.msk.f32.vlgmr.msra.gmra.mrb[16].mxu1 %vm784_vm1, %v3950_v15 }
 0x6e3   : > { %3358 = vmatprep.mubr.msk.f32.mxu1 %vm3601_vm0, %v3602_v6  ;;  %3496 = vmatpush3.bf16.msra.mxu1 %v3495_v21 }
 0x6e4   : > { %3497 = vmatprep.subr.bf16.mxu1 %v3600_v3 }
 0x6e7   : > { %3499 = vmatpush3.bf16.msra.mxu1 %v3498_v26 }
 0x6e8   : > { %3366 = vmatprep.subr.mxu1 %v3602_v6 }
 0x6ea   : > { %3359 = vmatmul.mubr.msk.f32.vlgmr.msra.gmra.mrb[18].mxu1 %vm784_vm1, %v765_v61 }
 0x6eb   : > { %3368 = vmatprep.mubr.msk.f32.mxu1 %vm3601_vm0, %v3602_v6 }
 0x6f6   : > { %v2194_v27 = vpop.permute.xlu0 %2193 }
 0x6fa   : > { %v2361_v28 = vpop.permute.xlu0 %2360 }
 0x6fe   : > { %v2527_v31 = vpop.permute.xlu0 %2526 }
 0x7b5   : > { %v1875_v23 = vpop.f32.mrb[16].mxu1 }
 0x7b6   : > { %v1879_v24 = vmul.f32 0.17677669, %v1875_v23  ;;  %v3338_v25 = vpop.f32.mrb[17].mxu1 }
 0x7b8   : > { %2191 = vrot.lane.b32.xlu1 %v1879_v24, %s4218_s8  ;;  %3364 = vmatmul.mubr.msk.f32.vlgmr.msra.gmra.mrb[10].mxu0 %vm1000_vm2, %v1879_v24 }
 0x7b9   : > { %3372 = vmatpush3.xpose.msk.msra.mxu0 %vm1000_vm2, %v2194_v27  ;;  %3373 = vmatprep.mubr.msk.f32.mxu0 %vm3601_vm0, %v3602_v6 }
 0x7ba   : > { %3381 = vmatprep.subr.mxu0 %v3602_v6 }
 0x7bc   : > { %2358 = vrot.lane.b32.xlu1 %v1879_v24, %s4219_s1 }
 0x7bd   : > { %v2019_v44 = vpop.f32.mrb[18].mxu1 }
 0x7be   : > { %v3360_v45 = vpop.f32.mrb[19].mxu1  ;;  %3367 = vmatpush3.msra.mxu1 %v2019_v44 }
 0x7bf   : > { %3376 = vmatprep.subr.mxu1 %v3602_v6 }
 0x7c0   : > { %2524 = vrot.lane.b32.xlu1 %v1879_v24, %s4220_s27 }
 0x82a   : > { %v2192_v29 = vpop.permute.xlu1 %2191 }
 0x82b   : > { %3374 = vmatmul.mubr.msk.f32.vlgmr.msra.gmra.mrb[12].mxu0 %vm1000_vm2, %v2192_v29 }
 0x82c   : > { %3382 = vmatpush3.xpose.msk.msra.mxu0 %vm1000_vm2, %v2361_v28  ;;  %3383 = vmatprep.mubr.msk.f32.mxu0 %vm3601_vm0, %v3602_v6 }
 0x82d   : > { %3391 = vmatprep.subr.mxu0 %v3602_v6 }
 0x82e   : > { %v2359_v30 = vpop.permute.xlu1 %2358 }
 0x82f   : > { %3384 = vmatmul.mubr.msk.f32.vlgmr.msra.gmra.mrb[14].mxu0 %vm1000_vm2, %v2359_v30 }
 0x830   : > { %3392 = vmatpush3.xpose.msk.msra.mxu0 %vm1000_vm2, %v2527_v31  ;;  %3393 = vmatprep.mubr.msk.f32.mxu0 %vm3601_vm0, %v3602_v6 }
 0x831   : > { %3500 = vmatprep.subr.bf16.mxu0 %v3600_v3 }
 0x832   : > { %v2525_v32 = vpop.permute.xlu1 %2524 }
 0x833   : > { %3394 = vmatmul.mubr.msk.f32.vlgmr.msra.gmra.mrb[16].mxu0 %vm1000_vm2, %v2525_v32 }
 0x834   : > { %3409 = vmatprep.mubr.msk.f32.mxu0 %vm3601_vm0, %v3602_v6  ;;  %3502 = vmatpush3.bf16.msra.mxu0 %v3501_v36  ;;  %v2834_v36 = vld [vmem:[%s4180_s20 + $0x78] sm:$0xff] }
 0x835   : > { %3503 = vmatprep.subr.bf16.mxu0 %v3600_v3 }
 0x838   : > { %3505 = vmatpush3.bf16.msra.mxu0 %v3504_v39 }
 0x839   : > { %3512 = vmatprep.subr.bf16.mxu0 %v3600_v3 }
 0x88b   : > { %v2096_v40 = vpop.f32.mrb[10].mxu0 }
 0x88c   : > { %v2106_v41 = vsel %vm2105_vm7, -1e+20, %v2096_v40  ;;  %v3365_v42 = vpop.f32.mrb[11].mxu0 }
 0x88d   : > { %v2107_v43 = vsel %vm1000_vm2, %v2106_v41, -inf }
 0x88e   : > { %2108 = vmax.xlane.f32.xlu0 %v2107_v43 }
 0x8fe   : > { %v2265_v46 = vpop.f32.mrb[12].mxu0 }
 0x8ff   : > { %v2269_v47 = vsel %vm2105_vm7, -1e+20, %v2265_v46  ;;  %v3375_v48 = vpop.f32.mrb[13].mxu0 }
 0x900   : > { %v2270_v49 = vsel %vm1000_vm2, %v2269_v47, -inf }
 0x901   : > { %2271 = vmax.xlane.f32.xlu1 %v2270_v49 }
 0x902   : > { %v2432_v50 = vpop.f32.mrb[14].mxu0 }
 0x903   : > { %v2436_v51 = vsel %vm2105_vm7, -1e+20, %v2432_v50  ;;  %v3385_v52 = vpop.f32.mrb[15].mxu0 }
 0x904   : > { %v2437_v53 = vsel %vm1000_vm2, %v2436_v51, -inf  ;;  %v3139_v52 = vld [vmem:[%s4175_s15] ss:$0 sm:$0xff] }
 0x905   : > { %2438 = vmax.xlane.f32.xlu0 %v2437_v53 }
 0x906   : > { %v2598_v54 = vpop.f32.mrb[16].mxu0 }
 0x907   : > { %v2602_v55 = vsel %vm2105_vm7, -1e+20, %v2598_v54  ;;  %v3395_v56 = vpop.f32.mrb[17].mxu0 }
 0x908   : > { %v2603_v57 = vsel %vm1000_vm2, %v2602_v55, -inf }
 0x909   : > { %2604 = vmax.xlane.f32.xlu0 %v2603_v57 }
 0x912   : > { %2282 = vrot.lane.b32.xlu1 %v2019_v44, %s4218_s8 }
 0x91b   : > { %v2109_v10 = vpop.xlane.xlu0 %2108 }
 0x91c   : > { %v2110_v58 = vsub.f32 %v2106_v41, %v2109_v10 }
 0x91e   : > { %v2111_v59 = vmul.f32 1.442695, %v2110_v58 }
 0x920   : > { %3572 = vpow2.f32 %v2111_v59 }
 0x92a   : > { %v3573_v60 = vpop.eup %3572 }
 0x92b   : > { %v2113_v61 = vsel %vm1000_vm2, %v3573_v60, 0.0 }
 0x936   : > { %2114 = vadd.xlane.f32.xlu1 %v2113_v61 }
 0x98e   : > { %v2272_v62 = vpop.xlane.xlu1 %2271 }
 0x98f   : > { %v2273_v63 = vsub.f32 %v2269_v47, %v2272_v62  ;;  %v2815_v62 = vld [vmem:[%s4178_s18 + $0x8] sm:$0xff] }
 0x991   : > { %v2274_v0 = vmul.f32 1.442695, %v2273_v63 }
 0x992   : > { %v2439_v1 = vpop.xlane.xlu0 %2438  ;;  %v2283_v17 = vpop.permute.xlu1 %2282 }
 0x993   : > { %3574 = vpow2.f32 %v2274_v0  ;;  %v2440_v2 = vsub.f32 %v2436_v51, %v2439_v1  ;;  %v2817_v0 = vld [vmem:[%s4178_s18 + $0x18] sm:$0xff] }
 0x995   : > { %v2441_v4 = vmul.f32 1.442695, %v2440_v2  ;;  %v2819_v2 = vld [vmem:[%s4180_s20] sm:$0xff] }
 0x996   : > { %v2605_v5 = vpop.xlane.xlu0 %2604 }
 0x997   : > { %3576 = vpow2.f32 %v2441_v4  ;;  %v2606_v7 = vsub.f32 %v2602_v55, %v2605_v5  ;;  %v2820_v4 = vld [vmem:[%s4180_s20 + $0x8] sm:$0xff]  ;;  %v2821_v5 = vld [vmem:[%s4180_s20 + $0x10] sm:$0xff] }
 0x999   : > { %v2607_v8 = vmul.f32 1.442695, %v2606_v7  ;;  %v3513_v7 = vpack.c.bf16 %v2820_v4, %v2819_v2 }
 0x99b   : > { %3578 = vpow2.f32 %v2607_v8  ;;  %v2822_v8 = vld [vmem:[%s4180_s20 + $0x18] sm:$0xff] }
 0x99d   : > { %v3575_v9 = vpop.eup %3574 }
 0x99e   : > { %v2276_v11 = vsel %vm1000_vm2, %v3575_v9, 0.0 }
 0x99f   : > { %2277 = vadd.xlane.f32.xlu0 %v2276_v11  ;;  %v2823_v11 = vld [vmem:[%s4180_s20 + $0x20] sm:$0xff] }
 0x9a1   : > { %v3577_v12 = vpop.eup %3576 }
 0x9a2   : > { %v2443_v13 = vsel %vm1000_vm2, %v3577_v12, 0.0 }
 0x9a3   : > { %2444 = vadd.xlane.f32.xlu1 %v2443_v13 }
 0x9a5   : > { %v3579_v14 = vpop.eup %3578 }
 0x9a6   : > { %v2609_v16 = vsel %vm1000_vm2, %v3579_v14, 0.0 }
 0x9a7   : > { %2610 = vadd.xlane.f32.xlu0 %v2609_v16  ;;  %v2826_v16 = vld [vmem:[%s4180_s20 + $0x38] sm:$0xff] }
 0x9b4   : > { %2614 = vrot.lane.b32.xlu1 %v2019_v44, %s4220_s27 }
 0x9bd   : > { %2448 = vrot.lane.b32.xlu0 %v2019_v44, %s4219_s1 }
 0x9c3   : > { %v2115_v18 = vpop.xlane.xlu1 %2114 }
 0x9c4   : > { %3580 = vrcp.f32 %v2115_v18  ;;  %v2827_v18 = vld [vmem:[%s4180_s20 + $0x40] sm:$0xff] }
 0x9ce   : > { %v3581_v19 = vpop.eup %3580 }
 0x9cf   : > { %v2117_v20 = vmul.f32 %v3581_v19, %v3573_v60  ;;  %v2828_v19 = vld [vmem:[%s4180_s20 + $0x48] sm:$0xff] }
 0x9d1   : > { %3369 = vmatmul.mubr.msk.f32.vlgmr.msra.gmra.mrb[20].mxu1 %vm1000_vm2, %v2117_v20  ;;  %v3525_v20 = vpack.c.bf16 %v2828_v19, %v2827_v18 }
 0x9d2   : > { %3377 = vmatpush3.msra.mxu1 %v2283_v17  ;;  %3378 = vmatprep.mubr.msk.f32.mxu1 %vm3601_vm0, %v3602_v6 }
 0x9d3   : > { %3386 = vmatprep.subr.mxu1 %v3602_v6 }
 0xa2c   : > { %v2278_v21 = vpop.xlane.xlu0 %2277 }
 0xa2d   : > { %3582 = vrcp.f32 %v2278_v21  ;;  %v2829_v21 = vld [vmem:[%s4180_s20 + $0x50] sm:$0xff] }
 0xa30   : > { %v2445_v22 = vpop.xlane.xlu1 %2444 }
 0xa31   : > { %3584 = vrcp.f32 %v2445_v22  ;;  %v2830_v22 = vld [vmem:[%s4180_s20 + $0x58] sm:$0xff] }
 0xa34   : > { %v2611_v23 = vpop.xlane.xlu0 %2610  ;;  %v2615_v29 = vpop.permute.xlu1 %2614 }
 0xa35   : > { %3586 = vrcp.f32 %v2611_v23  ;;  %v3528_v23 = vpack.c.bf16 %v2830_v22, %v2829_v21 }
 0xa37   : > { %v3583_v24 = vpop.eup %3582 }
 0xa38   : > { %v2280_v25 = vmul.f32 %v3583_v24, %v3575_v9  ;;  %v2449_v26 = vpop.permute.xlu0 %2448  ;;  %v3516_v9 = vpack.c.bf16 %v2822_v8, %v2821_v5  ;;  %v2831_v24 = vld [vmem:[%s4180_s20 + $0x60] sm:$0xff] }
 0xa3a   : > { %3379 = vmatmul.mubr.msk.f32.vlgmr.msra.gmra.mrb[22].mxu1 %vm1000_vm2, %v2280_v25  ;;  %v2832_v25 = vld [vmem:[%s4180_s20 + $0x68] sm:$0xff] }
 0xa3b   : > { %v3585_v27 = vpop.eup %3584  ;;  %3387 = vmatpush3.msra.mxu1 %v2449_v26  ;;  %3388 = vmatprep.mubr.msk.f32.mxu1 %vm3601_vm0, %v3602_v6  ;;  %v3531_v26 = vpack.c.bf16 %v2832_v25, %v2831_v24 }
 0xa3c   : > { %v2447_v28 = vmul.f32 %v3585_v27, %v3577_v12  ;;  %3396 = vmatprep.subr.mxu1 %v3602_v6  ;;  %v2824_v12 = vld [vmem:[%s4180_s20 + $0x28] sm:$0xff] }
 0xa3d   : > { %v3519_v13 = vpack.c.bf16 %v2824_v12, %v2823_v11 }
 0xa3e   : > { %3389 = vmatmul.mubr.msk.f32.vlgmr.msra.gmra.mrb[24].mxu1 %vm1000_vm2, %v2447_v28 }
 0xa3f   : > { %v3587_v30 = vpop.eup %3586  ;;  %3397 = vmatpush3.msra.mxu1 %v2615_v29  ;;  %3398 = vmatprep.mubr.msk.f32.mxu1 %vm3601_vm0, %v3602_v6 }
 0xa40   : > { %v2613_v31 = vmul.f32 %v3587_v30, %v3579_v14  ;;  %3506 = vmatprep.subr.bf16.mxu1 %v3600_v3  ;;  %v2825_v14 = vld [vmem:[%s4180_s20 + $0x30] sm:$0xff] }
 0xa41   : > { %v3522_v17 = vpack.c.bf16 %v2826_v16, %v2825_v14 }
 0xa42   : > { %3399 = vmatmul.mubr.msk.f32.vlgmr.msra.gmra.mrb[26].mxu1 %vm1000_vm2, %v2613_v31  ;;  %v3141_v31 = vld [vmem:[%s4176_s16] ss:$0 sm:$0xff] }
 0xa43   : > { %3420 = vmatprep.mubr.msk.f32.mxu1 %vm3601_vm0, %v3602_v6 }
 0xaa4   : > { %v2187_v32 = vpop.f32.mrb[20].mxu1 }
 0xaa5   : > { %v3370_v33 = vpop.f32.mrb[21].mxu1 }
 0xaa6   : > { %v3142_v33 = vld [vmem:[%s4177_s17] ss:$0 sm:$0xff] }
 0xb0d   : > { %v2354_v40 = vpop.f32.mrb[22].mxu1 }
 0xb0e   : > { %2691 = vrot.lane.b32.xlu1 %v2354_v40, %s4222_s30  ;;  %v3380_v41 = vpop.f32.mrb[23].mxu1 }
 0xb11   : > { %v2520_v42 = vpop.f32.mrb[24].mxu1 }
 0xb12   : > { %2695 = vrot.lane.b32.xlu0 %v2520_v42, %s4223_s2  ;;  %v3390_v43 = vpop.f32.mrb[25].mxu1 }
 0xb13   : > { %v3145_v43 = vld [vmem:[%s4181_s21] ss:$0 sm:$0xff] }
 0xb15   : > { %v2686_v44 = vpop.f32.mrb[26].mxu1 }
 0xb16   : > { %2699 = vrot.lane.b32.xlu1 %v2686_v44, %s4224_s4  ;;  %v3400_v45 = vpop.f32.mrb[27].mxu1 }
 0xb80   : > { %v2692_v46 = vpop.permute.xlu1 %2691 }
 0xb81   : > { %v2702_v48 = vsel %vm1000_vm2, %v2187_v32, %v2692_v46 }
 0xb84   : > { %v2696_v47 = vpop.permute.xlu0 %2695 }
 0xb85   : > { %v2703_v49 = vsel %vm1674_vm4, %v2702_v48, %v2696_v47 }
 0xb88   : > { %v2700_v50 = vpop.permute.xlu1 %2699 }
 0xb89   : > { %v2704_v51 = vsel %vm1676_vm5, %v2703_v49, %v2700_v50 }
 0xb8a   : > { %3410 = vmatmul.mubr.msk.f32.vlgmr.msra.gmra.mrb[18].mxu0 %vm784_vm1, %v2704_v51 }
 0xb8b   : > { %3455 = vmatprep.mubr.msk.f32.mxu0 %vm3601_vm0, %v3602_v6  ;;  %v2814_v6 = vld [vmem:[%s4178_s18] sm:$0xff]  ;;  %3514 = vmatpush3.bf16.msra.mxu0 %v3513_v7 }
 0xb8c   : > { %v3507_v63 = vpack.c.bf16 %v2815_v62, %v2814_v6  ;;  %3515 = vmatprep.subr.bf16.mxu0 %v3600_v3 }
 0xb8e   : > { %3508 = vmatpush3.bf16.msra.mxu1 %v3507_v63 }
 0xb8f   : > { %3509 = vmatprep.subr.bf16.mxu1 %v3600_v3  ;;  %3517 = vmatpush3.bf16.msra.mxu0 %v3516_v9 }
 0xb90   : > { %3518 = vmatprep.subr.bf16.mxu0 %v3600_v3 }
 0xb93   : > { %3520 = vmatpush3.bf16.msra.mxu0 %v3519_v13 }
 0xb94   : > { %3521 = vmatprep.subr.bf16.mxu0 %v3600_v3 }
 0xb97   : > { %3523 = vmatpush3.bf16.msra.mxu0 %v3522_v17 }
 0xb98   : > { %3524 = vmatprep.subr.bf16.mxu0 %v3600_v3 }
 0xb9b   : > { %3526 = vmatpush3.bf16.msra.mxu0 %v3525_v20 }
 0xb9c   : > { %3527 = vmatprep.subr.bf16.mxu0 %v3600_v3 }
 0xb9f   : > { %3529 = vmatpush3.bf16.msra.mxu0 %v3528_v23 }
 0xba0   : > { %3530 = vmatprep.subr.bf16.mxu0 %v3600_v3 }
 0xba3   : > { %3532 = vmatpush3.bf16.msra.mxu0 %v3531_v26 }
 0xba4   : > { %3533 = vmatprep.subr.bf16.mxu0 %v3600_v3  ;;  %v2833_v3 = vld [vmem:[%s4180_s20 + $0x70] sm:$0xff] }
 0xba5   : > { %v3534_v37 = vpack.c.bf16 %v2834_v36, %v2833_v3 }
 0xba7   : > { %3535 = vmatpush3.bf16.msra.mxu0 %v3534_v37 }
 0xc5d   : > { %v2780_v53 = vpop.f32.mrb[18].mxu0 }
 0xc5e   : > { %v2781_v54 = vadd.f32 %v3139_v52, %v2780_v53  ;;  %v3411_v55 = vpop.f32.mrb[19].mxu0 }
 0xc60   : > { %v2786_v56 = vadd.f32 %v2781_v54, %v3950_v15  ;;  %v2816_v15 = vld [vmem:[%s4178_s18 + $0x10] sm:$0xff] }
 0xc61   : > { %v3510_v1 = vpack.c.bf16 %v2817_v0, %v2816_v15 }
 0xc62   : > { %v2787_v57 = vsel %vm784_vm1, %v2786_v56, 0.0 }
 0xc63   : > { %2788 = vadd.xlane.f32.xlu0 %v2787_v57  ;;  %3511 = vmatpush3.bf16.msra.mxu1 %v3510_v1 }
 0xcf0   : > { %v2789_v10 = vpop.xlane.xlu0 %2788 }
 0xcf1   : > { %v2790_v58 = vmul.f32 0.03125, %v2789_v10  ;;  %v3146_v10 = vld [vmem:[%s4182_s22] ss:$0 sm:$0xff] }
 0xcf3   : > { %v2791_v59 = vsub.f32 %v2786_v56, %v2790_v58 }
 0xcf5   : > { %v2792_v60 = vmul.f32 %v2791_v59, %v2791_v59 }
 0xcf7   : > { %v2793_v61 = vsel %vm784_vm1, %v2792_v60, 0.0 }
 0xcf8   : > { %2794 = vadd.xlane.f32.xlu1 %v2793_v61 }
 0xd85   : > { %v2795_v27 = vpop.xlane.xlu1 %2794 }
 0xd86   : > { %v2796_v28 = vmul.f32 0.03125, %v2795_v27 }
 0xd88   : > { %v2797_v29 = vadd.f32 1e-05, %v2796_v28 }
 0xd8a   : > { %3588 = vrsqrt.f32 %v2797_v29 }
 0xd94   : > { %v3589_v30 = vpop.eup %3588 }
 0xd95   : > { %v2799_v32 = vmul.f32 %v3589_v30, %v2791_v59  ;;  %v3147_v59 = vld [vmem:[%s4183_s23] ss:$0 sm:$0xff] }
 0xd97   : > { %v2806_v34 = vmul.f32 %v3141_v31, %v2799_v32 }
 0xd99   : > { %v2813_v35 = vadd.f32 %v3142_v33, %v2806_v34 }
 0xd9b   : > { %3421 = vmatmul.mubr.msk.f32.vlgmr.msra.gmra.mrb[28].mxu1 %vm784_vm1, %v2813_v35 }
 0xe6e   : > { %v2911_v39 = vpop.f32.mrb[28].mxu1 }
 0xe6f   : > { %v2912_v40 = vadd.f32 %v3143_v38, %v2911_v39  ;;  %v3422_v41 = vpop.f32.mrb[29].mxu1 }
 0xe71   : > { %v2915_v42 = vmax.f32 %v2912_v40, 0.0 }
 0xe73   : > { %3456 = vmatmul.mubr.f32.vlgmr.msra.gmra.mrb[20].mxu0 %v2915_v42 }
 0xf46   : > { %v2988_v44 = vpop.f32.mrb[20].mxu0 }
 0xf47   : > { %v2989_v45 = vadd.f32 %v3145_v43, %v2988_v44  ;;  %v3457_v46 = vpop.f32.mrb[21].mxu0 }
 0xf49   : > { %v2994_v47 = vadd.f32 %v2989_v45, %v2813_v35 }
 0xf4b   : > { %v2995_v48 = vsel %vm784_vm1, %v2994_v47, 0.0 }
 0xf4c   : > { %2996 = vadd.xlane.f32.xlu0 %v2995_v48 }
 0xfd9   : > { %v2997_v49 = vpop.xlane.xlu0 %2996 }
 0xfda   : > { %v2998_v50 = vmul.f32 0.03125, %v2997_v49 }
 0xfdc   : > { %v2999_v51 = vsub.f32 %v2994_v47, %v2998_v50 }
 0xfde   : > { %v3000_v52 = vmul.f32 %v2999_v51, %v2999_v51 }
 0xfe0   : > { %v3001_v53 = vsel %vm784_vm1, %v3000_v52, 0.0 }
 0xfe1   : > { %3002 = vadd.xlane.f32.xlu0 %v3001_v53 }
0x106e   : > { %v3003_v54 = vpop.xlane.xlu0 %3002 }
0x106f   : > { %v3004_v55 = vmul.f32 0.03125, %v3003_v54 }
0x1071   : > { %v3005_v56 = vadd.f32 1e-05, %v3004_v55 }
0x1073   : > { %3590 = vrsqrt.f32 %v3005_v56 }
0x107d   : > { %v3591_v57 = vpop.eup %3590 }
0x107e   : > { %v3007_v58 = vmul.f32 %v3591_v57, %v2999_v51 }
0x1080   : > { %v3014_v60 = vmul.f32 %v3146_v10, %v3007_v58 }
0x1082   : > { %v3021_v61 = vadd.f32 %v3147_v59, %v3014_v60 }
0x1084   : > { %3022 = vst.msk [vmem:[%s763_s7] sm:$0xff] %vm784_vm1, %v3021_v61 }
0x1085 PF: > { %s34_s5 = sadd.s32 1, %s3598_s5  }
0x1086   : > { %p31_p4 = scmp.ge.s32.totalorder %s34_s5, 4  }
0x1088   :  { %33 = sbr.rel (!%p31_p4) target bundleno = 10 (0xa), region = 152 }

// kernel: transformer_fwd.6
= control target key start
LH: loop header
LB: loop body
LE: loop exit
PB: predicated region body
PF: predicated region fallthrough
CT: control target
= control target key end

     0   :  { %s4267_s0 = inlined_call_operand.vmem [shape: f32[2,8,32], index: 0, kind: input, shape index: {}]   ;;  %s4268_s1 = inlined_call_operand.vmem [shape: f32[2,8,32], index: 1, kind: input, shape index: {}]   ;;  %s4269_s2 = inlined_call_operand.vmem [shape: f32[1,8,8], index: 2, kind: input, shape index: {}]   ;;  %s4270_s3 = inlined_call_operand.vmem [shape: f32[2,1,8], index: 3, kind: input, shape index: {}]   ;;  %s4271_s4 = inlined_call_operand.vmem [shape: f32[32,32], index: 4, kind: input, shape index: {}]   ;;  %s4272_s5 = inlined_call_operand.vmem [shape: f32[32,32], index: 5, kind: input, shape index: {}]   ;;  %s4273_s6 = inlined_call_operand.vmem [shape: f32[32,32], index: 6, kind: input, shape index: {}]   ;;  %s4274_s7 = inlined_call_operand.vmem [shape: f32[32,32], index: 7, kind: input, shape index: {}]   ;;  %s4275_s8 = inlined_call_operand.vmem [shape: f32[1,32], index: 8, kind: input, shape index: {}]   ;;  %s4276_s9 = inlined_call_operand.vmem [shape: f32[1,32], index: 9, kind: input, shape index: {}]   ;;  %s4277_s10 = inlined_call_operand.vmem [shape: f32[1,32], index: 10, kind: input, shape index: {}]   ;;  %s4278_s11 = inlined_call_operand.vmem [shape: f32[32,32], index: 11, kind: input, shape index: {}]   ;;  %s4279_s12 = inlined_call_operand.vmem [shape: f32[32,32], index: 12, kind: input, shape index: {}]   ;;  %s4280_s13 = inlined_call_operand.vmem [shape: f32[32,32], index: 13, kind: input, shape index: {}]   ;;  %s4281_s14 = inlined_call_operand.vmem [shape: f32[32,32], index: 14, kind: input, shape index: {}]   ;;  %s4282_s15 = inlined_call_operand.vmem [shape: f32[1,32], index: 15, kind: input, shape index: {}]   ;;  %s4283_s16 = inlined_call_operand.vmem [shape: f32[1,32], index: 16, kind: input, shape index: {}]   ;;  %s4284_s17 = inlined_call_operand.vmem [shape: f32[1,32], index: 17, kind: input, shape index: {}]   ;;  %s4285_s18 = inlined_call_operand.vmem [shape: f32[32,128], index: 18, kind: input, shape index: {}]   ;;  %s4286_s19 = inlined_call_operand.vmem [shape: f32[1,128], index: 19, kind: input, shape index: {}]   ;;  %s4287_s20 = inlined_call_operand.vmem [shape: f32[128,32], index: 20, kind: input, shape index: {}]   ;;  %s4288_s21 = inlined_call_operand.vmem [shape: f32[1,32], index: 21, kind: input, shape index: {}]   ;;  %s4289_s22 = inlined_call_operand.vmem [shape: f32[1,32], index: 22, kind: input, shape index: {}]   ;;  %s4290_s23 = inlined_call_operand.hbm [shape: f32[1,32], index: 23, kind: input, shape index: {}]   ;;  %s4291_s24 = inlined_call_operand.vmem [shape: f32[2,8,32], index: 24, kind: output, shape index: {}]  }
   0x1   :  { %4310 = sst [smem:[#allocation5_spill]] %s4267_s0 }
   0x2   :  { %4311 = sst [smem:[#allocation6_spill]] %s4268_s1 }
   0x3   :  { %4312 = sst [smem:[#allocation7_spill]] %s4269_s2 }
   0x4   :  { %4313 = sst [smem:[#allocation8_spill]] %s4270_s3 }
   0x5   :  { %4314 = sst [smem:[#allocation9_spill]] %s4271_s4 }
   0x6   :  { %4315 = sst [smem:[#allocation10_spill]] %s4272_s5 }
   0x7   :  { %4316 = sst [smem:[#allocation11_spill]] %s4273_s6 }
   0x8   :  { %4317 = sst [smem:[#allocation12_spill]] %s4274_s7 }
   0x9   :  { %4318 = sst [smem:[#allocation13_spill]] %s4275_s8 }
   0xa   :  { %29 = vsyncpa [#allocation3], 0  ;;  %s3806_s5 = smov 0  }
   0xb LB: > { %s3812_s26 = sadd.s32 4294967295, %s3668_s5   ;;  %p3124_p0 = scmp.ge.s32.totalorder %s3668_s5, 1  ;;  %s3668_s5 = sphi %s3806_s5, %s35_s5  }
   0xc   : > { %p585_p1 = scmp.lt.s32.totalorder %s3668_s5, 3  ;;  %p4296_p3 = scmp.eq.s32.totalorder %s3812_s26, 0 }
   0xd   : > { %s3670_s28 = smov [#allocation2]   ;;  %s3630_s7 = scalar_lea.hbm %s4290_s23, 16 }
   0xe   : > { %p3816_p2 = pnand %p3124_p0, %p585_p1  ;;  %s658_s6 = sshll.u32 %s3670_s28, 4  ;;  %s659_s6 = int_to_ptr.vmem [resolvable:$true] %s658_s6 }
   0xf   : > { %p3631_p6 = scmp.ne.s32.totalorder %s4290_s23, %s3630_s7  ;;  %p3637_p10 = scmp.lt.u32.totalorder %s3630_s7, %s4290_s23 }
  0x10   : > { %s4319_s27 = scalar_select %p3816_p2, 1, 0 }
  0x11   : > { %p3567_p4 = pneg %p3816_p2 }
  0x13   : > { %p3825_p5 = pnand %p4296_p3, %p3567_p4 }
  0x15   : > { %p3632_p7 = pneg %p3825_p5 }
  0x17   : > { %p3633_p8 = pnand %p3632_p7, %p3631_p6 }
  0x19   : > { %p3634_p9 = pneg %p3633_p8 }
  0x1b   : > { %p3639_p11 = pnand %p3637_p10, %p3634_p9 }
  0x1d   : > { %3642 = shalt.err (!%p3639_p11)
}
  0x1e   : > { %s3643_s4 = scalar_lea.vmem %s659_s6, 16  ;;  %s3650_s1 = scalar_lea.vmem %s659_s6, 32 }
  0x1f   : > { %p3644_p12 = scmp.ne.s32.totalorder %s659_s6, %s3643_s4  ;;  %p3651_p1 = scmp.lt.s32.totalorder %s659_s6, %s659_s6 }
  0x20   : > { %p3652_p4 = scmp.lt.s32.totalorder %s3650_s1, %s3643_s4 }
  0x21   : > { %p3646_p13 = pnand %p3644_p12, %p3632_p7 }
  0x22   : > { %p3653_p3 = por %p3652_p4, %p3651_p1 }
  0x23   : > { %p3647_p0 = pneg %p3646_p13 }
  0x25   : > { %p3654_p2 = pnand %p3653_p3, %p3647_p0 }
  0x27   : > { %3657 = shalt.err (!%p3654_p2)
}
  0x28   : > { %3570 = dma.hbm_to_vmem [thread:$0]  (!%p3825_p5), %s4290_s23, 16, %s659_s6, [#allocation3]  }
  0x29   : > { %p4321_p6 = scmp.ne.s32.totalorder %s4319_s27, 0 }
  0x2a   : > { %p4322_p8 = scmp.eq.s32.totalorder (!%p4321_p6), %s3812_s26, 0 }
  0x2b   : > { %691 = sbr.rel (%p4321_p6) target bundleno = 4266 (0x10aa), region = 116 }
  0x32   : > { %3663 = dma.done.wait (%p4322_p8), [#allocation3], 16   ;;  %p4323_p7 = pmov %p4322_p8 }
  0x33   : > { %p762_p9 = scmp.lt.s32.totalorder %s3812_s26, 1  ;;  %v3671_v0 = vmov 0.0|0.0   ;;  %vm3672_vm0 = vmmov 0   ;;  %v3673_v1 = vmov 0.0   ;;  %s4324_s2 = sld [smem:[#allocation9_spill]]  ;;  %vm797_vm1 = vcmask 261120  }
  0x34   : > { %3665 = vsyncadd (%p4323_p7), [#allocation3], 4294967280  ;;  %3485 = vmatprep.subr.bf16.mxu1 %v3671_v0  ;;  %3279 = vmatprep.mubr.msk.f32.mxu1 %vm3672_vm0, %v3673_v1  ;;  %s4325_s29 = sld [smem:[#allocation5_spill]]  ;;  %s4326_s7 = sld [smem:[#allocation10_spill]]  ;;  %vm1013_vm2 = vcmask 64512   ;;  %vm1687_vm4 = vcmask 130048  }
  0x35   : > { %3314 = vmatprep.subr.mxu0 %v3673_v1  ;;  %3316 = vmatprep.mubr.msk.f32.mxu0 %vm3672_vm0, %v3673_v1  ;;  %s4340_s26 = smov (!%p762_p9, %s3812_s26), 1  ;;  %s4327_s6 = sld [smem:[#allocation11_spill]]  ;;  %vm1689_vm5 = vcmask 195584  }
  0x36   : > { %s3874_s4 = sshll.u32 %s4340_s26, 3  ;;  %s4300_s28 = smov 112  }
  0x37   : > { %s4328_s3 = sld [smem:[#allocation7_spill]]  ;;  %s4329_s1 = sld [smem:[#allocation12_spill]] }
  0x38   : > { %s4306_s25 = smov 8   ;;  %s4305_s8 = smov 16  }
  0x39   : > { %v780_v2 = vld [vmem:[%s4324_s2] sm:$0xff]  ;;  %v781_v3 = vld [vmem:[%s4324_s2 + $0x8] sm:$0xff]  ;;  %v782_v4 = vld [vmem:[%s4324_s2 + $0x10] sm:$0xff]  ;;  %s4330_s0 = sld [smem:[#allocation13_spill]] }
  0x3a   : > { %v3486_v5 = vpack.c.bf16 %v781_v3, %v780_v2  ;;  %v783_v6 = vld [vmem:[%s4324_s2 + $0x18] sm:$0xff]  ;;  %s765_s27 = scalar_lea.vmem %s4325_s29, %s3874_s4  ;;  %v784_v8 = vld [vmem:[%s4326_s7] sm:$0xff]  ;;  %v785_v9 = vld [vmem:[%s4326_s7 + $0x8] sm:$0xff]  ;;  %s4302_s29 = smov 120  }
  0x3b   : > { %v3489_v7 = vpack.c.bf16 %v783_v6, %v782_v4  ;;  %v3887_v10 = vld [vmem:[%s765_s27] sm:$0xff]  ;;  %v3492_v11 = vpack.c.bf16 %v785_v9, %v784_v8  ;;  %v786_v12 = vld [vmem:[%s4326_s7 + $0x10] sm:$0xff]  ;;  %v787_v13 = vld [vmem:[%s4326_s7 + $0x18] sm:$0xff]  ;;  %s4298_s27 = smov 104  }
  0x3c   : > { %3487 = vmatpush3.bf16.msra.mxu1 %v3486_v5  ;;  %v3495_v14 = vpack.c.bf16 %v787_v13, %v786_v12  ;;  %v788_v15 = vld [vmem:[%s4327_s6] sm:$0xff]  ;;  %v789_v16 = vld [vmem:[%s4327_s6 + $0x8] sm:$0xff]  ;;  %v790_v18 = vld [vmem:[%s4327_s6 + $0x10] sm:$0xff] }
  0x3d   : > { %3488 = vmatprep.subr.bf16.mxu1 %v3671_v0  ;;  %v3498_v17 = vpack.c.bf16 %v789_v16, %v788_v15  ;;  %v791_v19 = vld [vmem:[%s4327_s6 + $0x18] sm:$0xff]  ;;  %v779_v34 = vld [vmem:[%s4328_s3] sm:$0xff] }
  0x3e   : > { %v3501_v20 = vpack.c.bf16 %v791_v19, %v790_v18  ;;  %vm1012_vm3 = vcmp.eq.f32.partialorder %v779_v34, 0.0 }
  0x40   : > { %3490 = vmatpush3.bf16.msra.mxu1 %v3489_v7 }
  0x41   : > { %3491 = vmatprep.subr.bf16.mxu1 %v3671_v0 }
  0x43   : > { %3280 = vmatmul.mubr.msk.f32.vlgmr.msra.gmra.mrb[0].mxu1 %vm797_vm1, %v3887_v10 }
  0x44   : > { %3493 = vmatpush3.bf16.msra.mxu1 %v3492_v11  ;;  %3290 = vmatprep.mubr.msk.f32.mxu1 %vm3672_vm0, %v3673_v1 }
  0x45   : > { %3494 = vmatprep.subr.bf16.mxu1 %v3671_v0 }
  0x48   : > { %3496 = vmatpush3.bf16.msra.mxu1 %v3495_v14 }
  0x49   : > { %3497 = vmatprep.subr.bf16.mxu1 %v3671_v0 }
  0x4b   : > { %3291 = vmatmul.mubr.msk.f32.vlgmr.msra.gmra.mrb[2].mxu1 %vm797_vm1, %v3887_v10 }
  0x4c   : > { %3499 = vmatpush3.bf16.msra.mxu1 %v3498_v17  ;;  %3301 = vmatprep.mubr.msk.f32.mxu1 %vm3672_vm0, %v3673_v1 }
  0x4d   : > { %3500 = vmatprep.subr.bf16.mxu1 %v3671_v0 }
  0x50   : > { %3502 = vmatpush3.bf16.msra.mxu1 %v3501_v20 }
  0x51   : > { %3304 = vmatprep.subr.mxu1 %v3673_v1 }
  0x53   : > { %3302 = vmatmul.mubr.msk.f32.vlgmr.msra.gmra.mrb[4].mxu1 %vm797_vm1, %v3887_v10 }
  0x54   : > { %3306 = vmatprep.mubr.msk.f32.mxu1 %vm3672_vm0, %v3673_v1 }
 0x116   : > { %v867_v21 = vpop.f32.mrb[0].mxu1 }
 0x117   : > { %v3281_v22 = vpop.f32.mrb[1].mxu1  ;;  %v871_v25 = vmul.f32 0.17677669, %v867_v21 }
 0x11e   : > { %v938_v23 = vpop.f32.mrb[2].mxu1 }
 0x11f   : > { %1344 = vrot.lane.b32.xlu1 %v938_v23, %s4300_s28  ;;  %1177 = vrot.lane.b32.xlu0 %v938_v23, %s4302_s29  ;;  %v3292_v24 = vpop.f32.mrb[3].mxu1 }
 0x120   : > { %3305 = vmatpush3.xpose.msk.msra.mxu1 %vm1013_vm2, %v938_v23 }
 0x121   : > { %3309 = vmatprep.subr.mxu1 %v3673_v1 }
 0x123   : > { %3307 = vmatmul.mubr.msk.f32.vlgmr.msra.gmra.mrb[6].mxu1 %vm1013_vm2, %v871_v25  ;;  %1342 = vrot.lane.b32.xlu1 %v871_v25, %s4300_s28 }
 0x124   : > { %1175 = vrot.lane.b32.xlu0 %v871_v25, %s4302_s29  ;;  %3311 = vmatprep.mubr.msk.f32.mxu1 %vm3672_vm0, %v3673_v1 }
 0x126   : > { %v3935_v26 = vpop.f32.mrb[4].mxu1 }
 0x127   : > { %1508 = vrot.lane.b32.xlu1 %v871_v25, %s4298_s27  ;;  %v3303_v27 = vpop.f32.mrb[5].mxu1  ;;  %3310 = vmatpush3.msra.mxu1 %v3935_v26 }
 0x128   : > { %1510 = vrot.lane.b32.xlu0 %v938_v23, %s4298_s27  ;;  %3319 = vmatprep.subr.mxu1 %v3673_v1  ;;  %v792_v27 = vld [vmem:[%s4329_s1] sm:$0xff] }
 0x191   : > { %v1178_v28 = vpop.permute.xlu0 %1177  ;;  %v1345_v29 = vpop.permute.xlu1 %1344 }
 0x192   : > { %3315 = vmatpush3.xpose.msk.msra.mxu0 %vm1013_vm2, %v1178_v28  ;;  %v793_v28 = vld [vmem:[%s4329_s1 + $0x8] sm:$0xff] }
 0x193   : > { %3324 = vmatprep.subr.mxu0 %v3673_v1 }
 0x195   : > { %v1343_v31 = vpop.permute.xlu1 %1342 }
 0x196   : > { %v1176_v30 = vpop.permute.xlu0 %1175 }
 0x197   : > { %3317 = vmatmul.mubr.msk.f32.vlgmr.msra.gmra.mrb[0].mxu0 %vm1013_vm2, %v1176_v30  ;;  %v794_v30 = vld [vmem:[%s4329_s1 + $0x10] sm:$0xff] }
 0x198   : > { %3325 = vmatpush3.xpose.msk.msra.mxu0 %vm1013_vm2, %v1345_v29  ;;  %3326 = vmatprep.mubr.msk.f32.mxu0 %vm3672_vm0, %v3673_v1  ;;  %v3504_v29 = vpack.c.bf16 %v793_v28, %v792_v27 }
 0x199   : > { %3334 = vmatprep.subr.mxu0 %v3673_v1  ;;  %v1509_v33 = vpop.permute.xlu1 %1508 }
 0x19a   : > { %v1511_v32 = vpop.permute.xlu0 %1510 }
 0x19b   : > { %3327 = vmatmul.mubr.msk.f32.vlgmr.msra.gmra.mrb[2].mxu0 %vm1013_vm2, %v1343_v31  ;;  %v795_v31 = vld [vmem:[%s4329_s1 + $0x18] sm:$0xff]  ;;  %s4331_s1 = sld [smem:[#allocation6_spill]] }
 0x19c   : > { %3335 = vmatpush3.xpose.msk.msra.mxu0 %vm1013_vm2, %v1511_v32  ;;  %3336 = vmatprep.mubr.msk.f32.mxu0 %vm3672_vm0, %v3673_v1  ;;  %v3507_v32 = vpack.c.bf16 %v795_v31, %v794_v30 }
 0x19d   : > { %3503 = vmatprep.subr.bf16.mxu0 %v3671_v0 }
 0x19f   : > { %3337 = vmatmul.mubr.msk.f32.vlgmr.msra.gmra.mrb[4].mxu0 %vm1013_vm2, %v1509_v33 }
 0x1a0   : > { %3352 = vmatprep.mubr.msk.f32.mxu0 %vm3672_vm0, %v3673_v1  ;;  %3505 = vmatpush3.bf16.msra.mxu0 %v3504_v29 }
 0x1a1   : > { %3506 = vmatprep.subr.bf16.mxu0 %v3671_v0  ;;  %s769_s2 = scalar_lea.vmem %s4331_s1, %s3874_s4  ;;  %s4337_s1 = smov 16  }
 0x1a4   : > { %3508 = vmatpush3.bf16.msra.mxu0 %v3507_v32 }
 0x1a5   : > { %3515 = vmatprep.subr.bf16.mxu0 %v3671_v0 }
 0x1f6   : > { %v1086_v35 = vpop.f32.mrb[6].mxu1 }
 0x1f7   : > { %v1090_v36 = vsel %vm1012_vm3, -1e+20, %v1086_v35  ;;  %v3308_v37 = vpop.f32.mrb[7].mxu1 }
 0x1f8   : > { %v1091_v38 = vsel %vm1013_vm2, %v1090_v36, -inf }
 0x1f9   : > { %1092 = vmax.xlane.f32.xlu0 %v1091_v38 }
 0x26a   : > { %v1249_v39 = vpop.f32.mrb[0].mxu0 }
 0x26b   : > { %v1253_v40 = vsel %vm1012_vm3, -1e+20, %v1249_v39  ;;  %v3318_v41 = vpop.f32.mrb[1].mxu0 }
 0x26c   : > { %v1254_v42 = vsel %vm1013_vm2, %v1253_v40, -inf }
 0x26d   : > { %1255 = vmax.xlane.f32.xlu1 %v1254_v42 }
 0x26e   : > { %v1416_v43 = vpop.f32.mrb[2].mxu0 }
 0x26f   : > { %v1420_v44 = vsel %vm1012_vm3, -1e+20, %v1416_v43  ;;  %v3328_v45 = vpop.f32.mrb[3].mxu0 }
 0x270   : > { %v1421_v46 = vsel %vm1013_vm2, %v1420_v44, -inf  ;;  %v3147_v45 = vld [vmem:[%s4330_s0] ss:$0 sm:$0xff]  ;;  %s776_s0 = scalar_lea.vmem %s4291_s24, %s3874_s4 }
 0x271   : > { %1422 = vmax.xlane.f32.xlu0 %v1421_v46 }
 0x272   : > { %v1582_v47 = vpop.f32.mrb[4].mxu0 }
 0x273   : > { %v1586_v48 = vsel %vm1012_vm3, -1e+20, %v1582_v47  ;;  %v3338_v49 = vpop.f32.mrb[5].mxu0 }
 0x274   : > { %v1587_v50 = vsel %vm1013_vm2, %v1586_v48, -inf }
 0x275   : > { %1588 = vmax.xlane.f32.xlu0 %v1587_v50 }
 0x27e   : > { %1266 = vrot.lane.b32.xlu1 %v3935_v26, %s4302_s29  ;;  %s4333_s29 = smov 112  }
 0x286   : > { %v1093_v51 = vpop.xlane.xlu0 %1092 }
 0x287   : > { %v1094_v52 = vsub.f32 %v1090_v36, %v1093_v51 }
 0x289   : > { %v1095_v53 = vmul.f32 1.442695, %v1094_v52 }
 0x28b   : > { %3592 = vpow2.f32 %v1095_v53 }
 0x295   : > { %v3593_v54 = vpop.eup %3592 }
 0x296   : > { %v1097_v55 = vsel %vm1013_vm2, %v3593_v54, 0.0 }
 0x2a2   : > { %1098 = vadd.xlane.f32.xlu1 %v1097_v55 }
 0x2fa   : > { %v1256_v56 = vpop.xlane.xlu1 %1255 }
 0x2fb   : > { %v1257_v57 = vsub.f32 %v1253_v40, %v1256_v56  ;;  %v1806_v56 = vld [vmem:[%s4279_s12] sm:$0xff] }
 0x2fd   : > { %v1258_v58 = vmul.f32 1.442695, %v1257_v57  ;;  %v1807_v57 = vld [vmem:[%s4279_s12 + $0x8] sm:$0xff] }
 0x2fe   : > { %v1423_v59 = vpop.xlane.xlu0 %1422  ;;  %v1267_v9 = vpop.permute.xlu1 %1266 }
 0x2ff   : > { %3594 = vpow2.f32 %v1258_v58  ;;  %v1424_v60 = vsub.f32 %v1420_v44, %v1423_v59  ;;  %v1808_v58 = vld [vmem:[%s4279_s12 + $0x10] sm:$0xff]  ;;  %v1809_v59 = vld [vmem:[%s4279_s12 + $0x18] sm:$0xff] }
 0x301   : > { %v1425_v61 = vmul.f32 1.442695, %v1424_v60  ;;  %v3519_v60 = vpack.c.bf16 %v1809_v59, %v1808_v58 }
 0x302   : > { %v1589_v62 = vpop.xlane.xlu0 %1588 }
 0x303   : > { %3596 = vpow2.f32 %v1425_v61  ;;  %v1590_v63 = vsub.f32 %v1586_v48, %v1589_v62  ;;  %v778_v61 = vld [vmem:[%s769_s2] sm:$0xff]  ;;  %s4335_s2 = sld [smem:[#allocation8_spill]] }
 0x304   : > { %v1802_v62 = vld [vmem:[%s4278_s11] sm:$0xff] }
 0x305   : > { %v1591_v2 = vmul.f32 1.442695, %v1590_v63  ;;  %v1803_v63 = vld [vmem:[%s4278_s11 + $0x8] sm:$0xff] }
 0x307   : > { %3598 = vpow2.f32 %v1591_v2  ;;  %v3510_v2 = vpack.c.bf16 %v1803_v63, %v1802_v62 }
 0x309   : > { %v3595_v3 = vpop.eup %3594 }
 0x30a   : > { %v1260_v4 = vsel %vm1013_vm2, %v3595_v3, 0.0 }
 0x30b   : > { %1261 = vadd.xlane.f32.xlu0 %v1260_v4  ;;  %v1805_v4 = vld [vmem:[%s4278_s11 + $0x18] sm:$0xff] }
 0x30d   : > { %v3597_v5 = vpop.eup %3596 }
 0x30e   : > { %v1427_v6 = vsel %vm1013_vm2, %v3597_v5, 0.0 }
 0x30f   : > { %1428 = vadd.xlane.f32.xlu1 %v1427_v6 }
 0x311   : > { %v3599_v7 = vpop.eup %3598 }
 0x312   : > { %v1593_v8 = vsel %vm1013_vm2, %v3599_v7, 0.0 }
 0x313   : > { %1594 = vadd.xlane.f32.xlu0 %v1593_v8 }
 0x320   : > { %1598 = vrot.lane.b32.xlu1 %v3935_v26, %s4298_s27  ;;  %s4304_s27 = smov 24  }
 0x329   : > { %1432 = vrot.lane.b32.xlu0 %v3935_v26, %s4300_s28  ;;  %s4332_s28 = smov 120  }
 0x32f   : > { %v1099_v11 = vpop.xlane.xlu1 %1098 }
 0x330   : > { %3600 = vrcp.f32 %v1099_v11  ;;  %v3149_v11 = vld [vmem:[%s4276_s9] ss:$0 sm:$0xff] }
 0x33a   : > { %v3601_v12 = vpop.eup %3600 }
 0x33b   : > { %v1101_v13 = vmul.f32 %v3601_v12, %v3593_v54 }
 0x33d   : > { %3312 = vmatmul.mubr.msk.f32.vlgmr.msra.gmra.mrb[8].mxu1 %vm1013_vm2, %v1101_v13  ;;  %v3150_v13 = vld [vmem:[%s4277_s10] ss:$0 sm:$0xff] }
 0x33e   : > { %3320 = vmatpush3.msra.mxu1 %v1267_v9  ;;  %3321 = vmatprep.mubr.msk.f32.mxu1 %vm3672_vm0, %v3673_v1 }
 0x33f   : > { %3329 = vmatprep.subr.mxu1 %v3673_v1 }
 0x398   : > { %v1262_v14 = vpop.xlane.xlu0 %1261 }
 0x399   : > { %3602 = vrcp.f32 %v1262_v14 }
 0x39c   : > { %v1429_v15 = vpop.xlane.xlu1 %1428 }
 0x39d   : > { %3604 = vrcp.f32 %v1429_v15 }
 0x3a0   : > { %v1595_v16 = vpop.xlane.xlu0 %1594  ;;  %v1599_v22 = vpop.permute.xlu1 %1598 }
 0x3a1   : > { %3606 = vrcp.f32 %v1595_v16 }
 0x3a3   : > { %v3603_v17 = vpop.eup %3602 }
 0x3a4   : > { %v1264_v18 = vmul.f32 %v3603_v17, %v3595_v3  ;;  %v1433_v19 = vpop.permute.xlu0 %1432  ;;  %v1804_v3 = vld [vmem:[%s4278_s11 + $0x10] sm:$0xff] }
 0x3a6   : > { %3322 = vmatmul.mubr.msk.f32.vlgmr.msra.gmra.mrb[10].mxu1 %vm1013_vm2, %v1264_v18  ;;  %v1810_v18 = vld [vmem:[%s4280_s13] sm:$0xff] }
 0x3a7   : > { %v3605_v20 = vpop.eup %3604  ;;  %3330 = vmatpush3.msra.mxu1 %v1433_v19  ;;  %3331 = vmatprep.mubr.msk.f32.mxu1 %vm3672_vm0, %v3673_v1  ;;  %v1811_v19 = vld [vmem:[%s4280_s13 + $0x8] sm:$0xff] }
 0x3a8   : > { %v1431_v21 = vmul.f32 %v3605_v20, %v3597_v5  ;;  %3339 = vmatprep.subr.mxu1 %v3673_v1  ;;  %v3513_v5 = vpack.c.bf16 %v1805_v4, %v1804_v3  ;;  %v1812_v20 = vld [vmem:[%s4280_s13 + $0x10] sm:$0xff] }
 0x3aa   : > { %3332 = vmatmul.mubr.msk.f32.vlgmr.msra.gmra.mrb[12].mxu1 %vm1013_vm2, %v1431_v21  ;;  %v3522_v21 = vpack.c.bf16 %v1811_v19, %v1810_v18 }
 0x3ab   : > { %v3607_v23 = vpop.eup %3606  ;;  %3340 = vmatpush3.msra.mxu1 %v1599_v22  ;;  %3341 = vmatprep.mubr.msk.f32.mxu1 %vm3672_vm0, %v3673_v1  ;;  %v1813_v22 = vld [vmem:[%s4280_s13 + $0x18] sm:$0xff] }
 0x3ac   : > { %v1597_v24 = vmul.f32 %v3607_v23, %v3599_v7  ;;  %3509 = vmatprep.subr.bf16.mxu1 %v3671_v0 }
 0x3ae   : > { %3342 = vmatmul.mubr.msk.f32.vlgmr.msra.gmra.mrb[14].mxu1 %vm1013_vm2, %v1597_v24 }
 0x3af   : > { %3363 = vmatprep.mubr.msk.f32.mxu1 %vm3672_vm0, %v3673_v1  ;;  %3511 = vmatpush3.bf16.msra.mxu1 %v3510_v2 }
 0x3b0   : > { %3512 = vmatprep.subr.bf16.mxu1 %v3671_v0 }
 0x3b3   : > { %3514 = vmatpush3.bf16.msra.mxu1 %v3513_v5 }
 0x3b4   : > { %3521 = vmatprep.subr.bf16.mxu1 %v3671_v0 }
 0x410   : > { %v1171_v25 = vpop.f32.mrb[8].mxu1 }
 0x411   : > { %v3313_v26 = vpop.f32.mrb[9].mxu1 }
 0x412   : > { %v3525_v26 = vpack.c.bf16 %v1813_v22, %v1812_v20 }
 0x479   : > { %v1338_v33 = vpop.f32.mrb[10].mxu1 }
 0x47a   : > { %1675 = vrot.lane.b32.xlu1 %v1338_v33, %s4306_s25  ;;  %v3323_v34 = vpop.f32.mrb[11].mxu1  ;;  %v2114_v33 = vlaneseq  ;;  %s4336_s25 = smov 8  }
 0x47d   : > { %v1504_v35 = vpop.f32.mrb[12].mxu1 }
 0x47e   : > { %1679 = vrot.lane.b32.xlu0 %v1504_v35, %s4305_s8  ;;  %v3333_v36 = vpop.f32.mrb[13].mxu1  ;;  %s772_s8 = scalar_lea.vmem %s4335_s2, %s4340_s26  ;;  %v2115_v35 = vshrl.u32 %v2114_v33, 7  ;;  %s4338_s2 = smov 24  }
 0x47f   : > { %v1801_v34 = vld [vmem:[%s772_s8] sm:$0x1] }
 0x480   : > { %vm2036_vm6 = vcmp.eq.f32.partialorder %v1801_v34, 0.0  ;;  %v2116_v36 = vsub.s32 0, %v2115_v35  ;;  %v1814_v34 = vld [vmem:[%s4281_s14] sm:$0xff]  ;;  %v1815_v35 = vld [vmem:[%s4281_s14 + $0x8] sm:$0xff] }
 0x481   : > { %v1670_v37 = vpop.f32.mrb[14].mxu1 }
 0x482   : > { %1683 = vrot.lane.b32.xlu1 %v1670_v37, %s4304_s27  ;;  %v3343_v38 = vpop.f32.mrb[15].mxu1  ;;  %s4334_s27 = smov 104   ;;  %v3680_v37 = vmov 0  }
 0x483   : > { %v2113_v38 = vsel %vm2036_vm6, 1, %v3680_v37  ;;  %v1816_v37 = vld [vmem:[%s4281_s14 + $0x10] sm:$0xff] }
 0x4ec   : > { %v1676_v39 = vpop.permute.xlu1 %1675 }
 0x4ed   : > { %v1686_v41 = vsel %vm1013_vm2, %v1171_v25, %v1676_v39  ;;  %v2117_v39 = vrot.slane %v2113_v38, %v2116_v36  ;;  %v3528_v36 = vpack.c.bf16 %v1815_v35, %v1814_v34  ;;  %v1817_v38 = vld [vmem:[%s4281_s14 + $0x18] sm:$0xff] }
 0x4ef   : > { %vm2118_vm7 = vcmp.eq.s32.totalorder %v2117_v39, 1  ;;  %v3531_v39 = vpack.c.bf16 %v1817_v38, %v1816_v37  ;;  %v3170_v38 = vld [vmem:[%s4286_s19] ss:$0 sm:$0xff] }
 0x4f0   : > { %v1680_v40 = vpop.permute.xlu0 %1679 }
 0x4f1   : > { %v1688_v42 = vsel %vm1687_vm4, %v1686_v41, %v1680_v40 }
 0x4f4   : > { %v1684_v43 = vpop.permute.xlu1 %1683 }
 0x4f5   : > { %v1690_v44 = vsel %vm1689_vm5, %v1688_v42, %v1684_v43 }
 0x4f6   : > { %3353 = vmatmul.mubr.msk.f32.vlgmr.msra.gmra.mrb[6].mxu0 %vm797_vm1, %v1690_v44 }
 0x4f7   : > { %3374 = vmatprep.mubr.msk.f32.mxu0 %vm3672_vm0, %v3673_v1 }
 0x5c9   : > { %v1766_v46 = vpop.f32.mrb[6].mxu0 }
 0x5ca   : > { %v1767_v47 = vadd.f32 %v3147_v45, %v1766_v46  ;;  %v3354_v48 = vpop.f32.mrb[7].mxu0 }
 0x5cc   : > { %v1772_v49 = vadd.f32 %v1767_v47, %v3887_v10  ;;  %v3516_v10 = vpack.c.bf16 %v1807_v57, %v1806_v56 }
 0x5ce   : > { %v1773_v50 = vsel %vm797_vm1, %v1772_v49, 0.0  ;;  %3517 = vmatpush3.bf16.msra.mxu0 %v3516_v10 }
 0x5cf   : > { %1774 = vadd.xlane.f32.xlu0 %v1773_v50  ;;  %3518 = vmatprep.subr.bf16.mxu0 %v3671_v0 }
 0x5d2   : > { %3520 = vmatpush3.bf16.msra.mxu0 %v3519_v60 }
 0x5d3   : > { %3388 = vmatprep.subr.mxu0 %v3673_v1 }
 0x5d5   : > { %3375 = vmatmul.mubr.msk.f32.vlgmr.msra.gmra.mrb[8].mxu0 %vm797_vm1, %v778_v61 }
 0x5d6   : > { %3390 = vmatprep.mubr.msk.f32.mxu0 %vm3672_vm0, %v3673_v1 }
 0x65c   : > { %v1775_v51 = vpop.xlane.xlu0 %1774 }
 0x65d   : > { %v1777_v52 = vmul.f32 0.03125, %v1775_v51 }
 0x65f   : > { %v1778_v53 = vsub.f32 %v1772_v49, %v1777_v52 }
 0x661   : > { %v1779_v54 = vmul.f32 %v1778_v53, %v1778_v53 }
 0x663   : > { %v1780_v55 = vsel %vm797_vm1, %v1779_v54, 0.0 }
 0x664   : > { %1781 = vadd.xlane.f32.xlu1 %v1780_v55 }
 0x6a8   : > { %v1962_v16 = vpop.f32.mrb[8].mxu0 }
 0x6a9   : > { %2206 = vrot.lane.b32.xlu0 %v1962_v16, %s4332_s28  ;;  %v3376_v17 = vpop.f32.mrb[9].mxu0  ;;  %3389 = vmatpush3.xpose.msk.msra.mxu0 %vm1013_vm2, %v1962_v16 }
 0x6aa   : > { %3398 = vmatprep.subr.mxu0 %v3673_v1 }
 0x6ad   : > { %2373 = vrot.lane.b32.xlu0 %v1962_v16, %s4333_s29 }
 0x6b1   : > { %2539 = vrot.lane.b32.xlu0 %v1962_v16, %s4334_s27 }
 0x6f1   : > { %v1782_v6 = vpop.xlane.xlu1 %1781 }
 0x6f2   : > { %v1783_v7 = vmul.f32 0.03125, %v1782_v6 }
 0x6f4   : > { %v1784_v8 = vadd.f32 1e-05, %v1783_v7 }
 0x6f6   : > { %3608 = vrsqrt.f32 %v1784_v8 }
 0x700   : > { %v3609_v9 = vpop.eup %3608 }
 0x701   : > { %v1786_v12 = vmul.f32 %v3609_v9, %v1778_v53 }
 0x703   : > { %v1793_v14 = vmul.f32 %v3149_v11, %v1786_v12 }
 0x705   : > { %v4060_v15 = vadd.f32 %v3150_v13, %v1793_v14 }
 0x707   : > { %3364 = vmatmul.mubr.msk.f32.vlgmr.msra.gmra.mrb[16].mxu1 %vm797_vm1, %v4060_v15 }
 0x708   : > { %3385 = vmatprep.mubr.msk.f32.mxu1 %vm3672_vm0, %v3673_v1  ;;  %3523 = vmatpush3.bf16.msra.mxu1 %v3522_v21 }
 0x709   : > { %3524 = vmatprep.subr.bf16.mxu1 %v3671_v0 }
 0x70c   : > { %3526 = vmatpush3.bf16.msra.mxu1 %v3525_v26 }
 0x70d   : > { %3393 = vmatprep.subr.mxu1 %v3673_v1 }
 0x70f   : > { %3386 = vmatmul.mubr.msk.f32.vlgmr.msra.gmra.mrb[18].mxu1 %vm797_vm1, %v778_v61 }
 0x710   : > { %3395 = vmatprep.mubr.msk.f32.mxu1 %vm3672_vm0, %v3673_v1 }
 0x71b   : > { %v2207_v27 = vpop.permute.xlu0 %2206 }
 0x71f   : > { %v2374_v28 = vpop.permute.xlu0 %2373 }
 0x723   : > { %v2540_v31 = vpop.permute.xlu0 %2539 }
 0x7da   : > { %v1888_v23 = vpop.f32.mrb[16].mxu1 }
 0x7db   : > { %v1892_v24 = vmul.f32 0.17677669, %v1888_v23  ;;  %v3365_v25 = vpop.f32.mrb[17].mxu1 }
 0x7dd   : > { %2204 = vrot.lane.b32.xlu1 %v1892_v24, %s4332_s28  ;;  %3391 = vmatmul.mubr.msk.f32.vlgmr.msra.gmra.mrb[10].mxu0 %vm1013_vm2, %v1892_v24 }
 0x7de   : > { %3399 = vmatpush3.xpose.msk.msra.mxu0 %vm1013_vm2, %v2207_v27  ;;  %3400 = vmatprep.mubr.msk.f32.mxu0 %vm3672_vm0, %v3673_v1 }
 0x7df   : > { %3408 = vmatprep.subr.mxu0 %v3673_v1 }
 0x7e1   : > { %2371 = vrot.lane.b32.xlu1 %v1892_v24, %s4333_s29 }
 0x7e2   : > { %v2032_v44 = vpop.f32.mrb[18].mxu1 }
 0x7e3   : > { %v3387_v45 = vpop.f32.mrb[19].mxu1  ;;  %3394 = vmatpush3.msra.mxu1 %v2032_v44 }
 0x7e4   : > { %3403 = vmatprep.subr.mxu1 %v3673_v1 }
 0x7e5   : > { %2537 = vrot.lane.b32.xlu1 %v1892_v24, %s4334_s27 }
 0x84f   : > { %v2205_v29 = vpop.permute.xlu1 %2204 }
 0x850   : > { %3401 = vmatmul.mubr.msk.f32.vlgmr.msra.gmra.mrb[12].mxu0 %vm1013_vm2, %v2205_v29 }
 0x851   : > { %3409 = vmatpush3.xpose.msk.msra.mxu0 %vm1013_vm2, %v2374_v28  ;;  %3410 = vmatprep.mubr.msk.f32.mxu0 %vm3672_vm0, %v3673_v1 }
 0x852   : > { %3418 = vmatprep.subr.mxu0 %v3673_v1 }
 0x853   : > { %v2372_v30 = vpop.permute.xlu1 %2371 }
 0x854   : > { %3411 = vmatmul.mubr.msk.f32.vlgmr.msra.gmra.mrb[14].mxu0 %vm1013_vm2, %v2372_v30 }
 0x855   : > { %3419 = vmatpush3.xpose.msk.msra.mxu0 %vm1013_vm2, %v2540_v31  ;;  %3420 = vmatprep.mubr.msk.f32.mxu0 %vm3672_vm0, %v3673_v1 }
 0x856   : > { %3527 = vmatprep.subr.bf16.mxu0 %v3671_v0 }
 0x857   : > { %v2538_v32 = vpop.permute.xlu1 %2537 }
 0x858   : > { %3421 = vmatmul.mubr.msk.f32.vlgmr.msra.gmra.mrb[16].mxu0 %vm1013_vm2, %v2538_v32 }
 0x859   : > { %3436 = vmatprep.mubr.msk.f32.mxu0 %vm3672_vm0, %v3673_v1  ;;  %3529 = vmatpush3.bf16.msra.mxu0 %v3528_v36  ;;  %v2847_v36 = vld [vmem:[%s4287_s20 + $0x78] sm:$0xff] }
 0x85a   : > { %3530 = vmatprep.subr.bf16.mxu0 %v3671_v0 }
 0x85d   : > { %3532 = vmatpush3.bf16.msra.mxu0 %v3531_v39 }
 0x85e   : > { %3539 = vmatprep.subr.bf16.mxu0 %v3671_v0 }
 0x8b0   : > { %v2109_v40 = vpop.f32.mrb[10].mxu0 }
 0x8b1   : > { %v2119_v41 = vsel %vm2118_vm7, -1e+20, %v2109_v40  ;;  %v3392_v42 = vpop.f32.mrb[11].mxu0 }
 0x8b2   : > { %v2120_v43 = vsel %vm1013_vm2, %v2119_v41, -inf }
 0x8b3   : > { %2121 = vmax.xlane.f32.xlu0 %v2120_v43 }
 0x923   : > { %v2278_v46 = vpop.f32.mrb[12].mxu0 }
 0x924   : > { %v2282_v47 = vsel %vm2118_vm7, -1e+20, %v2278_v46  ;;  %v3402_v48 = vpop.f32.mrb[13].mxu0 }
 0x925   : > { %v2283_v49 = vsel %vm1013_vm2, %v2282_v47, -inf }
 0x926   : > { %2284 = vmax.xlane.f32.xlu1 %v2283_v49 }
 0x927   : > { %v2445_v50 = vpop.f32.mrb[14].mxu0 }
 0x928   : > { %v2449_v51 = vsel %vm2118_vm7, -1e+20, %v2445_v50  ;;  %v3412_v52 = vpop.f32.mrb[15].mxu0 }
 0x929   : > { %v2450_v53 = vsel %vm1013_vm2, %v2449_v51, -inf  ;;  %v3166_v52 = vld [vmem:[%s4282_s15] ss:$0 sm:$0xff] }
 0x92a   : > { %2451 = vmax.xlane.f32.xlu0 %v2450_v53 }
 0x92b   : > { %v2611_v54 = vpop.f32.mrb[16].mxu0 }
 0x92c   : > { %v2615_v55 = vsel %vm2118_vm7, -1e+20, %v2611_v54  ;;  %v3422_v56 = vpop.f32.mrb[17].mxu0 }
 0x92d   : > { %v2616_v57 = vsel %vm1013_vm2, %v2615_v55, -inf }
 0x92e   : > { %2617 = vmax.xlane.f32.xlu0 %v2616_v57 }
 0x937   : > { %2295 = vrot.lane.b32.xlu1 %v2032_v44, %s4332_s28 }
 0x940   : > { %v2122_v10 = vpop.xlane.xlu0 %2121 }
 0x941   : > { %v2123_v58 = vsub.f32 %v2119_v41, %v2122_v10 }
 0x943   : > { %v2124_v59 = vmul.f32 1.442695, %v2123_v58 }
 0x945   : > { %3610 = vpow2.f32 %v2124_v59 }
 0x94f   : > { %v3611_v60 = vpop.eup %3610 }
 0x950   : > { %v2126_v61 = vsel %vm1013_vm2, %v3611_v60, 0.0 }
 0x95b   : > { %2127 = vadd.xlane.f32.xlu1 %v2126_v61 }
 0x9b3   : > { %v2285_v62 = vpop.xlane.xlu1 %2284 }
 0x9b4   : > { %v2286_v63 = vsub.f32 %v2282_v47, %v2285_v62  ;;  %v2828_v62 = vld [vmem:[%s4285_s18 + $0x8] sm:$0xff] }
 0x9b6   : > { %v2287_v2 = vmul.f32 1.442695, %v2286_v63 }
 0x9b7   : > { %v2452_v3 = vpop.xlane.xlu0 %2451  ;;  %v2296_v17 = vpop.permute.xlu1 %2295 }
 0x9b8   : > { %3612 = vpow2.f32 %v2287_v2  ;;  %v2453_v4 = vsub.f32 %v2449_v51, %v2452_v3  ;;  %v2830_v2 = vld [vmem:[%s4285_s18 + $0x18] sm:$0xff] }
 0x9ba   : > { %v2454_v5 = vmul.f32 1.442695, %v2453_v4  ;;  %v2832_v4 = vld [vmem:[%s4287_s20] sm:$0xff] }
 0x9bb   : > { %v2618_v6 = vpop.xlane.xlu0 %2617 }
 0x9bc   : > { %3614 = vpow2.f32 %v2454_v5  ;;  %v2619_v7 = vsub.f32 %v2615_v55, %v2618_v6  ;;  %v2833_v5 = vld [vmem:[%s4287_s20 + $0x8] sm:$0xff]  ;;  %v2834_v6 = vld [vmem:[%s4287_s20 + $0x10] sm:$0xff] }
 0x9be   : > { %v2620_v8 = vmul.f32 1.442695, %v2619_v7  ;;  %v3540_v7 = vpack.c.bf16 %v2833_v5, %v2832_v4 }
 0x9c0   : > { %3616 = vpow2.f32 %v2620_v8  ;;  %v2835_v8 = vld [vmem:[%s4287_s20 + $0x18] sm:$0xff] }
 0x9c2   : > { %v3613_v9 = vpop.eup %3612 }
 0x9c3   : > { %v2289_v11 = vsel %vm1013_vm2, %v3613_v9, 0.0 }
 0x9c4   : > { %2290 = vadd.xlane.f32.xlu0 %v2289_v11  ;;  %v2836_v11 = vld [vmem:[%s4287_s20 + $0x20] sm:$0xff] }
 0x9c6   : > { %v3615_v12 = vpop.eup %3614 }
 0x9c7   : > { %v2456_v13 = vsel %vm1013_vm2, %v3615_v12, 0.0 }
 0x9c8   : > { %2457 = vadd.xlane.f32.xlu1 %v2456_v13 }
 0x9ca   : > { %v3617_v14 = vpop.eup %3616 }
 0x9cb   : > { %v2622_v16 = vsel %vm1013_vm2, %v3617_v14, 0.0 }
 0x9cc   : > { %2623 = vadd.xlane.f32.xlu0 %v2622_v16  ;;  %v2839_v16 = vld [vmem:[%s4287_s20 + $0x38] sm:$0xff] }
 0x9d9   : > { %2627 = vrot.lane.b32.xlu1 %v2032_v44, %s4334_s27 }
 0x9e2   : > { %2461 = vrot.lane.b32.xlu0 %v2032_v44, %s4333_s29 }
 0x9e8   : > { %v2128_v18 = vpop.xlane.xlu1 %2127 }
 0x9e9   : > { %3618 = vrcp.f32 %v2128_v18  ;;  %v2840_v18 = vld [vmem:[%s4287_s20 + $0x40] sm:$0xff] }
 0x9f3   : > { %v3619_v19 = vpop.eup %3618 }
 0x9f4   : > { %v2130_v20 = vmul.f32 %v3619_v19, %v3611_v60  ;;  %v2841_v19 = vld [vmem:[%s4287_s20 + $0x48] sm:$0xff] }
 0x9f6   : > { %3396 = vmatmul.mubr.msk.f32.vlgmr.msra.gmra.mrb[20].mxu1 %vm1013_vm2, %v2130_v20  ;;  %v3552_v20 = vpack.c.bf16 %v2841_v19, %v2840_v18 }
 0x9f7   : > { %3404 = vmatpush3.msra.mxu1 %v2296_v17  ;;  %3405 = vmatprep.mubr.msk.f32.mxu1 %vm3672_vm0, %v3673_v1 }
 0x9f8   : > { %3413 = vmatprep.subr.mxu1 %v3673_v1 }
 0xa51   : > { %v2291_v21 = vpop.xlane.xlu0 %2290 }
 0xa52   : > { %3620 = vrcp.f32 %v2291_v21  ;;  %v2842_v21 = vld [vmem:[%s4287_s20 + $0x50] sm:$0xff] }
 0xa55   : > { %v2458_v22 = vpop.xlane.xlu1 %2457 }
 0xa56   : > { %3622 = vrcp.f32 %v2458_v22  ;;  %v2843_v22 = vld [vmem:[%s4287_s20 + $0x58] sm:$0xff] }
 0xa59   : > { %v2624_v23 = vpop.xlane.xlu0 %2623  ;;  %v2628_v29 = vpop.permute.xlu1 %2627 }
 0xa5a   : > { %3624 = vrcp.f32 %v2624_v23  ;;  %v3555_v23 = vpack.c.bf16 %v2843_v22, %v2842_v21 }
 0xa5c   : > { %v3621_v24 = vpop.eup %3620 }
 0xa5d   : > { %v2293_v25 = vmul.f32 %v3621_v24, %v3613_v9  ;;  %v2462_v26 = vpop.permute.xlu0 %2461  ;;  %v3543_v9 = vpack.c.bf16 %v2835_v8, %v2834_v6  ;;  %v2844_v24 = vld [vmem:[%s4287_s20 + $0x60] sm:$0xff] }
 0xa5f   : > { %3406 = vmatmul.mubr.msk.f32.vlgmr.msra.gmra.mrb[22].mxu1 %vm1013_vm2, %v2293_v25  ;;  %v2845_v25 = vld [vmem:[%s4287_s20 + $0x68] sm:$0xff] }
 0xa60   : > { %v3623_v27 = vpop.eup %3622  ;;  %3414 = vmatpush3.msra.mxu1 %v2462_v26  ;;  %3415 = vmatprep.mubr.msk.f32.mxu1 %vm3672_vm0, %v3673_v1  ;;  %v3558_v26 = vpack.c.bf16 %v2845_v25, %v2844_v24 }
 0xa61   : > { %v2460_v28 = vmul.f32 %v3623_v27, %v3615_v12  ;;  %3423 = vmatprep.subr.mxu1 %v3673_v1  ;;  %v2837_v12 = vld [vmem:[%s4287_s20 + $0x28] sm:$0xff] }
 0xa62   : > { %v3546_v13 = vpack.c.bf16 %v2837_v12, %v2836_v11 }
 0xa63   : > { %3416 = vmatmul.mubr.msk.f32.vlgmr.msra.gmra.mrb[24].mxu1 %vm1013_vm2, %v2460_v28 }
 0xa64   : > { %v3625_v30 = vpop.eup %3624  ;;  %3424 = vmatpush3.msra.mxu1 %v2628_v29  ;;  %3425 = vmatprep.mubr.msk.f32.mxu1 %vm3672_vm0, %v3673_v1 }
 0xa65   : > { %v2626_v31 = vmul.f32 %v3625_v30, %v3617_v14  ;;  %3533 = vmatprep.subr.bf16.mxu1 %v3671_v0  ;;  %v2838_v14 = vld [vmem:[%s4287_s20 + $0x30] sm:$0xff] }
 0xa66   : > { %v3549_v17 = vpack.c.bf16 %v2839_v16, %v2838_v14 }
 0xa67   : > { %3426 = vmatmul.mubr.msk.f32.vlgmr.msra.gmra.mrb[26].mxu1 %vm1013_vm2, %v2626_v31  ;;  %v3168_v31 = vld [vmem:[%s4283_s16] ss:$0 sm:$0xff] }
 0xa68   : > { %3447 = vmatprep.mubr.msk.f32.mxu1 %vm3672_vm0, %v3673_v1 }
 0xac9   : > { %v2200_v32 = vpop.f32.mrb[20].mxu1 }
 0xaca   : > { %v3397_v33 = vpop.f32.mrb[21].mxu1 }
 0xacb   : > { %v3169_v33 = vld [vmem:[%s4284_s17] ss:$0 sm:$0xff] }
 0xb32   : > { %v2367_v40 = vpop.f32.mrb[22].mxu1 }
 0xb33   : > { %2704 = vrot.lane.b32.xlu1 %v2367_v40, %s4336_s25  ;;  %v3407_v41 = vpop.f32.mrb[23].mxu1 }
 0xb36   : > { %v2533_v42 = vpop.f32.mrb[24].mxu1 }
 0xb37   : > { %2708 = vrot.lane.b32.xlu0 %v2533_v42, %s4337_s1  ;;  %v3417_v43 = vpop.f32.mrb[25].mxu1 }
 0xb38   : > { %v3172_v43 = vld [vmem:[%s4288_s21] ss:$0 sm:$0xff] }
 0xb3a   : > { %v2699_v44 = vpop.f32.mrb[26].mxu1 }
 0xb3b   : > { %2712 = vrot.lane.b32.xlu1 %v2699_v44, %s4338_s2  ;;  %v3427_v45 = vpop.f32.mrb[27].mxu1 }
 0xba5   : > { %v2705_v46 = vpop.permute.xlu1 %2704 }
 0xba6   : > { %v2715_v48 = vsel %vm1013_vm2, %v2200_v32, %v2705_v46 }
 0xba9   : > { %v2709_v47 = vpop.permute.xlu0 %2708 }
 0xbaa   : > { %v2716_v49 = vsel %vm1687_vm4, %v2715_v48, %v2709_v47 }
 0xbad   : > { %v2713_v50 = vpop.permute.xlu1 %2712 }
 0xbae   : > { %v2717_v51 = vsel %vm1689_vm5, %v2716_v49, %v2713_v50 }
 0xbaf   : > { %3437 = vmatmul.mubr.msk.f32.vlgmr.msra.gmra.mrb[18].mxu0 %vm797_vm1, %v2717_v51 }
 0xbb0   : > { %3482 = vmatprep.mubr.msk.f32.mxu0 %vm3672_vm0, %v3673_v1  ;;  %v2827_v1 = vld [vmem:[%s4285_s18] sm:$0xff]  ;;  %3541 = vmatpush3.bf16.msra.mxu0 %v3540_v7 }
 0xbb1   : > { %v3534_v63 = vpack.c.bf16 %v2828_v62, %v2827_v1  ;;  %3542 = vmatprep.subr.bf16.mxu0 %v3671_v0 }
 0xbb3   : > { %3535 = vmatpush3.bf16.msra.mxu1 %v3534_v63 }
 0xbb4   : > { %3536 = vmatprep.subr.bf16.mxu1 %v3671_v0  ;;  %3544 = vmatpush3.bf16.msra.mxu0 %v3543_v9 }
 0xbb5   : > { %3545 = vmatprep.subr.bf16.mxu0 %v3671_v0 }
 0xbb8   : > { %3547 = vmatpush3.bf16.msra.mxu0 %v3546_v13 }
 0xbb9   : > { %3548 = vmatprep.subr.bf16.mxu0 %v3671_v0 }
 0xbbc   : > { %3550 = vmatpush3.bf16.msra.mxu0 %v3549_v17 }
 0xbbd   : > { %3551 = vmatprep.subr.bf16.mxu0 %v3671_v0 }
 0xbc0   : > { %3553 = vmatpush3.bf16.msra.mxu0 %v3552_v20 }
 0xbc1   : > { %3554 = vmatprep.subr.bf16.mxu0 %v3671_v0 }
 0xbc4   : > { %3556 = vmatpush3.bf16.msra.mxu0 %v3555_v23 }
 0xbc5   : > { %3557 = vmatprep.subr.bf16.mxu0 %v3671_v0 }
 0xbc8   : > { %3559 = vmatpush3.bf16.msra.mxu0 %v3558_v26 }
 0xbc9   : > { %3560 = vmatprep.subr.bf16.mxu0 %v3671_v0  ;;  %v2846_v0 = vld [vmem:[%s4287_s20 + $0x70] sm:$0xff] }
 0xbca   : > { %v3561_v37 = vpack.c.bf16 %v2847_v36, %v2846_v0 }
 0xbcc   : > { %3562 = vmatpush3.bf16.msra.mxu0 %v3561_v37 }
 0xc82   : > { %v2793_v53 = vpop.f32.mrb[18].mxu0 }
 0xc83   : > { %v2794_v54 = vadd.f32 %v3166_v52, %v2793_v53  ;;  %v3438_v55 = vpop.f32.mrb[19].mxu0 }
 0xc85   : > { %v2799_v56 = vadd.f32 %v2794_v54, %v4060_v15  ;;  %v2829_v15 = vld [vmem:[%s4285_s18 + $0x10] sm:$0xff] }
 0xc86   : > { %v3537_v3 = vpack.c.bf16 %v2830_v2, %v2829_v15 }
 0xc87   : > { %v2800_v57 = vsel %vm797_vm1, %v2799_v56, 0.0 }
 0xc88   : > { %2801 = vadd.xlane.f32.xlu0 %v2800_v57  ;;  %3538 = vmatpush3.bf16.msra.mxu1 %v3537_v3 }
 0xd15   : > { %v2802_v10 = vpop.xlane.xlu0 %2801 }
 0xd16   : > { %v2803_v58 = vmul.f32 0.03125, %v2802_v10  ;;  %v3173_v10 = vld [vmem:[%s4289_s22] ss:$0 sm:$0xff] }
 0xd18   : > { %v2804_v59 = vsub.f32 %v2799_v56, %v2803_v58 }
 0xd1a   : > { %v2805_v60 = vmul.f32 %v2804_v59, %v2804_v59 }
 0xd1c   : > { %v2806_v61 = vsel %vm797_vm1, %v2805_v60, 0.0 }
 0xd1d   : > { %2807 = vadd.xlane.f32.xlu1 %v2806_v61 }
 0xdaa   : > { %v2808_v27 = vpop.xlane.xlu1 %2807 }
 0xdab   : > { %v2809_v28 = vmul.f32 0.03125, %v2808_v27 }
 0xdad   : > { %v2810_v29 = vadd.f32 1e-05, %v2809_v28 }
 0xdaf   : > { %3626 = vrsqrt.f32 %v2810_v29 }
 0xdb9   : > { %v3627_v30 = vpop.eup %3626 }
 0xdba   : > { %v2812_v32 = vmul.f32 %v3627_v30, %v2804_v59  ;;  %v3174_v59 = vld [vmem:[#allocation2] ss:$0 sm:$0xff] }
 0xdbc   : > { %v2819_v34 = vmul.f32 %v3168_v31, %v2812_v32 }
 0xdbe   : > { %v2826_v35 = vadd.f32 %v3169_v33, %v2819_v34 }
 0xdc0   : > { %3448 = vmatmul.mubr.msk.f32.vlgmr.msra.gmra.mrb[28].mxu1 %vm797_vm1, %v2826_v35 }
 0xe93   : > { %v2924_v39 = vpop.f32.mrb[28].mxu1 }
 0xe94   : > { %v2925_v40 = vadd.f32 %v3170_v38, %v2924_v39  ;;  %v3449_v41 = vpop.f32.mrb[29].mxu1 }
 0xe96   : > { %v2928_v42 = vmax.f32 %v2925_v40, 0.0 }
 0xe98   : > { %3483 = vmatmul.mubr.f32.vlgmr.msra.gmra.mrb[20].mxu0 %v2928_v42 }
 0xf6b   : > { %v3001_v44 = vpop.f32.mrb[20].mxu0 }
 0xf6c   : > { %v3002_v45 = vadd.f32 %v3172_v43, %v3001_v44  ;;  %v3484_v46 = vpop.f32.mrb[21].mxu0 }
 0xf6e   : > { %v3007_v47 = vadd.f32 %v3002_v45, %v2826_v35 }
 0xf70   : > { %v3008_v48 = vsel %vm797_vm1, %v3007_v47, 0.0 }
 0xf71   : > { %3009 = vadd.xlane.f32.xlu0 %v3008_v48 }
 0xffe   : > { %v3010_v49 = vpop.xlane.xlu0 %3009 }
 0xfff   : > { %v3011_v50 = vmul.f32 0.03125, %v3010_v49 }
0x1001   : > { %v3012_v51 = vsub.f32 %v3007_v47, %v3011_v50 }
0x1003   : > { %v3013_v52 = vmul.f32 %v3012_v51, %v3012_v51 }
0x1005   : > { %v3014_v53 = vsel %vm797_vm1, %v3013_v52, 0.0 }
0x1006   : > { %3015 = vadd.xlane.f32.xlu0 %v3014_v53 }
0x1093   : > { %v3016_v54 = vpop.xlane.xlu0 %3015 }
0x1094   : > { %v3017_v55 = vmul.f32 0.03125, %v3016_v54 }
0x1096   : > { %v3018_v56 = vadd.f32 1e-05, %v3017_v55 }
0x1098   : > { %3628 = vrsqrt.f32 %v3018_v56 }
0x10a2   : > { %v3629_v57 = vpop.eup %3628 }
0x10a3   : > { %v3020_v58 = vmul.f32 %v3629_v57, %v3012_v51 }
0x10a5   : > { %v3027_v60 = vmul.f32 %v3173_v10, %v3020_v58 }
0x10a7   : > { %v3034_v61 = vadd.f32 %v3174_v59, %v3027_v60 }
0x10a9   : > { %3035 = vst.msk [vmem:[%s776_s0] sm:$0xff] %vm797_vm1, %v3034_v61 }
0x10aa PF: > { %s35_s5 = sadd.s32 1, %s3668_s5  }
0x10ab   : > { %p32_p2 = scmp.ge.s32.totalorder %s35_s5, 4  }
0x10ad   :  { %34 = sbr.rel (!%p32_p2) target bundleno = 11 (0xb), region = 157 }
0x10b4   :  { %3055 = vsyncpa [#allocation3], 1 }
0x10b5   :  { %3057 = vsyncpa [#allocation3 + $0x1], 1 }

</bundles_post_ra>
